<compile_context>
chip_gen: v7x
topology: tpu7x:2x2x1
jax: 0.10.0
libtpu: 0.0.40
codegen_flags: <defaults>
</compile_context>

<pallas_src>
import functools

import jax
import jax.numpy as jnp
from jax.experimental import pallas as pl
from jax.experimental.pallas import tpu as pltpu

# ---------------- problem sizes (small, consistent with the module) ----------------
BATCH = 2             # graphs per call (parallel grid axis)
N = 8                 # nodes
E = 2 * N             # directed edges (bidirectional ring)
DIM_NODE = 16
DIM_EDGE = 8
N_CENTERS_DIST = 12
N_CENTERS_ANGLE = 10
DIM_HIDDEN = 128      # Topo/Spat default dim_hidden (DMGCNLayer does not override it)
ALPHA = 0.8
EPS = 1e-12


# ------------------------------- fused Pallas kernel --------------------------------
def dmgcn_kernel(
    # graph structure (shared across the batch)
    s_src_ref, s_dst_ref, s_dst_t_ref, mask_flat_ref, upd_ref, indeg_ref,
    # per-graph features (one batch element per grid step)
    node_h_ref, edge_h_ref, dist_ref, cos_ref,
    # weights (linear chains pre-folded in the wrapper)
    w_ue_ref,
    t_wn_ref, t_bn_ref, t_wd_ref, t_bd_ref, t_wc1_ref, t_wec_ref, t_bec_ref,
    s_wm_ref, s_bm_ref, s_wd_ref, s_bd_ref, s_wa_ref, s_ba_ref, s_cent_ref,
    s_wc1_ref, s_wec_ref, s_bec_ref,
    # output
    out_ref,
    # VMEM scratch
    fa_ref, fd_ref, fmfd_ref, m_ref,
):
    dot = functools.partial(jnp.dot, preferred_element_type=jnp.float32)

    s_src = s_src_ref[...]        # [E,N]
    s_dst = s_dst_ref[...]        # [E,N]
    s_dst_t = s_dst_t_ref[...]    # [N,E]
    indeg = indeg_ref[...]        # [N,1]
    node_h0 = node_h_ref[...]     # [N,Dn]
    dist = dist_ref[...]          # [E,Cd]
    w_ue = w_ue_ref[...]          # [Dn,De]

    # ---- g.apply_edges(update_edges) #1:  e' = 0.8*e + 0.2*fc_ue(src_h * dst_h) ----
    src_h0 = dot(s_src, node_h0)
    dst_h0 = dot(s_dst, node_h0)
    edge_h1 = ALPHA * edge_h_ref[...] + (1.0 - ALPHA) * dot(src_h0 * dst_h0, w_ue)

    # ---- TopoConvLayer (fc_combine split + fc_edge chain folded offline) ----
    m1 = (dot(src_h0, t_wn_ref[...]) + t_bn_ref[...]) * \
         (dot(dist, t_wd_ref[...]) + t_bd_ref[...])                            # [E,H]
    m_topo = jnp.tanh(dot(m1, t_wc1_ref[...])
                      + dot(edge_h1, t_wec_ref[...]) + t_bec_ref[...])         # [E,Dn]
    agg_t = dot(s_dst_t, m_topo)                                               # [N,Dn]
    node_h1 = jnp.where(
        indeg > 0.0,
        agg_t * jax.lax.rsqrt(jnp.sum(agg_t * agg_t, axis=1, keepdims=True) + EPS),
        node_h0)

    # ---- g.apply_edges(update_edges) #2 (uses updated node and edge features) ----
    src_h1 = dot(s_src, node_h1)
    dst_h1 = dot(s_dst, node_h1)
    edge_h2 = ALPHA * edge_h1 + (1.0 - ALPHA) * dot(src_h1 * dst_h1, w_ue)

    # ---- SpatConvLayer prologue (everything loop-invariant, off the serial path) ----
    # angle RBF built in-kernel from pairwise cosines and projected ONCE:
    #   one [E*E,Ca]x[Ca,H] matmul into VMEM scratch (no per-iteration tiny matmuls,
    #   no [B,E*E,Ca] HBM tensor).
    arbf = jnp.exp(-0.5 * (cos_ref[...] - s_cent_ref[...]) ** 2)               # [E*E,Ca]
    fa_ref[...] = dot(arbf, s_wa_ref[...]) + s_ba_ref[...]                     # [E*E,H]

    fd_ref[...] = dot(dist, s_wd_ref[...]) + s_bd_ref[...]                     # [E,H]
    fe_c = dot(edge_h2, s_wec_ref[...]) + s_bec_ref[...]                       # [E,Dn]

    wm = s_wm_ref[...]            # [Dn,H]
    bm = s_bm_ref[...]            # [1,H]
    wc1 = s_wc1_ref[...]          # [H,Dn]

    ne = edge_h_ref.shape[0]
    m_ref[...] = m_topo                                   # edge-message buffer [E,Dn]
    fmfd_ref[...] = (dot(m_topo, wm) + bm) * fd_ref[...]  # fc_msg(m)*fc_dist(d) [E,H]

    # Sequential in-place per-edge update, fully unrolled (matches the Python loop in
    # SpatConvLayer.msg_func: later edges see already-updated rows of m).  All row
    # selection is static-offset VMEM slicing / masked VPU reduces; only 2 small MXU
    # matmuls remain on the per-iteration critical path.
    for i in range(ne):
        lo = i * ne
        fa_i = fa_ref[lo:lo + ne, :]                                           # [E,H]
        contrib = jnp.tanh(dot(fmfd_ref[...] * fa_i, wc1) + fe_c)              # [E,Dn]

        mask_i = mask_flat_ref[lo:lo + ne, :]                                  # [E,1]
        m_tmp = jnp.sum(mask_i * contrib, axis=0, keepdims=True)               # [1,Dn]

        m_old = m_ref[i:i + 1, :]                                              # [1,Dn]
        upd_i = upd_ref[i:i + 1, :]                                            # [1,1]
        # m[i] = 0.8*m[i] + 0.2*m_tmp  (only if edge i has valid predecessors)
        m_new = m_old + (1.0 - ALPHA) * upd_i * (m_tmp - m_old)                # [1,Dn]
        m_ref[i:i + 1, :] = m_new

        # incremental fc_msg refresh: only row i of fm*fd changes
        fmfd_ref[i:i + 1, :] = (dot(m_new, wm) + bm) * fd_ref[i:i + 1, :]      # [1,H]

    # reduce: sum incoming (final) messages per destination node, L2-normalize
    agg_s = dot(s_dst_t, m_ref[...])                                           # [N,Dn]
    out_ref[...] = jnp.where(
        indeg > 0.0,
        agg_s * jax.lax.rsqrt(jnp.sum(agg_s * agg_s, axis=1, keepdims=True) + EPS),
        node_h1)


# ------------------------------- pallas_call glue ------------------------------------
def _shared_spec(a):
    nd = a.ndim
    return pl.BlockSpec(tuple(a.shape), lambda b, nd=nd: (0,) * nd)


def _batched_spec(a):
    nd = a.ndim
    return pl.BlockSpec((None,) + tuple(a.shape[1:]),
                        lambda b, nd=nd: (b,) + (0,) * (nd - 1))


def dmgcn_pallas(weights, graph, node_h, edge_h, dist, cos_flat):
    s_src, s_dst, s_dst_t, mask_flat, upd, indeg = graph
    batch, n_nodes, dim_node = node_h.shape
    ne = edge_h.shape[1]

    shared = (s_src, s_dst, s_dst_t, mask_flat, upd, indeg)
    batched = (node_h, edge_h, dist, cos_flat)

    in_specs = ([_shared_spec(a) for a in shared]
                + [_batched_spec(a) for a in batched]
                + [_shared_spec(a) for a in weights])

    return pl.pallas_call(
        dmgcn_kernel,
        grid=(batch,),
        in_specs=in_specs,
        out_specs=pl.BlockSpec((None, n_nodes, dim_node), lambda b: (b, 0, 0)),
        out_shape=jax.ShapeDtypeStruct((batch, n_nodes, dim_node), jnp.float32),
        scratch_shapes=[
            pltpu.VMEM((ne * ne, DIM_HIDDEN), jnp.float32),   # fa   (angle projection)
            pltpu.VMEM((ne, DIM_HIDDEN), jnp.float32),        # fd   (fc_dist)
            pltpu.VMEM((ne, DIM_HIDDEN), jnp.float32),        # fmfd (fc_msg*fc_dist)
            pltpu.VMEM((ne, dim_node), jnp.float32),          # m    (edge messages)
        ],
        compiler_params=pltpu.CompilerParams(dimension_semantics=("parallel",)),
    )(*shared, *batched, *weights)


# ------------------------------- parameters ------------------------------------------
def _init_params(key):
    def lin(k, din, dout, bias=True, scale=0.1):
        kw, kb = jax.random.split(k)
        w = scale * jax.random.normal(kw, (din, dout), jnp.float32)
        if not bias:
            return w
        b = scale * jax.random.normal(kb, (1, dout), jnp.float32)
        return w, b

    ks = jax.random.split(key, 10)
    p = {}
    p['w_ue'] = lin(ks[0], DIM_NODE, DIM_EDGE, bias=False)                  # fc_update_edge
    # TopoConvLayer
    p['t_w_node'], p['t_b_node'] = lin(ks[1], DIM_NODE, DIM_HIDDEN)
    p['t_w_dist'], p['t_b_dist'] = lin(ks[2], N_CENTERS_DIST, DIM_HIDDEN)
    p['t_w_edge'], p['t_b_edge'] = lin(ks[3], DIM_EDGE, DIM_HIDDEN)
    p['t_wc'] = lin(ks[4], 2 * DIM_HIDDEN, DIM_NODE, bias=False)            # stacked fc_combine
    # SpatConvLayer
    p['s_w_msg'], p['s_b_msg'] = lin(ks[5], DIM_NODE, DIM_HIDDEN)
    p['s_w_dist'], p['s_b_dist'] = lin(ks[6], N_CENTERS_DIST, DIM_HIDDEN)
    p['s_w_angle'], p['s_b_angle'] = lin(ks[7], N_CENTERS_ANGLE, DIM_HIDDEN)
    p['s_w_edge'], p['s_b_edge'] = lin(ks[8], DIM_EDGE, DIM_HIDDEN)
    wc = lin(ks[9], 2 * DIM_HIDDEN, DIM_NODE, bias=False)
    p['s_wc1'], p['s_wc2'] = wc[:DIM_HIDDEN], wc[DIM_HIDDEN:]
    p['centers'] = jnp.linspace(-1.0, 1.0, N_CENTERS_ANGLE,
                                dtype=jnp.float32).reshape(1, N_CENTERS_ANGLE)
    return p


def _fold_weights(p):
    """Fold the purely-linear weight chains (algebraically exact)."""
    h = DIM_HIDDEN
    t_wc1 = p['t_wc'][:h]                                 # [H,Dn]
    t_wc2 = p['t_wc'][h:]                                 # [H,Dn]
    t_wec = jnp.dot(p['t_w_edge'], t_wc2)                 # [De,Dn]  fc_edge∘fc_combine
    t_bec = jnp.dot(p['t_b_edge'], t_wc2)                 # [1,Dn]
    s_wec = jnp.dot(p['s_w_edge'], p['s_wc2'])            # [De,Dn]
    s_bec = jnp.dot(p['s_b_edge'], p['s_wc2'])            # [1,Dn]
    return (
        p['w_ue'],
        p['t_w_node'], p['t_b_node'], p['t_w_dist'], p['t_b_dist'],
        t_wc1, t_wec, t_bec,
        p['s_w_msg'], p['s_b_msg'], p['s_w_dist'], p['s_b_dist'],
        p['s_w_angle'], p['s_b_angle'], p['centers'],
        p['s_wc1'], s_wec, s_bec,
    )


# ------------------------- graph structure (precomputed once) ------------------------
def precompute_graph(src, dst, n_nodes):
    """Feature-independent graph tensors, computed once and reused every forward."""
    ne = src.shape[0]
    s_src = jax.nn.one_hot(src, n_nodes, dtype=jnp.float32)                 # [E,N]
    s_dst = jax.nn.one_hot(dst, n_nodes, dtype=jnp.float32)                 # [E,N]
    s_dst_t = jnp.transpose(s_dst)                                          # [N,E]
    # mask[i,j] = 1 iff edge j flows into src(i) and src(j) != dst(i)  (the "wv" set)
    mask = ((dst[None, :] == src[:, None]) &
            (src[None, :] != dst[:, None])).astype(jnp.float32)             # [E,E]
    mask_flat = mask.reshape(ne * ne, 1)                                    # [E*E,1]
    upd = (jnp.sum(mask, axis=1, keepdims=True) > 0).astype(jnp.float32)    # [E,1]
    indeg = jnp.sum(s_dst, axis=0, keepdims=True).T                         # [N,1]
    return (s_src, s_dst, s_dst_t, mask_flat, upd, indeg)


# ------------------------------- DMGCNLayer.forward ----------------------------------
@jax.jit
def dmgcn_forward(params, graph, node_h, edge_h, dist, vec):
    b, ne = edge_h.shape[0], edge_h.shape[1]
    # pairwise edge-direction cosines; RBF + projection are done inside the kernel
    cos = jnp.einsum('bid,bjd->bij', vec, vec)                              # [B,E,E]
    cos_flat = cos.reshape(b, ne * ne, 1)                                   # [B,E*E,1]
    weights = _fold_weights(params)
    return dmgcn_pallas(weights, graph, node_h, edge_h, dist, cos_flat)


# ------------------------------------ main --------------------------------------------
if __name__ == "__main__":
    key = jax.random.PRNGKey(0)
    kp, kn, ke, kd, kv = jax.random.split(key, 5)
    params = _init_params(kp)

    # bidirectional ring graph: every node has in-degree 2 and every edge's source has
    # at least one predecessor other than the edge's destination (spat updates fire).
    src_list, dst_list = [], []
    for i in range(N):
        src_list += [i, (i + 1) % N]
        dst_list += [(i + 1) % N, i]
    src = jnp.array(src_list, dtype=jnp.int32)
    dst = jnp.array(dst_list, dtype=jnp.int32)
    graph = precompute_graph(src, dst, N)

    node_h = jax.random.normal(kn, (BATCH, N, DIM_NODE), jnp.float32)
    edge_h = jax.random.normal(ke, (BATCH, E, DIM_EDGE), jnp.float32)
    dist = jax.random.normal(kd, (BATCH, E, N_CENTERS_DIST), jnp.float32)
    vec = jax.random.normal(kv, (BATCH, E, 3), jnp.float32)
    vec = vec / jnp.linalg.norm(vec, axis=-1, keepdims=True)   # unit edge directions

    out = jax.block_until_ready(dmgcn_forward(params, graph, node_h, edge_h, dist, vec))
    assert out.shape == (BATCH, N, DIM_NODE)
    assert bool(jnp.all(jnp.isfinite(out)))
    print("KERNEL_OK")
</pallas_src>

<mosaic_0001>
module attributes {stable_mosaic.version = 11 : i64} {
  func.func @dmgcn_kernel(%arg0: i32, %arg1: memref<16x8xf32, #tpu.memory_space<vmem>>, %arg2: memref<16x8xf32, #tpu.memory_space<vmem>>, %arg3: memref<8x16xf32, #tpu.memory_space<vmem>>, %arg4: memref<256x1xf32, #tpu.memory_space<vmem>>, %arg5: memref<16x1xf32, #tpu.memory_space<vmem>>, %arg6: memref<8x1xf32, #tpu.memory_space<vmem>>, %arg7: memref<1x8x16xf32, #tpu.memory_space<vmem>>, %arg8: memref<1x16x8xf32, #tpu.memory_space<vmem>>, %arg9: memref<1x16x12xf32, #tpu.memory_space<vmem>>, %arg10: memref<1x256x1xf32, #tpu.memory_space<vmem>>, %arg11: memref<16x8xf32, #tpu.memory_space<vmem>>, %arg12: memref<16x128xf32, #tpu.memory_space<vmem>>, %arg13: memref<1x128xf32, #tpu.memory_space<vmem>>, %arg14: memref<12x128xf32, #tpu.memory_space<vmem>>, %arg15: memref<1x128xf32, #tpu.memory_space<vmem>>, %arg16: memref<128x16xf32, #tpu.memory_space<vmem>>, %arg17: memref<8x16xf32, #tpu.memory_space<vmem>>, %arg18: memref<1x16xf32, #tpu.memory_space<vmem>>, %arg19: memref<16x128xf32, #tpu.memory_space<vmem>>, %arg20: memref<1x128xf32, #tpu.memory_space<vmem>>, %arg21: memref<12x128xf32, #tpu.memory_space<vmem>>, %arg22: memref<1x128xf32, #tpu.memory_space<vmem>>, %arg23: memref<10x128xf32, #tpu.memory_space<vmem>>, %arg24: memref<1x128xf32, #tpu.memory_space<vmem>>, %arg25: memref<1x10xf32, #tpu.memory_space<vmem>>, %arg26: memref<128x16xf32, #tpu.memory_space<vmem>>, %arg27: memref<8x16xf32, #tpu.memory_space<vmem>>, %arg28: memref<1x16xf32, #tpu.memory_space<vmem>>, %arg29: memref<1x8x16xf32, #tpu.memory_space<vmem>>, %arg30: memref<256x128xf32, #tpu.memory_space<vmem>>, %arg31: memref<16x128xf32, #tpu.memory_space<vmem>>, %arg32: memref<16x128xf32, #tpu.memory_space<vmem>>, %arg33: memref<16x16xf32, #tpu.memory_space<vmem>>) attributes {dimension_semantics = [#tpu.dimension_semantics<parallel>], iteration_bounds = array<i64: 2>, scalar_prefetch = 0 : i64, scratch_operands = 4 : i64, tpu.core_type = #tpu.core_type<tc>, window_params = [{pipeline_mode = #tpu.pipeline_mode<synchronous>, transform_indices = @transform_0, window_bounds = array<i64: 16, 8>}, {pipeline_mode = #tpu.pipeline_mode<synchronous>, transform_indices = @transform_1, window_bounds = array<i64: 16, 8>}, {pipeline_mode = #tpu.pipeline_mode<synchronous>, transform_indices = @transform_2, window_bounds = array<i64: 8, 16>}, {pipeline_mode = #tpu.pipeline_mode<synchronous>, transform_indices = @transform_3, window_bounds = array<i64: 256, 1>}, {pipeline_mode = #tpu.pipeline_mode<synchronous>, transform_indices = @transform_4, window_bounds = array<i64: 16, 1>}, {pipeline_mode = #tpu.pipeline_mode<synchronous>, transform_indices = @transform_5, window_bounds = array<i64: 8, 1>}, {transform_indices = @transform_6, window_bounds = array<i64: 1, 8, 16>}, {transform_indices = @transform_7, window_bounds = array<i64: 1, 16, 8>}, {transform_indices = @transform_8, window_bounds = array<i64: 1, 16, 12>}, {transform_indices = @transform_9, window_bounds = array<i64: 1, 256, 1>}, {pipeline_mode = #tpu.pipeline_mode<synchronous>, transform_indices = @transform_10, window_bounds = array<i64: 16, 8>}, {pipeline_mode = #tpu.pipeline_mode<synchronous>, transform_indices = @transform_11, window_bounds = array<i64: 16, 128>}, {pipeline_mode = #tpu.pipeline_mode<synchronous>, transform_indices = @transform_12, window_bounds = array<i64: 1, 128>}, {pipeline_mode = #tpu.pipeline_mode<synchronous>, transform_indices = @transform_13, window_bounds = array<i64: 12, 128>}, {pipeline_mode = #tpu.pipeline_mode<synchronous>, transform_indices = @transform_14, window_bounds = array<i64: 1, 128>}, {pipeline_mode = #tpu.pipeline_mode<synchronous>, transform_indices = @transform_15, window_bounds = array<i64: 128, 16>}, {pipeline_mode = #tpu.pipeline_mode<synchronous>, transform_indices = @transform_16, window_bounds = array<i64: 8, 16>}, {pipeline_mode = #tpu.pipeline_mode<synchronous>, transform_indices = @transform_17, window_bounds = array<i64: 1, 16>}, {pipeline_mode = #tpu.pipeline_mode<synchronous>, transform_indices = @transform_18, window_bounds = array<i64: 16, 128>}, {pipeline_mode = #tpu.pipeline_mode<synchronous>, transform_indices = @transform_19, window_bounds = array<i64: 1, 128>}, {pipeline_mode = #tpu.pipeline_mode<synchronous>, transform_indices = @transform_20, window_bounds = array<i64: 12, 128>}, {pipeline_mode = #tpu.pipeline_mode<synchronous>, transform_indices = @transform_21, window_bounds = array<i64: 1, 128>}, {pipeline_mode = #tpu.pipeline_mode<synchronous>, transform_indices = @transform_22, window_bounds = array<i64: 10, 128>}, {pipeline_mode = #tpu.pipeline_mode<synchronous>, transform_indices = @transform_23, window_bounds = array<i64: 1, 128>}, {pipeline_mode = #tpu.pipeline_mode<synchronous>, transform_indices = @transform_24, window_bounds = array<i64: 1, 10>}, {pipeline_mode = #tpu.pipeline_mode<synchronous>, transform_indices = @transform_25, window_bounds = array<i64: 128, 16>}, {pipeline_mode = #tpu.pipeline_mode<synchronous>, transform_indices = @transform_26, window_bounds = array<i64: 8, 16>}, {pipeline_mode = #tpu.pipeline_mode<synchronous>, transform_indices = @transform_27, window_bounds = array<i64: 1, 16>}, {transform_indices = @transform_28, window_bounds = array<i64: 1, 8, 16>}]} {
    %c0 = arith.constant 0 : index
    %c0_0 = arith.constant 0 : index
    %0 = vector.load %arg1[%c0, %c0_0] : memref<16x8xf32, #tpu.memory_space<vmem>>, vector<16x8xf32>
    %c0_1 = arith.constant 0 : index
    %c0_2 = arith.constant 0 : index
    %1 = vector.load %arg2[%c0_1, %c0_2] : memref<16x8xf32, #tpu.memory_space<vmem>>, vector<16x8xf32>
    %c0_3 = arith.constant 0 : index
    %c0_4 = arith.constant 0 : index
    %2 = vector.load %arg3[%c0_3, %c0_4] : memref<8x16xf32, #tpu.memory_space<vmem>>, vector<8x16xf32>
    %c0_5 = arith.constant 0 : index
    %c0_6 = arith.constant 0 : index
    %3 = vector.load %arg6[%c0_5, %c0_6] : memref<8x1xf32, #tpu.memory_space<vmem>>, vector<8x1xf32>
    %c0_7 = arith.constant 0 : index
    %c0_8 = arith.constant 0 : index
    %c0_9 = arith.constant 0 : index
    %4 = vector.load %arg7[%c0_7, %c0_8, %c0_9] : memref<1x8x16xf32, #tpu.memory_space<vmem>>, vector<1x8x16xf32>
    %5 = vector.shape_cast %4 : vector<1x8x16xf32> to vector<8x16xf32>
    %c0_10 = arith.constant 0 : index
    %c0_11 = arith.constant 0 : index
    %c0_12 = arith.constant 0 : index
    %6 = vector.load %arg9[%c0_10, %c0_11, %c0_12] : memref<1x16x12xf32, #tpu.memory_space<vmem>>, vector<1x16x12xf32>
    %7 = vector.shape_cast %6 : vector<1x16x12xf32> to vector<16x12xf32>
    %c0_13 = arith.constant 0 : index
    %c0_14 = arith.constant 0 : index
    %8 = vector.load %arg11[%c0_13, %c0_14] : memref<16x8xf32, #tpu.memory_space<vmem>>, vector<16x8xf32>
    %cst = arith.constant dense<0.000000e+00> : vector<16x16xf32>
    %9 = tpu.matmul %0, %5, %cst {dimension_numbers = #tpu.dot_dimension_numbers<[1], [0], [0], [1], [0, 0, 1, 1], [], []>} : vector<16x8xf32>, vector<8x16xf32>, vector<16x16xf32> -> vector<16x16xf32>
    %cst_15 = arith.constant dense<0.000000e+00> : vector<16x16xf32>
    %10 = tpu.matmul %1, %5, %cst_15 {dimension_numbers = #tpu.dot_dimension_numbers<[1], [0], [0], [1], [0, 0, 1, 1], [], []>} : vector<16x8xf32>, vector<8x16xf32>, vector<16x16xf32> -> vector<16x16xf32>
    %c0_16 = arith.constant 0 : index
    %c0_17 = arith.constant 0 : index
    %c0_18 = arith.constant 0 : index
    %11 = vector.load %arg8[%c0_16, %c0_17, %c0_18] : memref<1x16x8xf32, #tpu.memory_space<vmem>>, vector<1x16x8xf32>
    %12 = vector.shape_cast %11 : vector<1x16x8xf32> to vector<16x8xf32>
    %cst_19 = arith.constant 8.000000e-01 : f32
    %13 = vector.broadcast %cst_19 : f32 to vector<16x8xf32>
    %14 = arith.mulf %13, %12 : vector<16x8xf32>
    %15 = arith.mulf %9, %10 : vector<16x16xf32>
    %cst_20 = arith.constant dense<0.000000e+00> : vector<16x8xf32>
    %16 = tpu.matmul %15, %8, %cst_20 {dimension_numbers = #tpu.dot_dimension_numbers<[1], [0], [0], [1], [0, 0, 1, 1], [], []>} : vector<16x16xf32>, vector<16x8xf32>, vector<16x8xf32> -> vector<16x8xf32>
    %cst_21 = arith.constant 2.000000e-01 : f32
    %17 = vector.broadcast %cst_21 : f32 to vector<16x8xf32>
    %18 = arith.mulf %17, %16 : vector<16x8xf32>
    %19 = arith.addf %14, %18 : vector<16x8xf32>
    %c0_22 = arith.constant 0 : index
    %c0_23 = arith.constant 0 : index
    %20 = vector.load %arg12[%c0_22, %c0_23] : memref<16x128xf32, #tpu.memory_space<vmem>>, vector<16x128xf32>
    %cst_24 = arith.constant dense<0.000000e+00> : vector<16x128xf32>
    %21 = tpu.matmul %9, %20, %cst_24 {dimension_numbers = #tpu.dot_dimension_numbers<[1], [0], [0], [1], [0, 0, 1, 1], [], []>} : vector<16x16xf32>, vector<16x128xf32>, vector<16x128xf32> -> vector<16x128xf32>
    %c0_25 = arith.constant 0 : index
    %c0_26 = arith.constant 0 : index
    %22 = vector.load %arg13[%c0_25, %c0_26] : memref<1x128xf32, #tpu.memory_space<vmem>>, vector<1x128xf32>
    %23 = vector.broadcast %22 : vector<1x128xf32> to vector<16x128xf32>
    %24 = arith.addf %21, %23 : vector<16x128xf32>
    %c0_27 = arith.constant 0 : index
    %c0_28 = arith.constant 0 : index
    %25 = vector.load %arg14[%c0_27, %c0_28] : memref<12x128xf32, #tpu.memory_space<vmem>>, vector<12x128xf32>
    %cst_29 = arith.constant dense<0.000000e+00> : vector<16x128xf32>
    %26 = tpu.matmul %7, %25, %cst_29 {dimension_numbers = #tpu.dot_dimension_numbers<[1], [0], [0], [1], [0, 0, 1, 1], [], []>} : vector<16x12xf32>, vector<12x128xf32>, vector<16x128xf32> -> vector<16x128xf32>
    %c0_30 = arith.constant 0 : index
    %c0_31 = arith.constant 0 : index
    %27 = vector.load %arg15[%c0_30, %c0_31] : memref<1x128xf32, #tpu.memory_space<vmem>>, vector<1x128xf32>
    %28 = vector.broadcast %27 : vector<1x128xf32> to vector<16x128xf32>
    %29 = arith.addf %26, %28 : vector<16x128xf32>
    %30 = arith.mulf %24, %29 : vector<16x128xf32>
    %c0_32 = arith.constant 0 : index
    %c0_33 = arith.constant 0 : index
    %31 = vector.load %arg16[%c0_32, %c0_33] : memref<128x16xf32, #tpu.memory_space<vmem>>, vector<128x16xf32>
    %cst_34 = arith.constant dense<0.000000e+00> : vector<16x16xf32>
    %32 = tpu.matmul %30, %31, %cst_34 {dimension_numbers = #tpu.dot_dimension_numbers<[1], [0], [0], [1], [0, 0, 1, 1], [], []>} : vector<16x128xf32>, vector<128x16xf32>, vector<16x16xf32> -> vector<16x16xf32>
    %c0_35 = arith.constant 0 : index
    %c0_36 = arith.constant 0 : index
    %33 = vector.load %arg17[%c0_35, %c0_36] : memref<8x16xf32, #tpu.memory_space<vmem>>, vector<8x16xf32>
    %cst_37 = arith.constant dense<0.000000e+00> : vector<16x16xf32>
    %34 = tpu.matmul %19, %33, %cst_37 {dimension_numbers = #tpu.dot_dimension_numbers<[1], [0], [0], [1], [0, 0, 1, 1], [], []>} : vector<16x8xf32>, vector<8x16xf32>, vector<16x16xf32> -> vector<16x16xf32>
    %35 = arith.addf %32, %34 : vector<16x16xf32>
    %c0_38 = arith.constant 0 : index
    %c0_39 = arith.constant 0 : index
    %36 = vector.load %arg18[%c0_38, %c0_39] : memref<1x16xf32, #tpu.memory_space<vmem>>, vector<1x16xf32>
    %37 = vector.broadcast %36 : vector<1x16xf32> to vector<16x16xf32>
    %38 = arith.addf %35, %37 : vector<16x16xf32>
    %39 = math.tanh %38 : vector<16x16xf32>
    %cst_40 = arith.constant dense<0.000000e+00> : vector<8x16xf32>
    %40 = tpu.matmul %2, %39, %cst_40 {dimension_numbers = #tpu.dot_dimension_numbers<[1], [0], [0], [1], [0, 0, 1, 1], [], []>} : vector<8x16xf32>, vector<16x16xf32>, vector<8x16xf32> -> vector<8x16xf32>
    %cst_41 = arith.constant 0.000000e+00 : f32
    %41 = vector.broadcast %cst_41 : f32 to vector<8x1xf32>
    %42 = arith.cmpf ogt, %3, %41 : vector<8x1xf32>
    %43 = arith.mulf %40, %40 : vector<8x16xf32>
    %cst_42 = arith.constant dense<0.000000e+00> : vector<8xf32>
    %44 = vector.multi_reduction <add>, %43, %cst_42 [1] : vector<8x16xf32> to vector<8xf32>
    %45 = vector.shape_cast %44 : vector<8xf32> to vector<8x1xf32>
    %cst_43 = arith.constant 9.99999996E-13 : f32
    %46 = vector.broadcast %cst_43 : f32 to vector<8x1xf32>
    %47 = arith.addf %45, %46 : vector<8x1xf32>
    %48 = math.rsqrt %47 : vector<8x1xf32>
    %49 = vector.broadcast %48 : vector<8x1xf32> to vector<8x16xf32>
    %50 = arith.mulf %40, %49 : vector<8x16xf32>
    %51 = vector.shape_cast %42 : vector<8x1xi1> to vector<8x1xi1>
    %52 = vector.broadcast %51 : vector<8x1xi1> to vector<8x16xi1>
    %53 = arith.select %52, %50, %5 : vector<8x16xi1>, vector<8x16xf32>
    %cst_44 = arith.constant dense<0.000000e+00> : vector<16x16xf32>
    %54 = tpu.matmul %0, %53, %cst_44 {dimension_numbers = #tpu.dot_dimension_numbers<[1], [0], [0], [1], [0, 0, 1, 1], [], []>} : vector<16x8xf32>, vector<8x16xf32>, vector<16x16xf32> -> vector<16x16xf32>
    %cst_45 = arith.constant dense<0.000000e+00> : vector<16x16xf32>
    %55 = tpu.matmul %1, %53, %cst_45 {dimension_numbers = #tpu.dot_dimension_numbers<[1], [0], [0], [1], [0, 0, 1, 1], [], []>} : vector<16x8xf32>, vector<8x16xf32>, vector<16x16xf32> -> vector<16x16xf32>
    %cst_46 = arith.constant 8.000000e-01 : f32
    %56 = vector.broadcast %cst_46 : f32 to vector<16x8xf32>
    %57 = arith.mulf %56, %19 : vector<16x8xf32>
    %58 = arith.mulf %54, %55 : vector<16x16xf32>
    %cst_47 = arith.constant dense<0.000000e+00> : vector<16x8xf32>
    %59 = tpu.matmul %58, %8, %cst_47 {dimension_numbers = #tpu.dot_dimension_numbers<[1], [0], [0], [1], [0, 0, 1, 1], [], []>} : vector<16x16xf32>, vector<16x8xf32>, vector<16x8xf32> -> vector<16x8xf32>
    %cst_48 = arith.constant 2.000000e-01 : f32
    %60 = vector.broadcast %cst_48 : f32 to vector<16x8xf32>
    %61 = arith.mulf %60, %59 : vector<16x8xf32>
    %62 = arith.addf %57, %61 : vector<16x8xf32>
    %c0_49 = arith.constant 0 : index
    %c0_50 = arith.constant 0 : index
    %c0_51 = arith.constant 0 : index
    %63 = vector.load %arg10[%c0_49, %c0_50, %c0_51] : memref<1x256x1xf32, #tpu.memory_space<vmem>>, vector<1x256x1xf32>
    %64 = vector.shape_cast %63 : vector<1x256x1xf32> to vector<256x1xf32>
    %c0_52 = arith.constant 0 : index
    %c0_53 = arith.constant 0 : index
    %65 = vector.load %arg25[%c0_52, %c0_53] : memref<1x10xf32, #tpu.memory_space<vmem>>, vector<1x10xf32>
    %66 = vector.broadcast %64 : vector<256x1xf32> to vector<256x10xf32>
    %67 = vector.broadcast %65 : vector<1x10xf32> to vector<256x10xf32>
    %68 = arith.subf %66, %67 : vector<256x10xf32>
    %69 = arith.mulf %68, %68 : vector<256x10xf32>
    %cst_54 = arith.constant -5.000000e-01 : f32
    %70 = vector.broadcast %cst_54 : f32 to vector<256x10xf32>
    %71 = arith.mulf %70, %69 : vector<256x10xf32>
    %72 = math.exp %71 : vector<256x10xf32>
    %c0_55 = arith.constant 0 : index
    %c0_56 = arith.constant 0 : index
    %73 = vector.load %arg23[%c0_55, %c0_56] : memref<10x128xf32, #tpu.memory_space<vmem>>, vector<10x128xf32>
    %cst_57 = arith.constant dense<0.000000e+00> : vector<256x128xf32>
    %74 = tpu.matmul %72, %73, %cst_57 {dimension_numbers = #tpu.dot_dimension_numbers<[1], [0], [0], [1], [0, 0, 1, 1], [], []>} : vector<256x10xf32>, vector<10x128xf32>, vector<256x128xf32> -> vector<256x128xf32>
    %c0_58 = arith.constant 0 : index
    %c0_59 = arith.constant 0 : index
    %75 = vector.load %arg24[%c0_58, %c0_59] : memref<1x128xf32, #tpu.memory_space<vmem>>, vector<1x128xf32>
    %76 = vector.broadcast %75 : vector<1x128xf32> to vector<256x128xf32>
    %77 = arith.addf %74, %76 : vector<256x128xf32>
    %c0_60 = arith.constant 0 : index
    %c0_61 = arith.constant 0 : index
    %78 = vector.load %arg30[%c0_60, %c0_61] : memref<256x128xf32, #tpu.memory_space<vmem>>, vector<256x128xf32>
    tpu.vector_store %arg30[%c0_60, %c0_61], %77 {strides = array<i32>} : memref<256x128xf32, #tpu.memory_space<vmem>>, vector<256x128xf32>,
    %c0_62 = arith.constant 0 : index
    %c0_63 = arith.constant 0 : index
    %79 = vector.load %arg21[%c0_62, %c0_63] : memref<12x128xf32, #tpu.memory_space<vmem>>, vector<12x128xf32>
    %cst_64 = arith.constant dense<0.000000e+00> : vector<16x128xf32>
    %80 = tpu.matmul %7, %79, %cst_64 {dimension_numbers = #tpu.dot_dimension_numbers<[1], [0], [0], [1], [0, 0, 1, 1], [], []>} : vector<16x12xf32>, vector<12x128xf32>, vector<16x128xf32> -> vector<16x128xf32>
    %c0_65 = arith.constant 0 : index
    %c0_66 = arith.constant 0 : index
    %81 = vector.load %arg22[%c0_65, %c0_66] : memref<1x128xf32, #tpu.memory_space<vmem>>, vector<1x128xf32>
    %82 = vector.broadcast %81 : vector<1x128xf32> to vector<16x128xf32>
    %83 = arith.addf %80, %82 : vector<16x128xf32>
    %c0_67 = arith.constant 0 : index
    %c0_68 = arith.constant 0 : index
    %84 = vector.load %arg31[%c0_67, %c0_68] : memref<16x128xf32, #tpu.memory_space<vmem>>, vector<16x128xf32>
    tpu.vector_store %arg31[%c0_67, %c0_68], %83 {strides = array<i32>} : memref<16x128xf32, #tpu.memory_space<vmem>>, vector<16x128xf32>,
    %c0_69 = arith.constant 0 : index
    %c0_70 = arith.constant 0 : index
    %85 = vector.load %arg27[%c0_69, %c0_70] : memref<8x16xf32, #tpu.memory_space<vmem>>, vector<8x16xf32>
    %cst_71 = arith.constant dense<0.000000e+00> : vector<16x16xf32>
    %86 = tpu.matmul %62, %85, %cst_71 {dimension_numbers = #tpu.dot_dimension_numbers<[1], [0], [0], [1], [0, 0, 1, 1], [], []>} : vector<16x8xf32>, vector<8x16xf32>, vector<16x16xf32> -> vector<16x16xf32>
    %c0_72 = arith.constant 0 : index
    %c0_73 = arith.constant 0 : index
    %87 = vector.load %arg28[%c0_72, %c0_73] : memref<1x16xf32, #tpu.memory_space<vmem>>, vector<1x16xf32>
    %88 = vector.broadcast %87 : vector<1x16xf32> to vector<16x16xf32>
    %89 = arith.addf %86, %88 : vector<16x16xf32>
    %c0_74 = arith.constant 0 : index
    %c0_75 = arith.constant 0 : index
    %90 = vector.load %arg19[%c0_74, %c0_75] : memref<16x128xf32, #tpu.memory_space<vmem>>, vector<16x128xf32>
    %c0_76 = arith.constant 0 : index
    %c0_77 = arith.constant 0 : index
    %91 = vector.load %arg20[%c0_76, %c0_77] : memref<1x128xf32, #tpu.memory_space<vmem>>, vector<1x128xf32>
    %c0_78 = arith.constant 0 : index
    %c0_79 = arith.constant 0 : index
    %92 = vector.load %arg26[%c0_78, %c0_79] : memref<128x16xf32, #tpu.memory_space<vmem>>, vector<128x16xf32>
    %c0_80 = arith.constant 0 : index
    %c0_81 = arith.constant 0 : index
    %93 = vector.load %arg33[%c0_80, %c0_81] : memref<16x16xf32, #tpu.memory_space<vmem>>, vector<16x16xf32>
    tpu.vector_store %arg33[%c0_80, %c0_81], %39 {strides = array<i32>} : memref<16x16xf32, #tpu.memory_space<vmem>>, vector<16x16xf32>,
    %cst_82 = arith.constant dense<0.000000e+00> : vector<16x128xf32>
    %94 = tpu.matmul %39, %90, %cst_82 {dimension_numbers = #tpu.dot_dimension_numbers<[1], [0], [0], [1], [0, 0, 1, 1], [], []>} : vector<16x16xf32>, vector<16x128xf32>, vector<16x128xf32> -> vector<16x128xf32>
    %95 = vector.broadcast %91 : vector<1x128xf32> to vector<16x128xf32>
    %96 = arith.addf %94, %95 : vector<16x128xf32>
    %c0_83 = arith.constant 0 : index
    %c0_84 = arith.constant 0 : index
    %97 = vector.load %arg31[%c0_83, %c0_84] : memref<16x128xf32, #tpu.memory_space<vmem>>, vector<16x128xf32>
    %98 = arith.mulf %96, %97 : vector<16x128xf32>
    %c0_85 = arith.constant 0 : index
    %c0_86 = arith.constant 0 : index
    %99 = vector.load %arg32[%c0_85, %c0_86] : memref<16x128xf32, #tpu.memory_space<vmem>>, vector<16x128xf32>
    tpu.vector_store %arg32[%c0_85, %c0_86], %98 {strides = array<i32>} : memref<16x128xf32, #tpu.memory_space<vmem>>, vector<16x128xf32>,
    %c0_87 = arith.constant 0 : index
    %c0_88 = arith.constant 0 : index
    %100 = vector.load %arg30[%c0_87, %c0_88] : memref<256x128xf32, #tpu.memory_space<vmem>>, vector<16x128xf32>
    %c0_89 = arith.constant 0 : index
    %c0_90 = arith.constant 0 : index
    %101 = vector.load %arg32[%c0_89, %c0_90] : memref<16x128xf32, #tpu.memory_space<vmem>>, vector<16x128xf32>
    %102 = arith.mulf %101, %100 : vector<16x128xf32>
    %cst_91 = arith.constant dense<0.000000e+00> : vector<16x16xf32>
    %103 = tpu.matmul %102, %92, %cst_91 {dimension_numbers = #tpu.dot_dimension_numbers<[1], [0], [0], [1], [0, 0, 1, 1], [], []>} : vector<16x128xf32>, vector<128x16xf32>, vector<16x16xf32> -> vector<16x16xf32>
    %104 = arith.addf %103, %89 : vector<16x16xf32>
    %105 = math.tanh %104 : vector<16x16xf32>
    %c0_92 = arith.constant 0 : index
    %c0_93 = arith.constant 0 : index
    %106 = vector.load %arg4[%c0_92, %c0_93] : memref<256x1xf32, #tpu.memory_space<vmem>>, vector<16x1xf32>
    %107 = vector.broadcast %106 : vector<16x1xf32> to vector<16x16xf32>
    %108 = arith.mulf %107, %105 : vector<16x16xf32>
    %cst_94 = arith.constant dense<0.000000e+00> : vector<16xf32>
    %109 = vector.multi_reduction <add>, %108, %cst_94 [0] : vector<16x16xf32> to vector<16xf32>
    %110 = vector.shape_cast %109 : vector<16xf32> to vector<1x16xf32>
    %c0_95 = arith.constant 0 : index
    %c0_96 = arith.constant 0 : index
    %111 = vector.load %arg33[%c0_95, %c0_96] : memref<16x16xf32, #tpu.memory_space<vmem>>, vector<1x16xf32>
    %c0_97 = arith.constant 0 : index
    %c0_98 = arith.constant 0 : index
    %112 = vector.load %arg5[%c0_97, %c0_98] : memref<16x1xf32, #tpu.memory_space<vmem>>, vector<1x1xf32>
    %cst_99 = arith.constant 2.000000e-01 : f32
    %113 = vector.broadcast %cst_99 : f32 to vector<1x1xf32>
    %114 = arith.mulf %113, %112 : vector<1x1xf32>
    %115 = arith.subf %110, %111 : vector<1x16xf32>
    %116 = vector.broadcast %114 : vector<1x1xf32> to vector<1x16xf32>
    %117 = arith.mulf %116, %115 : vector<1x16xf32>
    %118 = arith.addf %111, %117 : vector<1x16xf32>
    %c0_100 = arith.constant 0 : index
    %c0_101 = arith.constant 0 : index
    %119 = vector.load %arg33[%c0_100, %c0_101] : memref<16x16xf32, #tpu.memory_space<vmem>>, vector<1x16xf32>
    tpu.vector_store %arg33[%c0_100, %c0_101], %118 {strides = array<i32>} : memref<16x16xf32, #tpu.memory_space<vmem>>, vector<1x16xf32>,
    %cst_102 = arith.constant dense<0.000000e+00> : vector<1x128xf32>
    %120 = tpu.matmul %118, %90, %cst_102 {dimension_numbers = #tpu.dot_dimension_numbers<[1], [0], [0], [1], [0, 0, 1, 1], [], []>} : vector<1x16xf32>, vector<16x128xf32>, vector<1x128xf32> -> vector<1x128xf32>
    %121 = arith.addf %120, %91 : vector<1x128xf32>
    %c0_103 = arith.constant 0 : index
    %c0_104 = arith.constant 0 : index
    %122 = vector.load %arg31[%c0_103, %c0_104] : memref<16x128xf32, #tpu.memory_space<vmem>>, vector<1x128xf32>
    %123 = arith.mulf %121, %122 : vector<1x128xf32>
    %c0_105 = arith.constant 0 : index
    %c0_106 = arith.constant 0 : index
    %124 = vector.load %arg32[%c0_105, %c0_106] : memref<16x128xf32, #tpu.memory_space<vmem>>, vector<1x128xf32>
    tpu.vector_store %arg32[%c0_105, %c0_106], %123 {strides = array<i32>} : memref<16x128xf32, #tpu.memory_space<vmem>>, vector<1x128xf32>,
    %c16 = arith.constant 16 : index
    %c0_107 = arith.constant 0 : index
    %125 = vector.load %arg30[%c16, %c0_107] : memref<256x128xf32, #tpu.memory_space<vmem>>, vector<16x128xf32>
    %c0_108 = arith.constant 0 : index
    %c0_109 = arith.constant 0 : index
    %126 = vector.load %arg32[%c0_108, %c0_109] : memref<16x128xf32, #tpu.memory_space<vmem>>, vector<16x128xf32>
    %127 = arith.mulf %126, %125 : vector<16x128xf32>
    %cst_110 = arith.constant dense<0.000000e+00> : vector<16x16xf32>
    %128 = tpu.matmul %127, %92, %cst_110 {dimension_numbers = #tpu.dot_dimension_numbers<[1], [0], [0], [1], [0, 0, 1, 1], [], []>} : vector<16x128xf32>, vector<128x16xf32>, vector<16x16xf32> -> vector<16x16xf32>
    %129 = arith.addf %128, %89 : vector<16x16xf32>
    %130 = math.tanh %129 : vector<16x16xf32>
    %c16_111 = arith.constant 16 : index
    %c0_112 = arith.constant 0 : index
    %131 = vector.load %arg4[%c16_111, %c0_112] : memref<256x1xf32, #tpu.memory_space<vmem>>, vector<16x1xf32>
    %132 = vector.broadcast %131 : vector<16x1xf32> to vector<16x16xf32>
    %133 = arith.mulf %132, %130 : vector<16x16xf32>
    %cst_113 = arith.constant dense<0.000000e+00> : vector<16xf32>
    %134 = vector.multi_reduction <add>, %133, %cst_113 [0] : vector<16x16xf32> to vector<16xf32>
    %135 = vector.shape_cast %134 : vector<16xf32> to vector<1x16xf32>
    %c1 = arith.constant 1 : index
    %c0_114 = arith.constant 0 : index
    %136 = vector.load %arg33[%c1, %c0_114] : memref<16x16xf32, #tpu.memory_space<vmem>>, vector<1x16xf32>
    %c1_115 = arith.constant 1 : index
    %c0_116 = arith.constant 0 : index
    %137 = vector.load %arg5[%c1_115, %c0_116] : memref<16x1xf32, #tpu.memory_space<vmem>>, vector<1x1xf32>
    %cst_117 = arith.constant 2.000000e-01 : f32
    %138 = vector.broadcast %cst_117 : f32 to vector<1x1xf32>
    %139 = arith.mulf %138, %137 : vector<1x1xf32>
    %140 = arith.subf %135, %136 : vector<1x16xf32>
    %141 = vector.broadcast %139 : vector<1x1xf32> to vector<1x16xf32>
    %142 = arith.mulf %141, %140 : vector<1x16xf32>
    %143 = arith.addf %136, %142 : vector<1x16xf32>
    %c1_118 = arith.constant 1 : index
    %c0_119 = arith.constant 0 : index
    %144 = vector.load %arg33[%c1_118, %c0_119] : memref<16x16xf32, #tpu.memory_space<vmem>>, vector<1x16xf32>
    tpu.vector_store %arg33[%c1_118, %c0_119], %143 {strides = array<i32>} : memref<16x16xf32, #tpu.memory_space<vmem>>, vector<1x16xf32>,
    %cst_120 = arith.constant dense<0.000000e+00> : vector<1x128xf32>
    %145 = tpu.matmul %143, %90, %cst_120 {dimension_numbers = #tpu.dot_dimension_numbers<[1], [0], [0], [1], [0, 0, 1, 1], [], []>} : vector<1x16xf32>, vector<16x128xf32>, vector<1x128xf32> -> vector<1x128xf32>
    %146 = arith.addf %145, %91 : vector<1x128xf32>
    %c1_121 = arith.constant 1 : index
    %c0_122 = arith.constant 0 : index
    %147 = vector.load %arg31[%c1_121, %c0_122] : memref<16x128xf32, #tpu.memory_space<vmem>>, vector<1x128xf32>
    %148 = arith.mulf %146, %147 : vector<1x128xf32>
    %c1_123 = arith.constant 1 : index
    %c0_124 = arith.constant 0 : index
    %149 = vector.load %arg32[%c1_123, %c0_124] : memref<16x128xf32, #tpu.memory_space<vmem>>, vector<1x128xf32>
    tpu.vector_store %arg32[%c1_123, %c0_124], %148 {strides = array<i32>} : memref<16x128xf32, #tpu.memory_space<vmem>>, vector<1x128xf32>,
    %c32 = arith.constant 32 : index
    %c0_125 = arith.constant 0 : index
    %150 = vector.load %arg30[%c32, %c0_125] : memref<256x128xf32, #tpu.memory_space<vmem>>, vector<16x128xf32>
    %c0_126 = arith.constant 0 : index
    %c0_127 = arith.constant 0 : index
    %151 = vector.load %arg32[%c0_126, %c0_127] : memref<16x128xf32, #tpu.memory_space<vmem>>, vector<16x128xf32>
    %152 = arith.mulf %151, %150 : vector<16x128xf32>
    %cst_128 = arith.constant dense<0.000000e+00> : vector<16x16xf32>
    %153 = tpu.matmul %152, %92, %cst_128 {dimension_numbers = #tpu.dot_dimension_numbers<[1], [0], [0], [1], [0, 0, 1, 1], [], []>} : vector<16x128xf32>, vector<128x16xf32>, vector<16x16xf32> -> vector<16x16xf32>
    %154 = arith.addf %153, %89 : vector<16x16xf32>
    %155 = math.tanh %154 : vector<16x16xf32>
    %c32_129 = arith.constant 32 : index
    %c0_130 = arith.constant 0 : index
    %156 = vector.load %arg4[%c32_129, %c0_130] : memref<256x1xf32, #tpu.memory_space<vmem>>, vector<16x1xf32>
    %157 = vector.broadcast %156 : vector<16x1xf32> to vector<16x16xf32>
    %158 = arith.mulf %157, %155 : vector<16x16xf32>
    %cst_131 = arith.constant dense<0.000000e+00> : vector<16xf32>
    %159 = vector.multi_reduction <add>, %158, %cst_131 [0] : vector<16x16xf32> to vector<16xf32>
    %160 = vector.shape_cast %159 : vector<16xf32> to vector<1x16xf32>
    %c2 = arith.constant 2 : index
    %c0_132 = arith.constant 0 : index
    %161 = vector.load %arg33[%c2, %c0_132] : memref<16x16xf32, #tpu.memory_space<vmem>>, vector<1x16xf32>
    %c2_133 = arith.constant 2 : index
    %c0_134 = arith.constant 0 : index
    %162 = vector.load %arg5[%c2_133, %c0_134] : memref<16x1xf32, #tpu.memory_space<vmem>>, vector<1x1xf32>
    %cst_135 = arith.constant 2.000000e-01 : f32
    %163 = vector.broadcast %cst_135 : f32 to vector<1x1xf32>
    %164 = arith.mulf %163, %162 : vector<1x1xf32>
    %165 = arith.subf %160, %161 : vector<1x16xf32>
    %166 = vector.broadcast %164 : vector<1x1xf32> to vector<1x16xf32>
    %167 = arith.mulf %166, %165 : vector<1x16xf32>
    %168 = arith.addf %161, %167 : vector<1x16xf32>
    %c2_136 = arith.constant 2 : index
    %c0_137 = arith.constant 0 : index
    %169 = vector.load %arg33[%c2_136, %c0_137] : memref<16x16xf32, #tpu.memory_space<vmem>>, vector<1x16xf32>
    tpu.vector_store %arg33[%c2_136, %c0_137], %168 {strides = array<i32>} : memref<16x16xf32, #tpu.memory_space<vmem>>, vector<1x16xf32>,
    %cst_138 = arith.constant dense<0.000000e+00> : vector<1x128xf32>
    %170 = tpu.matmul %168, %90, %cst_138 {dimension_numbers = #tpu.dot_dimension_numbers<[1], [0], [0], [1], [0, 0, 1, 1], [], []>} : vector<1x16xf32>, vector<16x128xf32>, vector<1x128xf32> -> vector<1x128xf32>
    %171 = arith.addf %170, %91 : vector<1x128xf32>
    %c2_139 = arith.constant 2 : index
    %c0_140 = arith.constant 0 : index
    %172 = vector.load %arg31[%c2_139, %c0_140] : memref<16x128xf32, #tpu.memory_space<vmem>>, vector<1x128xf32>
    %173 = arith.mulf %171, %172 : vector<1x128xf32>
    %c2_141 = arith.constant 2 : index
    %c0_142 = arith.constant 0 : index
    %174 = vector.load %arg32[%c2_141, %c0_142] : memref<16x128xf32, #tpu.memory_space<vmem>>, vector<1x128xf32>
    tpu.vector_store %arg32[%c2_141, %c0_142], %173 {strides = array<i32>} : memref<16x128xf32, #tpu.memory_space<vmem>>, vector<1x128xf32>,
    %c48 = arith.constant 48 : index
    %c0_143 = arith.constant 0 : index
    %175 = vector.load %arg30[%c48, %c0_143] : memref<256x128xf32, #tpu.memory_space<vmem>>, vector<16x128xf32>
    %c0_144 = arith.constant 0 : index
    %c0_145 = arith.constant 0 : index
    %176 = vector.load %arg32[%c0_144, %c0_145] : memref<16x128xf32, #tpu.memory_space<vmem>>, vector<16x128xf32>
    %177 = arith.mulf %176, %175 : vector<16x128xf32>
    %cst_146 = arith.constant dense<0.000000e+00> : vector<16x16xf32>
    %178 = tpu.matmul %177, %92, %cst_146 {dimension_numbers = #tpu.dot_dimension_numbers<[1], [0], [0], [1], [0, 0, 1, 1], [], []>} : vector<16x128xf32>, vector<128x16xf32>, vector<16x16xf32> -> vector<16x16xf32>
    %179 = arith.addf %178, %89 : vector<16x16xf32>
    %180 = math.tanh %179 : vector<16x16xf32>
    %c48_147 = arith.constant 48 : index
    %c0_148 = arith.constant 0 : index
    %181 = vector.load %arg4[%c48_147, %c0_148] : memref<256x1xf32, #tpu.memory_space<vmem>>, vector<16x1xf32>
    %182 = vector.broadcast %181 : vector<16x1xf32> to vector<16x16xf32>
    %183 = arith.mulf %182, %180 : vector<16x16xf32>
    %cst_149 = arith.constant dense<0.000000e+00> : vector<16xf32>
    %184 = vector.multi_reduction <add>, %183, %cst_149 [0] : vector<16x16xf32> to vector<16xf32>
    %185 = vector.shape_cast %184 : vector<16xf32> to vector<1x16xf32>
    %c3 = arith.constant 3 : index
    %c0_150 = arith.constant 0 : index
    %186 = vector.load %arg33[%c3, %c0_150] : memref<16x16xf32, #tpu.memory_space<vmem>>, vector<1x16xf32>
    %c3_151 = arith.constant 3 : index
    %c0_152 = arith.constant 0 : index
    %187 = vector.load %arg5[%c3_151, %c0_152] : memref<16x1xf32, #tpu.memory_space<vmem>>, vector<1x1xf32>
    %cst_153 = arith.constant 2.000000e-01 : f32
    %188 = vector.broadcast %cst_153 : f32 to vector<1x1xf32>
    %189 = arith.mulf %188, %187 : vector<1x1xf32>
    %190 = arith.subf %185, %186 : vector<1x16xf32>
    %191 = vector.broadcast %189 : vector<1x1xf32> to vector<1x16xf32>
    %192 = arith.mulf %191, %190 : vector<1x16xf32>
    %193 = arith.addf %186, %192 : vector<1x16xf32>
    %c3_154 = arith.constant 3 : index
    %c0_155 = arith.constant 0 : index
    %194 = vector.load %arg33[%c3_154, %c0_155] : memref<16x16xf32, #tpu.memory_space<vmem>>, vector<1x16xf32>
    tpu.vector_store %arg33[%c3_154, %c0_155], %193 {strides = array<i32>} : memref<16x16xf32, #tpu.memory_space<vmem>>, vector<1x16xf32>,
    %cst_156 = arith.constant dense<0.000000e+00> : vector<1x128xf32>
    %195 = tpu.matmul %193, %90, %cst_156 {dimension_numbers = #tpu.dot_dimension_numbers<[1], [0], [0], [1], [0, 0, 1, 1], [], []>} : vector<1x16xf32>, vector<16x128xf32>, vector<1x128xf32> -> vector<1x128xf32>
    %196 = arith.addf %195, %91 : vector<1x128xf32>
    %c3_157 = arith.constant 3 : index
    %c0_158 = arith.constant 0 : index
    %197 = vector.load %arg31[%c3_157, %c0_158] : memref<16x128xf32, #tpu.memory_space<vmem>>, vector<1x128xf32>
    %198 = arith.mulf %196, %197 : vector<1x128xf32>
    %c3_159 = arith.constant 3 : index
    %c0_160 = arith.constant 0 : index
    %199 = vector.load %arg32[%c3_159, %c0_160] : memref<16x128xf32, #tpu.memory_space<vmem>>, vector<1x128xf32>
    tpu.vector_store %arg32[%c3_159, %c0_160], %198 {strides = array<i32>} : memref<16x128xf32, #tpu.memory_space<vmem>>, vector<1x128xf32>,
    %c64 = arith.constant 64 : index
    %c0_161 = arith.constant 0 : index
    %200 = vector.load %arg30[%c64, %c0_161] : memref<256x128xf32, #tpu.memory_space<vmem>>, vector<16x128xf32>
    %c0_162 = arith.constant 0 : index
    %c0_163 = arith.constant 0 : index
    %201 = vector.load %arg32[%c0_162, %c0_163] : memref<16x128xf32, #tpu.memory_space<vmem>>, vector<16x128xf32>
    %202 = arith.mulf %201, %200 : vector<16x128xf32>
    %cst_164 = arith.constant dense<0.000000e+00> : vector<16x16xf32>
    %203 = tpu.matmul %202, %92, %cst_164 {dimension_numbers = #tpu.dot_dimension_numbers<[1], [0], [0], [1], [0, 0, 1, 1], [], []>} : vector<16x128xf32>, vector<128x16xf32>, vector<16x16xf32> -> vector<16x16xf32>
    %204 = arith.addf %203, %89 : vector<16x16xf32>
    %205 = math.tanh %204 : vector<16x16xf32>
    %c64_165 = arith.constant 64 : index
    %c0_166 = arith.constant 0 : index
    %206 = vector.load %arg4[%c64_165, %c0_166] : memref<256x1xf32, #tpu.memory_space<vmem>>, vector<16x1xf32>
    %207 = vector.broadcast %206 : vector<16x1xf32> to vector<16x16xf32>
    %208 = arith.mulf %207, %205 : vector<16x16xf32>
    %cst_167 = arith.constant dense<0.000000e+00> : vector<16xf32>
    %209 = vector.multi_reduction <add>, %208, %cst_167 [0] : vector<16x16xf32> to vector<16xf32>
    %210 = vector.shape_cast %209 : vector<16xf32> to vector<1x16xf32>
    %c4 = arith.constant 4 : index
    %c0_168 = arith.constant 0 : index
    %211 = vector.load %arg33[%c4, %c0_168] : memref<16x16xf32, #tpu.memory_space<vmem>>, vector<1x16xf32>
    %c4_169 = arith.constant 4 : index
    %c0_170 = arith.constant 0 : index
    %212 = vector.load %arg5[%c4_169, %c0_170] : memref<16x1xf32, #tpu.memory_space<vmem>>, vector<1x1xf32>
    %cst_171 = arith.constant 2.000000e-01 : f32
    %213 = vector.broadcast %cst_171 : f32 to vector<1x1xf32>
    %214 = arith.mulf %213, %212 : vector<1x1xf32>
    %215 = arith.subf %210, %211 : vector<1x16xf32>
    %216 = vector.broadcast %214 : vector<1x1xf32> to vector<1x16xf32>
    %217 = arith.mulf %216, %215 : vector<1x16xf32>
    %218 = arith.addf %211, %217 : vector<1x16xf32>
    %c4_172 = arith.constant 4 : index
    %c0_173 = arith.constant 0 : index
    %219 = vector.load %arg33[%c4_172, %c0_173] : memref<16x16xf32, #tpu.memory_space<vmem>>, vector<1x16xf32>
    tpu.vector_store %arg33[%c4_172, %c0_173], %218 {strides = array<i32>} : memref<16x16xf32, #tpu.memory_space<vmem>>, vector<1x16xf32>,
    %cst_174 = arith.constant dense<0.000000e+00> : vector<1x128xf32>
    %220 = tpu.matmul %218, %90, %cst_174 {dimension_numbers = #tpu.dot_dimension_numbers<[1], [0], [0], [1], [0, 0, 1, 1], [], []>} : vector<1x16xf32>, vector<16x128xf32>, vector<1x128xf32> -> vector<1x128xf32>
    %221 = arith.addf %220, %91 : vector<1x128xf32>
    %c4_175 = arith.constant 4 : index
    %c0_176 = arith.constant 0 : index
    %222 = vector.load %arg31[%c4_175, %c0_176] : memref<16x128xf32, #tpu.memory_space<vmem>>, vector<1x128xf32>
    %223 = arith.mulf %221, %222 : vector<1x128xf32>
    %c4_177 = arith.constant 4 : index
    %c0_178 = arith.constant 0 : index
    %224 = vector.load %arg32[%c4_177, %c0_178] : memref<16x128xf32, #tpu.memory_space<vmem>>, vector<1x128xf32>
    tpu.vector_store %arg32[%c4_177, %c0_178], %223 {strides = array<i32>} : memref<16x128xf32, #tpu.memory_space<vmem>>, vector<1x128xf32>,
    %c80 = arith.constant 80 : index
    %c0_179 = arith.constant 0 : index
    %225 = vector.load %arg30[%c80, %c0_179] : memref<256x128xf32, #tpu.memory_space<vmem>>, vector<16x128xf32>
    %c0_180 = arith.constant 0 : index
    %c0_181 = arith.constant 0 : index
    %226 = vector.load %arg32[%c0_180, %c0_181] : memref<16x128xf32, #tpu.memory_space<vmem>>, vector<16x128xf32>
    %227 = arith.mulf %226, %225 : vector<16x128xf32>
    %cst_182 = arith.constant dense<0.000000e+00> : vector<16x16xf32>
    %228 = tpu.matmul %227, %92, %cst_182 {dimension_numbers = #tpu.dot_dimension_numbers<[1], [0], [0], [1], [0, 0, 1, 1], [], []>} : vector<16x128xf32>, vector<128x16xf32>, vector<16x16xf32> -> vector<16x16xf32>
    %229 = arith.addf %228, %89 : vector<16x16xf32>
    %230 = math.tanh %229 : vector<16x16xf32>
    %c80_183 = arith.constant 80 : index
    %c0_184 = arith.constant 0 : index
    %231 = vector.load %arg4[%c80_183, %c0_184] : memref<256x1xf32, #tpu.memory_space<vmem>>, vector<16x1xf32>
    %232 = vector.broadcast %231 : vector<16x1xf32> to vector<16x16xf32>
    %233 = arith.mulf %232, %230 : vector<16x16xf32>
    %cst_185 = arith.constant dense<0.000000e+00> : vector<16xf32>
    %234 = vector.multi_reduction <add>, %233, %cst_185 [0] : vector<16x16xf32> to vector<16xf32>
    %235 = vector.shape_cast %234 : vector<16xf32> to vector<1x16xf32>
    %c5 = arith.constant 5 : index
    %c0_186 = arith.constant 0 : index
    %236 = vector.load %arg33[%c5, %c0_186] : memref<16x16xf32, #tpu.memory_space<vmem>>, vector<1x16xf32>
    %c5_187 = arith.constant 5 : index
    %c0_188 = arith.constant 0 : index
    %237 = vector.load %arg5[%c5_187, %c0_188] : memref<16x1xf32, #tpu.memory_space<vmem>>, vector<1x1xf32>
    %cst_189 = arith.constant 2.000000e-01 : f32
    %238 = vector.broadcast %cst_189 : f32 to vector<1x1xf32>
    %239 = arith.mulf %238, %237 : vector<1x1xf32>
    %240 = arith.subf %235, %236 : vector<1x16xf32>
    %241 = vector.broadcast %239 : vector<1x1xf32> to vector<1x16xf32>
    %242 = arith.mulf %241, %240 : vector<1x16xf32>
    %243 = arith.addf %236, %242 : vector<1x16xf32>
    %c5_190 = arith.constant 5 : index
    %c0_191 = arith.constant 0 : index
    %244 = vector.load %arg33[%c5_190, %c0_191] : memref<16x16xf32, #tpu.memory_space<vmem>>, vector<1x16xf32>
    tpu.vector_store %arg33[%c5_190, %c0_191], %243 {strides = array<i32>} : memref<16x16xf32, #tpu.memory_space<vmem>>, vector<1x16xf32>,
    %cst_192 = arith.constant dense<0.000000e+00> : vector<1x128xf32>
    %245 = tpu.matmul %243, %90, %cst_192 {dimension_numbers = #tpu.dot_dimension_numbers<[1], [0], [0], [1], [0, 0, 1, 1], [], []>} : vector<1x16xf32>, vector<16x128xf32>, vector<1x128xf32> -> vector<1x128xf32>
    %246 = arith.addf %245, %91 : vector<1x128xf32>
    %c5_193 = arith.constant 5 : index
    %c0_194 = arith.constant 0 : index
    %247 = vector.load %arg31[%c5_193, %c0_194] : memref<16x128xf32, #tpu.memory_space<vmem>>, vector<1x128xf32>
    %248 = arith.mulf %246, %247 : vector<1x128xf32>
    %c5_195 = arith.constant 5 : index
    %c0_196 = arith.constant 0 : index
    %249 = vector.load %arg32[%c5_195, %c0_196] : memref<16x128xf32, #tpu.memory_space<vmem>>, vector<1x128xf32>
    tpu.vector_store %arg32[%c5_195, %c0_196], %248 {strides = array<i32>} : memref<16x128xf32, #tpu.memory_space<vmem>>, vector<1x128xf32>,
    %c96 = arith.constant 96 : index
    %c0_197 = arith.constant 0 : index
    %250 = vector.load %arg30[%c96, %c0_197] : memref<256x128xf32, #tpu.memory_space<vmem>>, vector<16x128xf32>
    %c0_198 = arith.constant 0 : index
    %c0_199 = arith.constant 0 : index
    %251 = vector.load %arg32[%c0_198, %c0_199] : memref<16x128xf32, #tpu.memory_space<vmem>>, vector<16x128xf32>
    %252 = arith.mulf %251, %250 : vector<16x128xf32>
    %cst_200 = arith.constant dense<0.000000e+00> : vector<16x16xf32>
    %253 = tpu.matmul %252, %92, %cst_200 {dimension_numbers = #tpu.dot_dimension_numbers<[1], [0], [0], [1], [0, 0, 1, 1], [], []>} : vector<16x128xf32>, vector<128x16xf32>, vector<16x16xf32> -> vector<16x16xf32>
    %254 = arith.addf %253, %89 : vector<16x16xf32>
    %255 = math.tanh %254 : vector<16x16xf32>
    %c96_201 = arith.constant 96 : index
    %c0_202 = arith.constant 0 : index
    %256 = vector.load %arg4[%c96_201, %c0_202] : memref<256x1xf32, #tpu.memory_space<vmem>>, vector<16x1xf32>
    %257 = vector.broadcast %256 : vector<16x1xf32> to vector<16x16xf32>
    %258 = arith.mulf %257, %255 : vector<16x16xf32>
    %cst_203 = arith.constant dense<0.000000e+00> : vector<16xf32>
    %259 = vector.multi_reduction <add>, %258, %cst_203 [0] : vector<16x16xf32> to vector<16xf32>
    %260 = vector.shape_cast %259 : vector<16xf32> to vector<1x16xf32>
    %c6 = arith.constant 6 : index
    %c0_204 = arith.constant 0 : index
    %261 = vector.load %arg33[%c6, %c0_204] : memref<16x16xf32, #tpu.memory_space<vmem>>, vector<1x16xf32>
    %c6_205 = arith.constant 6 : index
    %c0_206 = arith.constant 0 : index
    %262 = vector.load %arg5[%c6_205, %c0_206] : memref<16x1xf32, #tpu.memory_space<vmem>>, vector<1x1xf32>
    %cst_207 = arith.constant 2.000000e-01 : f32
    %263 = vector.broadcast %cst_207 : f32 to vector<1x1xf32>
    %264 = arith.mulf %263, %262 : vector<1x1xf32>
    %265 = arith.subf %260, %261 : vector<1x16xf32>
    %266 = vector.broadcast %264 : vector<1x1xf32> to vector<1x16xf32>
    %267 = arith.mulf %266, %265 : vector<1x16xf32>
    %268 = arith.addf %261, %267 : vector<1x16xf32>
    %c6_208 = arith.constant 6 : index
    %c0_209 = arith.constant 0 : index
    %269 = vector.load %arg33[%c6_208, %c0_209] : memref<16x16xf32, #tpu.memory_space<vmem>>, vector<1x16xf32>
    tpu.vector_store %arg33[%c6_208, %c0_209], %268 {strides = array<i32>} : memref<16x16xf32, #tpu.memory_space<vmem>>, vector<1x16xf32>,
    %cst_210 = arith.constant dense<0.000000e+00> : vector<1x128xf32>
    %270 = tpu.matmul %268, %90, %cst_210 {dimension_numbers = #tpu.dot_dimension_numbers<[1], [0], [0], [1], [0, 0, 1, 1], [], []>} : vector<1x16xf32>, vector<16x128xf32>, vector<1x128xf32> -> vector<1x128xf32>
    %271 = arith.addf %270, %91 : vector<1x128xf32>
    %c6_211 = arith.constant 6 : index
    %c0_212 = arith.constant 0 : index
    %272 = vector.load %arg31[%c6_211, %c0_212] : memref<16x128xf32, #tpu.memory_space<vmem>>, vector<1x128xf32>
    %273 = arith.mulf %271, %272 : vector<1x128xf32>
    %c6_213 = arith.constant 6 : index
    %c0_214 = arith.constant 0 : index
    %274 = vector.load %arg32[%c6_213, %c0_214] : memref<16x128xf32, #tpu.memory_space<vmem>>, vector<1x128xf32>
    tpu.vector_store %arg32[%c6_213, %c0_214], %273 {strides = array<i32>} : memref<16x128xf32, #tpu.memory_space<vmem>>, vector<1x128xf32>,
    %c112 = arith.constant 112 : index
    %c0_215 = arith.constant 0 : index
    %275 = vector.load %arg30[%c112, %c0_215] : memref<256x128xf32, #tpu.memory_space<vmem>>, vector<16x128xf32>
    %c0_216 = arith.constant 0 : index
    %c0_217 = arith.constant 0 : index
    %276 = vector.load %arg32[%c0_216, %c0_217] : memref<16x128xf32, #tpu.memory_space<vmem>>, vector<16x128xf32>
    %277 = arith.mulf %276, %275 : vector<16x128xf32>
    %cst_218 = arith.constant dense<0.000000e+00> : vector<16x16xf32>
    %278 = tpu.matmul %277, %92, %cst_218 {dimension_numbers = #tpu.dot_dimension_numbers<[1], [0], [0], [1], [0, 0, 1, 1], [], []>} : vector<16x128xf32>, vector<128x16xf32>, vector<16x16xf32> -> vector<16x16xf32>
    %279 = arith.addf %278, %89 : vector<16x16xf32>
    %280 = math.tanh %279 : vector<16x16xf32>
    %c112_219 = arith.constant 112 : index
    %c0_220 = arith.constant 0 : index
    %281 = vector.load %arg4[%c112_219, %c0_220] : memref<256x1xf32, #tpu.memory_space<vmem>>, vector<16x1xf32>
    %282 = vector.broadcast %281 : vector<16x1xf32> to vector<16x16xf32>
    %283 = arith.mulf %282, %280 : vector<16x16xf32>
    %cst_221 = arith.constant dense<0.000000e+00> : vector<16xf32>
    %284 = vector.multi_reduction <add>, %283, %cst_221 [0] : vector<16x16xf32> to vector<16xf32>
    %285 = vector.shape_cast %284 : vector<16xf32> to vector<1x16xf32>
    %c7 = arith.constant 7 : index
    %c0_222 = arith.constant 0 : index
    %286 = vector.load %arg33[%c7, %c0_222] : memref<16x16xf32, #tpu.memory_space<vmem>>, vector<1x16xf32>
    %c7_223 = arith.constant 7 : index
    %c0_224 = arith.constant 0 : index
    %287 = vector.load %arg5[%c7_223, %c0_224] : memref<16x1xf32, #tpu.memory_space<vmem>>, vector<1x1xf32>
    %cst_225 = arith.constant 2.000000e-01 : f32
    %288 = vector.broadcast %cst_225 : f32 to vector<1x1xf32>
    %289 = arith.mulf %288, %287 : vector<1x1xf32>
    %290 = arith.subf %285, %286 : vector<1x16xf32>
    %291 = vector.broadcast %289 : vector<1x1xf32> to vector<1x16xf32>
    %292 = arith.mulf %291, %290 : vector<1x16xf32>
    %293 = arith.addf %286, %292 : vector<1x16xf32>
    %c7_226 = arith.constant 7 : index
    %c0_227 = arith.constant 0 : index
    %294 = vector.load %arg33[%c7_226, %c0_227] : memref<16x16xf32, #tpu.memory_space<vmem>>, vector<1x16xf32>
    tpu.vector_store %arg33[%c7_226, %c0_227], %293 {strides = array<i32>} : memref<16x16xf32, #tpu.memory_space<vmem>>, vector<1x16xf32>,
    %cst_228 = arith.constant dense<0.000000e+00> : vector<1x128xf32>
    %295 = tpu.matmul %293, %90, %cst_228 {dimension_numbers = #tpu.dot_dimension_numbers<[1], [0], [0], [1], [0, 0, 1, 1], [], []>} : vector<1x16xf32>, vector<16x128xf32>, vector<1x128xf32> -> vector<1x128xf32>
    %296 = arith.addf %295, %91 : vector<1x128xf32>
    %c7_229 = arith.constant 7 : index
    %c0_230 = arith.constant 0 : index
    %297 = vector.load %arg31[%c7_229, %c0_230] : memref<16x128xf32, #tpu.memory_space<vmem>>, vector<1x128xf32>
    %298 = arith.mulf %296, %297 : vector<1x128xf32>
    %c7_231 = arith.constant 7 : index
    %c0_232 = arith.constant 0 : index
    %299 = vector.load %arg32[%c7_231, %c0_232] : memref<16x128xf32, #tpu.memory_space<vmem>>, vector<1x128xf32>
    tpu.vector_store %arg32[%c7_231, %c0_232], %298 {strides = array<i32>} : memref<16x128xf32, #tpu.memory_space<vmem>>, vector<1x128xf32>,
    %c128 = arith.constant 128 : index
    %c0_233 = arith.constant 0 : index
    %300 = vector.load %arg30[%c128, %c0_233] : memref<256x128xf32, #tpu.memory_space<vmem>>, vector<16x128xf32>
    %c0_234 = arith.constant 0 : index
    %c0_235 = arith.constant 0 : index
    %301 = vector.load %arg32[%c0_234, %c0_235] : memref<16x128xf32, #tpu.memory_space<vmem>>, vector<16x128xf32>
    %302 = arith.mulf %301, %300 : vector<16x128xf32>
    %cst_236 = arith.constant dense<0.000000e+00> : vector<16x16xf32>
    %303 = tpu.matmul %302, %92, %cst_236 {dimension_numbers = #tpu.dot_dimension_numbers<[1], [0], [0], [1], [0, 0, 1, 1], [], []>} : vector<16x128xf32>, vector<128x16xf32>, vector<16x16xf32> -> vector<16x16xf32>
    %304 = arith.addf %303, %89 : vector<16x16xf32>
    %305 = math.tanh %304 : vector<16x16xf32>
    %c128_237 = arith.constant 128 : index
    %c0_238 = arith.constant 0 : index
    %306 = vector.load %arg4[%c128_237, %c0_238] : memref<256x1xf32, #tpu.memory_space<vmem>>, vector<16x1xf32>
    %307 = vector.broadcast %306 : vector<16x1xf32> to vector<16x16xf32>
    %308 = arith.mulf %307, %305 : vector<16x16xf32>
    %cst_239 = arith.constant dense<0.000000e+00> : vector<16xf32>
    %309 = vector.multi_reduction <add>, %308, %cst_239 [0] : vector<16x16xf32> to vector<16xf32>
    %310 = vector.shape_cast %309 : vector<16xf32> to vector<1x16xf32>
    %c8 = arith.constant 8 : index
    %c0_240 = arith.constant 0 : index
    %311 = vector.load %arg33[%c8, %c0_240] : memref<16x16xf32, #tpu.memory_space<vmem>>, vector<1x16xf32>
    %c8_241 = arith.constant 8 : index
    %c0_242 = arith.constant 0 : index
    %312 = vector.load %arg5[%c8_241, %c0_242] : memref<16x1xf32, #tpu.memory_space<vmem>>, vector<1x1xf32>
    %cst_243 = arith.constant 2.000000e-01 : f32
    %313 = vector.broadcast %cst_243 : f32 to vector<1x1xf32>
    %314 = arith.mulf %313, %312 : vector<1x1xf32>
    %315 = arith.subf %310, %311 : vector<1x16xf32>
    %316 = vector.broadcast %314 : vector<1x1xf32> to vector<1x16xf32>
    %317 = arith.mulf %316, %315 : vector<1x16xf32>
    %318 = arith.addf %311, %317 : vector<1x16xf32>
    %c8_244 = arith.constant 8 : index
    %c0_245 = arith.constant 0 : index
    %319 = vector.load %arg33[%c8_244, %c0_245] : memref<16x16xf32, #tpu.memory_space<vmem>>, vector<1x16xf32>
    tpu.vector_store %arg33[%c8_244, %c0_245], %318 {strides = array<i32>} : memref<16x16xf32, #tpu.memory_space<vmem>>, vector<1x16xf32>,
    %cst_246 = arith.constant dense<0.000000e+00> : vector<1x128xf32>
    %320 = tpu.matmul %318, %90, %cst_246 {dimension_numbers = #tpu.dot_dimension_numbers<[1], [0], [0], [1], [0, 0, 1, 1], [], []>} : vector<1x16xf32>, vector<16x128xf32>, vector<1x128xf32> -> vector<1x128xf32>
    %321 = arith.addf %320, %91 : vector<1x128xf32>
    %c8_247 = arith.constant 8 : index
    %c0_248 = arith.constant 0 : index
    %322 = vector.load %arg31[%c8_247, %c0_248] : memref<16x128xf32, #tpu.memory_space<vmem>>, vector<1x128xf32>
    %323 = arith.mulf %321, %322 : vector<1x128xf32>
    %c8_249 = arith.constant 8 : index
    %c0_250 = arith.constant 0 : index
    %324 = vector.load %arg32[%c8_249, %c0_250] : memref<16x128xf32, #tpu.memory_space<vmem>>, vector<1x128xf32>
    tpu.vector_store %arg32[%c8_249, %c0_250], %323 {strides = array<i32>} : memref<16x128xf32, #tpu.memory_space<vmem>>, vector<1x128xf32>,
    %c144 = arith.constant 144 : index
    %c0_251 = arith.constant 0 : index
    %325 = vector.load %arg30[%c144, %c0_251] : memref<256x128xf32, #tpu.memory_space<vmem>>, vector<16x128xf32>
    %c0_252 = arith.constant 0 : index
    %c0_253 = arith.constant 0 : index
    %326 = vector.load %arg32[%c0_252, %c0_253] : memref<16x128xf32, #tpu.memory_space<vmem>>, vector<16x128xf32>
    %327 = arith.mulf %326, %325 : vector<16x128xf32>
    %cst_254 = arith.constant dense<0.000000e+00> : vector<16x16xf32>
    %328 = tpu.matmul %327, %92, %cst_254 {dimension_numbers = #tpu.dot_dimension_numbers<[1], [0], [0], [1], [0, 0, 1, 1], [], []>} : vector<16x128xf32>, vector<128x16xf32>, vector<16x16xf32> -> vector<16x16xf32>
    %329 = arith.addf %328, %89 : vector<16x16xf32>
    %330 = math.tanh %329 : vector<16x16xf32>
    %c144_255 = arith.constant 144 : index
    %c0_256 = arith.constant 0 : index
    %331 = vector.load %arg4[%c144_255, %c0_256] : memref<256x1xf32, #tpu.memory_space<vmem>>, vector<16x1xf32>
    %332 = vector.broadcast %331 : vector<16x1xf32> to vector<16x16xf32>
    %333 = arith.mulf %332, %330 : vector<16x16xf32>
    %cst_257 = arith.constant dense<0.000000e+00> : vector<16xf32>
    %334 = vector.multi_reduction <add>, %333, %cst_257 [0] : vector<16x16xf32> to vector<16xf32>
    %335 = vector.shape_cast %334 : vector<16xf32> to vector<1x16xf32>
    %c9 = arith.constant 9 : index
    %c0_258 = arith.constant 0 : index
    %336 = vector.load %arg33[%c9, %c0_258] : memref<16x16xf32, #tpu.memory_space<vmem>>, vector<1x16xf32>
    %c9_259 = arith.constant 9 : index
    %c0_260 = arith.constant 0 : index
    %337 = vector.load %arg5[%c9_259, %c0_260] : memref<16x1xf32, #tpu.memory_space<vmem>>, vector<1x1xf32>
    %cst_261 = arith.constant 2.000000e-01 : f32
    %338 = vector.broadcast %cst_261 : f32 to vector<1x1xf32>
    %339 = arith.mulf %338, %337 : vector<1x1xf32>
    %340 = arith.subf %335, %336 : vector<1x16xf32>
    %341 = vector.broadcast %339 : vector<1x1xf32> to vector<1x16xf32>
    %342 = arith.mulf %341, %340 : vector<1x16xf32>
    %343 = arith.addf %336, %342 : vector<1x16xf32>
    %c9_262 = arith.constant 9 : index
    %c0_263 = arith.constant 0 : index
    %344 = vector.load %arg33[%c9_262, %c0_263] : memref<16x16xf32, #tpu.memory_space<vmem>>, vector<1x16xf32>
    tpu.vector_store %arg33[%c9_262, %c0_263], %343 {strides = array<i32>} : memref<16x16xf32, #tpu.memory_space<vmem>>, vector<1x16xf32>,
    %cst_264 = arith.constant dense<0.000000e+00> : vector<1x128xf32>
    %345 = tpu.matmul %343, %90, %cst_264 {dimension_numbers = #tpu.dot_dimension_numbers<[1], [0], [0], [1], [0, 0, 1, 1], [], []>} : vector<1x16xf32>, vector<16x128xf32>, vector<1x128xf32> -> vector<1x128xf32>
    %346 = arith.addf %345, %91 : vector<1x128xf32>
    %c9_265 = arith.constant 9 : index
    %c0_266 = arith.constant 0 : index
    %347 = vector.load %arg31[%c9_265, %c0_266] : memref<16x128xf32, #tpu.memory_space<vmem>>, vector<1x128xf32>
    %348 = arith.mulf %346, %347 : vector<1x128xf32>
    %c9_267 = arith.constant 9 : index
    %c0_268 = arith.constant 0 : index
    %349 = vector.load %arg32[%c9_267, %c0_268] : memref<16x128xf32, #tpu.memory_space<vmem>>, vector<1x128xf32>
    tpu.vector_store %arg32[%c9_267, %c0_268], %348 {strides = array<i32>} : memref<16x128xf32, #tpu.memory_space<vmem>>, vector<1x128xf32>,
    %c160 = arith.constant 160 : index
    %c0_269 = arith.constant 0 : index
    %350 = vector.load %arg30[%c160, %c0_269] : memref<256x128xf32, #tpu.memory_space<vmem>>, vector<16x128xf32>
    %c0_270 = arith.constant 0 : index
    %c0_271 = arith.constant 0 : index
    %351 = vector.load %arg32[%c0_270, %c0_271] : memref<16x128xf32, #tpu.memory_space<vmem>>, vector<16x128xf32>
    %352 = arith.mulf %351, %350 : vector<16x128xf32>
    %cst_272 = arith.constant dense<0.000000e+00> : vector<16x16xf32>
    %353 = tpu.matmul %352, %92, %cst_272 {dimension_numbers = #tpu.dot_dimension_numbers<[1], [0], [0], [1], [0, 0, 1, 1], [], []>} : vector<16x128xf32>, vector<128x16xf32>, vector<16x16xf32> -> vector<16x16xf32>
    %354 = arith.addf %353, %89 : vector<16x16xf32>
    %355 = math.tanh %354 : vector<16x16xf32>
    %c160_273 = arith.constant 160 : index
    %c0_274 = arith.constant 0 : index
    %356 = vector.load %arg4[%c160_273, %c0_274] : memref<256x1xf32, #tpu.memory_space<vmem>>, vector<16x1xf32>
    %357 = vector.broadcast %356 : vector<16x1xf32> to vector<16x16xf32>
    %358 = arith.mulf %357, %355 : vector<16x16xf32>
    %cst_275 = arith.constant dense<0.000000e+00> : vector<16xf32>
    %359 = vector.multi_reduction <add>, %358, %cst_275 [0] : vector<16x16xf32> to vector<16xf32>
    %360 = vector.shape_cast %359 : vector<16xf32> to vector<1x16xf32>
    %c10 = arith.constant 10 : index
    %c0_276 = arith.constant 0 : index
    %361 = vector.load %arg33[%c10, %c0_276] : memref<16x16xf32, #tpu.memory_space<vmem>>, vector<1x16xf32>
    %c10_277 = arith.constant 10 : index
    %c0_278 = arith.constant 0 : index
    %362 = vector.load %arg5[%c10_277, %c0_278] : memref<16x1xf32, #tpu.memory_space<vmem>>, vector<1x1xf32>
    %cst_279 = arith.constant 2.000000e-01 : f32
    %363 = vector.broadcast %cst_279 : f32 to vector<1x1xf32>
    %364 = arith.mulf %363, %362 : vector<1x1xf32>
    %365 = arith.subf %360, %361 : vector<1x16xf32>
    %366 = vector.broadcast %364 : vector<1x1xf32> to vector<1x16xf32>
    %367 = arith.mulf %366, %365 : vector<1x16xf32>
    %368 = arith.addf %361, %367 : vector<1x16xf32>
    %c10_280 = arith.constant 10 : index
    %c0_281 = arith.constant 0 : index
    %369 = vector.load %arg33[%c10_280, %c0_281] : memref<16x16xf32, #tpu.memory_space<vmem>>, vector<1x16xf32>
    tpu.vector_store %arg33[%c10_280, %c0_281], %368 {strides = array<i32>} : memref<16x16xf32, #tpu.memory_space<vmem>>, vector<1x16xf32>,
    %cst_282 = arith.constant dense<0.000000e+00> : vector<1x128xf32>
    %370 = tpu.matmul %368, %90, %cst_282 {dimension_numbers = #tpu.dot_dimension_numbers<[1], [0], [0], [1], [0, 0, 1, 1], [], []>} : vector<1x16xf32>, vector<16x128xf32>, vector<1x128xf32> -> vector<1x128xf32>
    %371 = arith.addf %370, %91 : vector<1x128xf32>
    %c10_283 = arith.constant 10 : index
    %c0_284 = arith.constant 0 : index
    %372 = vector.load %arg31[%c10_283, %c0_284] : memref<16x128xf32, #tpu.memory_space<vmem>>, vector<1x128xf32>
    %373 = arith.mulf %371, %372 : vector<1x128xf32>
    %c10_285 = arith.constant 10 : index
    %c0_286 = arith.constant 0 : index
    %374 = vector.load %arg32[%c10_285, %c0_286] : memref<16x128xf32, #tpu.memory_space<vmem>>, vector<1x128xf32>
    tpu.vector_store %arg32[%c10_285, %c0_286], %373 {strides = array<i32>} : memref<16x128xf32, #tpu.memory_space<vmem>>, vector<1x128xf32>,
    %c176 = arith.constant 176 : index
    %c0_287 = arith.constant 0 : index
    %375 = vector.load %arg30[%c176, %c0_287] : memref<256x128xf32, #tpu.memory_space<vmem>>, vector<16x128xf32>
    %c0_288 = arith.constant 0 : index
    %c0_289 = arith.constant 0 : index
    %376 = vector.load %arg32[%c0_288, %c0_289] : memref<16x128xf32, #tpu.memory_space<vmem>>, vector<16x128xf32>
    %377 = arith.mulf %376, %375 : vector<16x128xf32>
    %cst_290 = arith.constant dense<0.000000e+00> : vector<16x16xf32>
    %378 = tpu.matmul %377, %92, %cst_290 {dimension_numbers = #tpu.dot_dimension_numbers<[1], [0], [0], [1], [0, 0, 1, 1], [], []>} : vector<16x128xf32>, vector<128x16xf32>, vector<16x16xf32> -> vector<16x16xf32>
    %379 = arith.addf %378, %89 : vector<16x16xf32>
    %380 = math.tanh %379 : vector<16x16xf32>
    %c176_291 = arith.constant 176 : index
    %c0_292 = arith.constant 0 : index
    %381 = vector.load %arg4[%c176_291, %c0_292] : memref<256x1xf32, #tpu.memory_space<vmem>>, vector<16x1xf32>
    %382 = vector.broadcast %381 : vector<16x1xf32> to vector<16x16xf32>
    %383 = arith.mulf %382, %380 : vector<16x16xf32>
    %cst_293 = arith.constant dense<0.000000e+00> : vector<16xf32>
    %384 = vector.multi_reduction <add>, %383, %cst_293 [0] : vector<16x16xf32> to vector<16xf32>
    %385 = vector.shape_cast %384 : vector<16xf32> to vector<1x16xf32>
    %c11 = arith.constant 11 : index
    %c0_294 = arith.constant 0 : index
    %386 = vector.load %arg33[%c11, %c0_294] : memref<16x16xf32, #tpu.memory_space<vmem>>, vector<1x16xf32>
    %c11_295 = arith.constant 11 : index
    %c0_296 = arith.constant 0 : index
    %387 = vector.load %arg5[%c11_295, %c0_296] : memref<16x1xf32, #tpu.memory_space<vmem>>, vector<1x1xf32>
    %cst_297 = arith.constant 2.000000e-01 : f32
    %388 = vector.broadcast %cst_297 : f32 to vector<1x1xf32>
    %389 = arith.mulf %388, %387 : vector<1x1xf32>
    %390 = arith.subf %385, %386 : vector<1x16xf32>
    %391 = vector.broadcast %389 : vector<1x1xf32> to vector<1x16xf32>
    %392 = arith.mulf %391, %390 : vector<1x16xf32>
    %393 = arith.addf %386, %392 : vector<1x16xf32>
    %c11_298 = arith.constant 11 : index
    %c0_299 = arith.constant 0 : index
    %394 = vector.load %arg33[%c11_298, %c0_299] : memref<16x16xf32, #tpu.memory_space<vmem>>, vector<1x16xf32>
    tpu.vector_store %arg33[%c11_298, %c0_299], %393 {strides = array<i32>} : memref<16x16xf32, #tpu.memory_space<vmem>>, vector<1x16xf32>,
    %cst_300 = arith.constant dense<0.000000e+00> : vector<1x128xf32>
    %395 = tpu.matmul %393, %90, %cst_300 {dimension_numbers = #tpu.dot_dimension_numbers<[1], [0], [0], [1], [0, 0, 1, 1], [], []>} : vector<1x16xf32>, vector<16x128xf32>, vector<1x128xf32> -> vector<1x128xf32>
    %396 = arith.addf %395, %91 : vector<1x128xf32>
    %c11_301 = arith.constant 11 : index
    %c0_302 = arith.constant 0 : index
    %397 = vector.load %arg31[%c11_301, %c0_302] : memref<16x128xf32, #tpu.memory_space<vmem>>, vector<1x128xf32>
    %398 = arith.mulf %396, %397 : vector<1x128xf32>
    %c11_303 = arith.constant 11 : index
    %c0_304 = arith.constant 0 : index
    %399 = vector.load %arg32[%c11_303, %c0_304] : memref<16x128xf32, #tpu.memory_space<vmem>>, vector<1x128xf32>
    tpu.vector_store %arg32[%c11_303, %c0_304], %398 {strides = array<i32>} : memref<16x128xf32, #tpu.memory_space<vmem>>, vector<1x128xf32>,
    %c192 = arith.constant 192 : index
    %c0_305 = arith.constant 0 : index
    %400 = vector.load %arg30[%c192, %c0_305] : memref<256x128xf32, #tpu.memory_space<vmem>>, vector<16x128xf32>
    %c0_306 = arith.constant 0 : index
    %c0_307 = arith.constant 0 : index
    %401 = vector.load %arg32[%c0_306, %c0_307] : memref<16x128xf32, #tpu.memory_space<vmem>>, vector<16x128xf32>
    %402 = arith.mulf %401, %400 : vector<16x128xf32>
    %cst_308 = arith.constant dense<0.000000e+00> : vector<16x16xf32>
    %403 = tpu.matmul %402, %92, %cst_308 {dimension_numbers = #tpu.dot_dimension_numbers<[1], [0], [0], [1], [0, 0, 1, 1], [], []>} : vector<16x128xf32>, vector<128x16xf32>, vector<16x16xf32> -> vector<16x16xf32>
    %404 = arith.addf %403, %89 : vector<16x16xf32>
    %405 = math.tanh %404 : vector<16x16xf32>
    %c192_309 = arith.constant 192 : index
    %c0_310 = arith.constant 0 : index
    %406 = vector.load %arg4[%c192_309, %c0_310] : memref<256x1xf32, #tpu.memory_space<vmem>>, vector<16x1xf32>
    %407 = vector.broadcast %406 : vector<16x1xf32> to vector<16x16xf32>
    %408 = arith.mulf %407, %405 : vector<16x16xf32>
    %cst_311 = arith.constant dense<0.000000e+00> : vector<16xf32>
    %409 = vector.multi_reduction <add>, %408, %cst_311 [0] : vector<16x16xf32> to vector<16xf32>
    %410 = vector.shape_cast %409 : vector<16xf32> to vector<1x16xf32>
    %c12 = arith.constant 12 : index
    %c0_312 = arith.constant 0 : index
    %411 = vector.load %arg33[%c12, %c0_312] : memref<16x16xf32, #tpu.memory_space<vmem>>, vector<1x16xf32>
    %c12_313 = arith.constant 12 : index
    %c0_314 = arith.constant 0 : index
    %412 = vector.load %arg5[%c12_313, %c0_314] : memref<16x1xf32, #tpu.memory_space<vmem>>, vector<1x1xf32>
    %cst_315 = arith.constant 2.000000e-01 : f32
    %413 = vector.broadcast %cst_315 : f32 to vector<1x1xf32>
    %414 = arith.mulf %413, %412 : vector<1x1xf32>
    %415 = arith.subf %410, %411 : vector<1x16xf32>
    %416 = vector.broadcast %414 : vector<1x1xf32> to vector<1x16xf32>
    %417 = arith.mulf %416, %415 : vector<1x16xf32>
    %418 = arith.addf %411, %417 : vector<1x16xf32>
    %c12_316 = arith.constant 12 : index
    %c0_317 = arith.constant 0 : index
    %419 = vector.load %arg33[%c12_316, %c0_317] : memref<16x16xf32, #tpu.memory_space<vmem>>, vector<1x16xf32>
    tpu.vector_store %arg33[%c12_316, %c0_317], %418 {strides = array<i32>} : memref<16x16xf32, #tpu.memory_space<vmem>>, vector<1x16xf32>,
    %cst_318 = arith.constant dense<0.000000e+00> : vector<1x128xf32>
    %420 = tpu.matmul %418, %90, %cst_318 {dimension_numbers = #tpu.dot_dimension_numbers<[1], [0], [0], [1], [0, 0, 1, 1], [], []>} : vector<1x16xf32>, vector<16x128xf32>, vector<1x128xf32> -> vector<1x128xf32>
    %421 = arith.addf %420, %91 : vector<1x128xf32>
    %c12_319 = arith.constant 12 : index
    %c0_320 = arith.constant 0 : index
    %422 = vector.load %arg31[%c12_319, %c0_320] : memref<16x128xf32, #tpu.memory_space<vmem>>, vector<1x128xf32>
    %423 = arith.mulf %421, %422 : vector<1x128xf32>
    %c12_321 = arith.constant 12 : index
    %c0_322 = arith.constant 0 : index
    %424 = vector.load %arg32[%c12_321, %c0_322] : memref<16x128xf32, #tpu.memory_space<vmem>>, vector<1x128xf32>
    tpu.vector_store %arg32[%c12_321, %c0_322], %423 {strides = array<i32>} : memref<16x128xf32, #tpu.memory_space<vmem>>, vector<1x128xf32>,
    %c208 = arith.constant 208 : index
    %c0_323 = arith.constant 0 : index
    %425 = vector.load %arg30[%c208, %c0_323] : memref<256x128xf32, #tpu.memory_space<vmem>>, vector<16x128xf32>
    %c0_324 = arith.constant 0 : index
    %c0_325 = arith.constant 0 : index
    %426 = vector.load %arg32[%c0_324, %c0_325] : memref<16x128xf32, #tpu.memory_space<vmem>>, vector<16x128xf32>
    %427 = arith.mulf %426, %425 : vector<16x128xf32>
    %cst_326 = arith.constant dense<0.000000e+00> : vector<16x16xf32>
    %428 = tpu.matmul %427, %92, %cst_326 {dimension_numbers = #tpu.dot_dimension_numbers<[1], [0], [0], [1], [0, 0, 1, 1], [], []>} : vector<16x128xf32>, vector<128x16xf32>, vector<16x16xf32> -> vector<16x16xf32>
    %429 = arith.addf %428, %89 : vector<16x16xf32>
    %430 = math.tanh %429 : vector<16x16xf32>
    %c208_327 = arith.constant 208 : index
    %c0_328 = arith.constant 0 : index
    %431 = vector.load %arg4[%c208_327, %c0_328] : memref<256x1xf32, #tpu.memory_space<vmem>>, vector<16x1xf32>
    %432 = vector.broadcast %431 : vector<16x1xf32> to vector<16x16xf32>
    %433 = arith.mulf %432, %430 : vector<16x16xf32>
    %cst_329 = arith.constant dense<0.000000e+00> : vector<16xf32>
    %434 = vector.multi_reduction <add>, %433, %cst_329 [0] : vector<16x16xf32> to vector<16xf32>
    %435 = vector.shape_cast %434 : vector<16xf32> to vector<1x16xf32>
    %c13 = arith.constant 13 : index
    %c0_330 = arith.constant 0 : index
    %436 = vector.load %arg33[%c13, %c0_330] : memref<16x16xf32, #tpu.memory_space<vmem>>, vector<1x16xf32>
    %c13_331 = arith.constant 13 : index
    %c0_332 = arith.constant 0 : index
    %437 = vector.load %arg5[%c13_331, %c0_332] : memref<16x1xf32, #tpu.memory_space<vmem>>, vector<1x1xf32>
    %cst_333 = arith.constant 2.000000e-01 : f32
    %438 = vector.broadcast %cst_333 : f32 to vector<1x1xf32>
    %439 = arith.mulf %438, %437 : vector<1x1xf32>
    %440 = arith.subf %435, %436 : vector<1x16xf32>
    %441 = vector.broadcast %439 : vector<1x1xf32> to vector<1x16xf32>
    %442 = arith.mulf %441, %440 : vector<1x16xf32>
    %443 = arith.addf %436, %442 : vector<1x16xf32>
    %c13_334 = arith.constant 13 : index
    %c0_335 = arith.constant 0 : index
    %444 = vector.load %arg33[%c13_334, %c0_335] : memref<16x16xf32, #tpu.memory_space<vmem>>, vector<1x16xf32>
    tpu.vector_store %arg33[%c13_334, %c0_335], %443 {strides = array<i32>} : memref<16x16xf32, #tpu.memory_space<vmem>>, vector<1x16xf32>,
    %cst_336 = arith.constant dense<0.000000e+00> : vector<1x128xf32>
    %445 = tpu.matmul %443, %90, %cst_336 {dimension_numbers = #tpu.dot_dimension_numbers<[1], [0], [0], [1], [0, 0, 1, 1], [], []>} : vector<1x16xf32>, vector<16x128xf32>, vector<1x128xf32> -> vector<1x128xf32>
    %446 = arith.addf %445, %91 : vector<1x128xf32>
    %c13_337 = arith.constant 13 : index
    %c0_338 = arith.constant 0 : index
    %447 = vector.load %arg31[%c13_337, %c0_338] : memref<16x128xf32, #tpu.memory_space<vmem>>, vector<1x128xf32>
    %448 = arith.mulf %446, %447 : vector<1x128xf32>
    %c13_339 = arith.constant 13 : index
    %c0_340 = arith.constant 0 : index
    %449 = vector.load %arg32[%c13_339, %c0_340] : memref<16x128xf32, #tpu.memory_space<vmem>>, vector<1x128xf32>
    tpu.vector_store %arg32[%c13_339, %c0_340], %448 {strides = array<i32>} : memref<16x128xf32, #tpu.memory_space<vmem>>, vector<1x128xf32>,
    %c224 = arith.constant 224 : index
    %c0_341 = arith.constant 0 : index
    %450 = vector.load %arg30[%c224, %c0_341] : memref<256x128xf32, #tpu.memory_space<vmem>>, vector<16x128xf32>
    %c0_342 = arith.constant 0 : index
    %c0_343 = arith.constant 0 : index
    %451 = vector.load %arg32[%c0_342, %c0_343] : memref<16x128xf32, #tpu.memory_space<vmem>>, vector<16x128xf32>
    %452 = arith.mulf %451, %450 : vector<16x128xf32>
    %cst_344 = arith.constant dense<0.000000e+00> : vector<16x16xf32>
    %453 = tpu.matmul %452, %92, %cst_344 {dimension_numbers = #tpu.dot_dimension_numbers<[1], [0], [0], [1], [0, 0, 1, 1], [], []>} : vector<16x128xf32>, vector<128x16xf32>, vector<16x16xf32> -> vector<16x16xf32>
    %454 = arith.addf %453, %89 : vector<16x16xf32>
    %455 = math.tanh %454 : vector<16x16xf32>
    %c224_345 = arith.constant 224 : index
    %c0_346 = arith.constant 0 : index
    %456 = vector.load %arg4[%c224_345, %c0_346] : memref<256x1xf32, #tpu.memory_space<vmem>>, vector<16x1xf32>
    %457 = vector.broadcast %456 : vector<16x1xf32> to vector<16x16xf32>
    %458 = arith.mulf %457, %455 : vector<16x16xf32>
    %cst_347 = arith.constant dense<0.000000e+00> : vector<16xf32>
    %459 = vector.multi_reduction <add>, %458, %cst_347 [0] : vector<16x16xf32> to vector<16xf32>
    %460 = vector.shape_cast %459 : vector<16xf32> to vector<1x16xf32>
    %c14 = arith.constant 14 : index
    %c0_348 = arith.constant 0 : index
    %461 = vector.load %arg33[%c14, %c0_348] : memref<16x16xf32, #tpu.memory_space<vmem>>, vector<1x16xf32>
    %c14_349 = arith.constant 14 : index
    %c0_350 = arith.constant 0 : index
    %462 = vector.load %arg5[%c14_349, %c0_350] : memref<16x1xf32, #tpu.memory_space<vmem>>, vector<1x1xf32>
    %cst_351 = arith.constant 2.000000e-01 : f32
    %463 = vector.broadcast %cst_351 : f32 to vector<1x1xf32>
    %464 = arith.mulf %463, %462 : vector<1x1xf32>
    %465 = arith.subf %460, %461 : vector<1x16xf32>
    %466 = vector.broadcast %464 : vector<1x1xf32> to vector<1x16xf32>
    %467 = arith.mulf %466, %465 : vector<1x16xf32>
    %468 = arith.addf %461, %467 : vector<1x16xf32>
    %c14_352 = arith.constant 14 : index
    %c0_353 = arith.constant 0 : index
    %469 = vector.load %arg33[%c14_352, %c0_353] : memref<16x16xf32, #tpu.memory_space<vmem>>, vector<1x16xf32>
    tpu.vector_store %arg33[%c14_352, %c0_353], %468 {strides = array<i32>} : memref<16x16xf32, #tpu.memory_space<vmem>>, vector<1x16xf32>,
    %cst_354 = arith.constant dense<0.000000e+00> : vector<1x128xf32>
    %470 = tpu.matmul %468, %90, %cst_354 {dimension_numbers = #tpu.dot_dimension_numbers<[1], [0], [0], [1], [0, 0, 1, 1], [], []>} : vector<1x16xf32>, vector<16x128xf32>, vector<1x128xf32> -> vector<1x128xf32>
    %471 = arith.addf %470, %91 : vector<1x128xf32>
    %c14_355 = arith.constant 14 : index
    %c0_356 = arith.constant 0 : index
    %472 = vector.load %arg31[%c14_355, %c0_356] : memref<16x128xf32, #tpu.memory_space<vmem>>, vector<1x128xf32>
    %473 = arith.mulf %471, %472 : vector<1x128xf32>
    %c14_357 = arith.constant 14 : index
    %c0_358 = arith.constant 0 : index
    %474 = vector.load %arg32[%c14_357, %c0_358] : memref<16x128xf32, #tpu.memory_space<vmem>>, vector<1x128xf32>
    tpu.vector_store %arg32[%c14_357, %c0_358], %473 {strides = array<i32>} : memref<16x128xf32, #tpu.memory_space<vmem>>, vector<1x128xf32>,
    %c240 = arith.constant 240 : index
    %c0_359 = arith.constant 0 : index
    %475 = vector.load %arg30[%c240, %c0_359] : memref<256x128xf32, #tpu.memory_space<vmem>>, vector<16x128xf32>
    %c0_360 = arith.constant 0 : index
    %c0_361 = arith.constant 0 : index
    %476 = vector.load %arg32[%c0_360, %c0_361] : memref<16x128xf32, #tpu.memory_space<vmem>>, vector<16x128xf32>
    %477 = arith.mulf %476, %475 : vector<16x128xf32>
    %cst_362 = arith.constant dense<0.000000e+00> : vector<16x16xf32>
    %478 = tpu.matmul %477, %92, %cst_362 {dimension_numbers = #tpu.dot_dimension_numbers<[1], [0], [0], [1], [0, 0, 1, 1], [], []>} : vector<16x128xf32>, vector<128x16xf32>, vector<16x16xf32> -> vector<16x16xf32>
    %479 = arith.addf %478, %89 : vector<16x16xf32>
    %480 = math.tanh %479 : vector<16x16xf32>
    %c240_363 = arith.constant 240 : index
    %c0_364 = arith.constant 0 : index
    %481 = vector.load %arg4[%c240_363, %c0_364] : memref<256x1xf32, #tpu.memory_space<vmem>>, vector<16x1xf32>
    %482 = vector.broadcast %481 : vector<16x1xf32> to vector<16x16xf32>
    %483 = arith.mulf %482, %480 : vector<16x16xf32>
    %cst_365 = arith.constant dense<0.000000e+00> : vector<16xf32>
    %484 = vector.multi_reduction <add>, %483, %cst_365 [0] : vector<16x16xf32> to vector<16xf32>
    %485 = vector.shape_cast %484 : vector<16xf32> to vector<1x16xf32>
    %c15 = arith.constant 15 : index
    %c0_366 = arith.constant 0 : index
    %486 = vector.load %arg33[%c15, %c0_366] : memref<16x16xf32, #tpu.memory_space<vmem>>, vector<1x16xf32>
    %c15_367 = arith.constant 15 : index
    %c0_368 = arith.constant 0 : index
    %487 = vector.load %arg5[%c15_367, %c0_368] : memref<16x1xf32, #tpu.memory_space<vmem>>, vector<1x1xf32>
    %cst_369 = arith.constant 2.000000e-01 : f32
    %488 = vector.broadcast %cst_369 : f32 to vector<1x1xf32>
    %489 = arith.mulf %488, %487 : vector<1x1xf32>
    %490 = arith.subf %485, %486 : vector<1x16xf32>
    %491 = vector.broadcast %489 : vector<1x1xf32> to vector<1x16xf32>
    %492 = arith.mulf %491, %490 : vector<1x16xf32>
    %493 = arith.addf %486, %492 : vector<1x16xf32>
    %c15_370 = arith.constant 15 : index
    %c0_371 = arith.constant 0 : index
    %494 = vector.load %arg33[%c15_370, %c0_371] : memref<16x16xf32, #tpu.memory_space<vmem>>, vector<1x16xf32>
    tpu.vector_store %arg33[%c15_370, %c0_371], %493 {strides = array<i32>} : memref<16x16xf32, #tpu.memory_space<vmem>>, vector<1x16xf32>,
    %cst_372 = arith.constant dense<0.000000e+00> : vector<1x128xf32>
    %495 = tpu.matmul %493, %90, %cst_372 {dimension_numbers = #tpu.dot_dimension_numbers<[1], [0], [0], [1], [0, 0, 1, 1], [], []>} : vector<1x16xf32>, vector<16x128xf32>, vector<1x128xf32> -> vector<1x128xf32>
    %496 = arith.addf %495, %91 : vector<1x128xf32>
    %c15_373 = arith.constant 15 : index
    %c0_374 = arith.constant 0 : index
    %497 = vector.load %arg31[%c15_373, %c0_374] : memref<16x128xf32, #tpu.memory_space<vmem>>, vector<1x128xf32>
    %498 = arith.mulf %496, %497 : vector<1x128xf32>
    %c15_375 = arith.constant 15 : index
    %c0_376 = arith.constant 0 : index
    %499 = vector.load %arg32[%c15_375, %c0_376] : memref<16x128xf32, #tpu.memory_space<vmem>>, vector<1x128xf32>
    tpu.vector_store %arg32[%c15_375, %c0_376], %498 {strides = array<i32>} : memref<16x128xf32, #tpu.memory_space<vmem>>, vector<1x128xf32>,
    %c0_377 = arith.constant 0 : index
    %c0_378 = arith.constant 0 : index
    %500 = vector.load %arg33[%c0_377, %c0_378] : memref<16x16xf32, #tpu.memory_space<vmem>>, vector<16x16xf32>
    %cst_379 = arith.constant dense<0.000000e+00> : vector<8x16xf32>
    %501 = tpu.matmul %2, %500, %cst_379 {dimension_numbers = #tpu.dot_dimension_numbers<[1], [0], [0], [1], [0, 0, 1, 1], [], []>} : vector<8x16xf32>, vector<16x16xf32>, vector<8x16xf32> -> vector<8x16xf32>
    %cst_380 = arith.constant 0.000000e+00 : f32
    %502 = vector.broadcast %cst_380 : f32 to vector<8x1xf32>
    %503 = arith.cmpf ogt, %3, %502 : vector<8x1xf32>
    %504 = arith.mulf %501, %501 : vector<8x16xf32>
    %cst_381 = arith.constant dense<0.000000e+00> : vector<8xf32>
    %505 = vector.multi_reduction <add>, %504, %cst_381 [1] : vector<8x16xf32> to vector<8xf32>
    %506 = vector.shape_cast %505 : vector<8xf32> to vector<8x1xf32>
    %cst_382 = arith.constant 9.99999996E-13 : f32
    %507 = vector.broadcast %cst_382 : f32 to vector<8x1xf32>
    %508 = arith.addf %506, %507 : vector<8x1xf32>
    %509 = math.rsqrt %508 : vector<8x1xf32>
    %510 = vector.broadcast %509 : vector<8x1xf32> to vector<8x16xf32>
    %511 = arith.mulf %501, %510 : vector<8x16xf32>
    %512 = vector.shape_cast %503 : vector<8x1xi1> to vector<8x1xi1>
    %513 = vector.broadcast %512 : vector<8x1xi1> to vector<8x16xi1>
    %514 = arith.select %513, %511, %53 : vector<8x16xi1>, vector<8x16xf32>
    %c0_383 = arith.constant 0 : index
    %c0_384 = arith.constant 0 : index
    %c0_385 = arith.constant 0 : index
    %515 = vector.load %arg29[%c0_383, %c0_384, %c0_385] : memref<1x8x16xf32, #tpu.memory_space<vmem>>, vector<1x8x16xf32>
    %516 = vector.shape_cast %515 : vector<1x8x16xf32> to vector<8x16xf32>
    %517 = vector.shape_cast %514 : vector<8x16xf32> to vector<1x8x16xf32>
    tpu.vector_store %arg29[%c0_383, %c0_384, %c0_385], %517 {strides = array<i32>} : memref<1x8x16xf32, #tpu.memory_space<vmem>>, vector<1x8x16xf32>,
    return
  }
  func.func @transform_0(%arg0: i32) -> (i32, i32) {
    %c0_i32 = arith.constant 0 : i32
    %c0_i32_0 = arith.constant 0 : i32
    %c0_i32_1 = arith.constant 0 : i32
    return %c0_i32, %c0_i32_0 : i32, i32
  }
  func.func @transform_1(%arg0: i32) -> (i32, i32) {
    %c0_i32 = arith.constant 0 : i32
    %c0_i32_0 = arith.constant 0 : i32
    %c0_i32_1 = arith.constant 0 : i32
    return %c0_i32, %c0_i32_0 : i32, i32
  }
  func.func @transform_2(%arg0: i32) -> (i32, i32) {
    %c0_i32 = arith.constant 0 : i32
    %c0_i32_0 = arith.constant 0 : i32
    %c0_i32_1 = arith.constant 0 : i32
    return %c0_i32, %c0_i32_0 : i32, i32
  }
  func.func @transform_3(%arg0: i32) -> (i32, i32) {
    %c0_i32 = arith.constant 0 : i32
    %c0_i32_0 = arith.constant 0 : i32
    %c0_i32_1 = arith.constant 0 : i32
    return %c0_i32, %c0_i32_0 : i32, i32
  }
  func.func @transform_4(%arg0: i32) -> (i32, i32) {
    %c0_i32 = arith.constant 0 : i32
    %c0_i32_0 = arith.constant 0 : i32
    %c0_i32_1 = arith.constant 0 : i32
    return %c0_i32, %c0_i32_0 : i32, i32
  }
  func.func @transform_5(%arg0: i32) -> (i32, i32) {
    %c0_i32 = arith.constant 0 : i32
    %c0_i32_0 = arith.constant 0 : i32
    %c0_i32_1 = arith.constant 0 : i32
    return %c0_i32, %c0_i32_0 : i32, i32
  }
  func.func @transform_6(%arg0: i32) -> (i32, i32, i32) {
    %c0_i32 = arith.constant 0 : i32
    %c0_i32_0 = arith.constant 0 : i32
    %c0_i32_1 = arith.constant 0 : i32
    return %arg0, %c0_i32, %c0_i32_0 : i32, i32, i32
  }
  func.func @transform_7(%arg0: i32) -> (i32, i32, i32) {
    %c0_i32 = arith.constant 0 : i32
    %c0_i32_0 = arith.constant 0 : i32
    %c0_i32_1 = arith.constant 0 : i32
    return %arg0, %c0_i32, %c0_i32_0 : i32, i32, i32
  }
  func.func @transform_8(%arg0: i32) -> (i32, i32, i32) {
    %c0_i32 = arith.constant 0 : i32
    %c0_i32_0 = arith.constant 0 : i32
    %c0_i32_1 = arith.constant 0 : i32
    return %arg0, %c0_i32, %c0_i32_0 : i32, i32, i32
  }
  func.func @transform_9(%arg0: i32) -> (i32, i32, i32) {
    %c0_i32 = arith.constant 0 : i32
    %c0_i32_0 = arith.constant 0 : i32
    %c0_i32_1 = arith.constant 0 : i32
    return %arg0, %c0_i32, %c0_i32_0 : i32, i32, i32
  }
  func.func @transform_10(%arg0: i32) -> (i32, i32) {
    %c0_i32 = arith.constant 0 : i32
    %c0_i32_0 = arith.constant 0 : i32
    %c0_i32_1 = arith.constant 0 : i32
    return %c0_i32, %c0_i32_0 : i32, i32
  }
  func.func @transform_11(%arg0: i32) -> (i32, i32) {
    %c0_i32 = arith.constant 0 : i32
    %c0_i32_0 = arith.constant 0 : i32
    %c0_i32_1 = arith.constant 0 : i32
    return %c0_i32, %c0_i32_0 : i32, i32
  }
  func.func @transform_12(%arg0: i32) -> (i32, i32) {
    %c0_i32 = arith.constant 0 : i32
    %c0_i32_0 = arith.constant 0 : i32
    %c0_i32_1 = arith.constant 0 : i32
    return %c0_i32, %c0_i32_0 : i32, i32
  }
  func.func @transform_13(%arg0: i32) -> (i32, i32) {
    %c0_i32 = arith.constant 0 : i32
    %c0_i32_0 = arith.constant 0 : i32
    %c0_i32_1 = arith.constant 0 : i32
    return %c0_i32, %c0_i32_0 : i32, i32
  }
  func.func @transform_14(%arg0: i32) -> (i32, i32) {
    %c0_i32 = arith.constant 0 : i32
    %c0_i32_0 = arith.constant 0 : i32
    %c0_i32_1 = arith.constant 0 : i32
    return %c0_i32, %c0_i32_0 : i32, i32
  }
  func.func @transform_15(%arg0: i32) -> (i32, i32) {
    %c0_i32 = arith.constant 0 : i32
    %c0_i32_0 = arith.constant 0 : i32
    %c0_i32_1 = arith.constant 0 : i32
    return %c0_i32, %c0_i32_0 : i32, i32
  }
  func.func @transform_16(%arg0: i32) -> (i32, i32) {
    %c0_i32 = arith.constant 0 : i32
    %c0_i32_0 = arith.constant 0 : i32
    %c0_i32_1 = arith.constant 0 : i32
    return %c0_i32, %c0_i32_0 : i32, i32
  }
  func.func @transform_17(%arg0: i32) -> (i32, i32) {
    %c0_i32 = arith.constant 0 : i32
    %c0_i32_0 = arith.constant 0 : i32
    %c0_i32_1 = arith.constant 0 : i32
    return %c0_i32, %c0_i32_0 : i32, i32
  }
  func.func @transform_18(%arg0: i32) -> (i32, i32) {
    %c0_i32 = arith.constant 0 : i32
    %c0_i32_0 = arith.constant 0 : i32
    %c0_i32_1 = arith.constant 0 : i32
    return %c0_i32, %c0_i32_0 : i32, i32
  }
  func.func @transform_19(%arg0: i32) -> (i32, i32) {
    %c0_i32 = arith.constant 0 : i32
    %c0_i32_0 = arith.constant 0 : i32
    %c0_i32_1 = arith.constant 0 : i32
    return %c0_i32, %c0_i32_0 : i32, i32
  }
  func.func @transform_20(%arg0: i32) -> (i32, i32) {
    %c0_i32 = arith.constant 0 : i32
    %c0_i32_0 = arith.constant 0 : i32
    %c0_i32_1 = arith.constant 0 : i32
    return %c0_i32, %c0_i32_0 : i32, i32
  }
  func.func @transform_21(%arg0: i32) -> (i32, i32) {
    %c0_i32 = arith.constant 0 : i32
    %c0_i32_0 = arith.constant 0 : i32
    %c0_i32_1 = arith.constant 0 : i32
    return %c0_i32, %c0_i32_0 : i32, i32
  }
  func.func @transform_22(%arg0: i32) -> (i32, i32) {
    %c0_i32 = arith.constant 0 : i32
    %c0_i32_0 = arith.constant 0 : i32
    %c0_i32_1 = arith.constant 0 : i32
    return %c0_i32, %c0_i32_0 : i32, i32
  }
  func.func @transform_23(%arg0: i32) -> (i32, i32) {
    %c0_i32 = arith.constant 0 : i32
    %c0_i32_0 = arith.constant 0 : i32
    %c0_i32_1 = arith.constant 0 : i32
    return %c0_i32, %c0_i32_0 : i32, i32
  }
  func.func @transform_24(%arg0: i32) -> (i32, i32) {
    %c0_i32 = arith.constant 0 : i32
    %c0_i32_0 = arith.constant 0 : i32
    %c0_i32_1 = arith.constant 0 : i32
    return %c0_i32, %c0_i32_0 : i32, i32
  }
  func.func @transform_25(%arg0: i32) -> (i32, i32) {
    %c0_i32 = arith.constant 0 : i32
    %c0_i32_0 = arith.constant 0 : i32
    %c0_i32_1 = arith.constant 0 : i32
    return %c0_i32, %c0_i32_0 : i32, i32
  }
  func.func @transform_26(%arg0: i32) -> (i32, i32) {
    %c0_i32 = arith.constant 0 : i32
    %c0_i32_0 = arith.constant 0 : i32
    %c0_i32_1 = arith.constant 0 : i32
    return %c0_i32, %c0_i32_0 : i32, i32
  }
  func.func @transform_27(%arg0: i32) -> (i32, i32) {
    %c0_i32 = arith.constant 0 : i32
    %c0_i32_0 = arith.constant 0 : i32
    %c0_i32_1 = arith.constant 0 : i32
    return %c0_i32, %c0_i32_0 : i32, i32
  }
  func.func @transform_28(%arg0: i32) -> (i32, i32, i32) {
    %c0_i32 = arith.constant 0 : i32
    %c0_i32_0 = arith.constant 0 : i32
    %c0_i32_1 = arith.constant 0 : i32
    return %arg0, %c0_i32, %c0_i32_0 : i32, i32, i32
  }
}

</mosaic_0001>

<bundles_post_ra>
// kernel: dmgcn_forward.1
= control target key start
LH: loop header
LB: loop body
LE: loop exit
PB: predicated region body
PF: predicated region fallthrough
CT: control target
= control target key end

     0   :  { %s9926_s0 = inlined_call_operand.vmem [shape: f32[16,8], index: 0, kind: input, shape index: {}]   ;;  %s9927_s1 = inlined_call_operand.vmem [shape: f32[16,8], index: 1, kind: input, shape index: {}]   ;;  %s9928_s2 = inlined_call_operand.vmem [shape: f32[8,16], index: 2, kind: input, shape index: {}]   ;;  %s9929_s3 = inlined_call_operand.vmem [shape: f32[256,1], index: 3, kind: input, shape index: {}]   ;;  %s9930_s4 = inlined_call_operand.vmem [shape: f32[16,1], index: 4, kind: input, shape index: {}]   ;;  %s9931_s5 = inlined_call_operand.vmem [shape: f32[8,1], index: 5, kind: input, shape index: {}]   ;;  %s9932_s6 = inlined_call_operand.vmem [shape: f32[2,8,16], index: 6, kind: input, shape index: {}]   ;;  %s9933_s7 = inlined_call_operand.vmem [shape: f32[2,16,8], index: 7, kind: input, shape index: {}]   ;;  %s9934_s8 = inlined_call_operand.vmem [shape: f32[2,16,12], index: 8, kind: input, shape index: {}]   ;;  %s9935_s9 = inlined_call_operand.vmem [shape: f32[2,256,1], index: 9, kind: input, shape index: {}]   ;;  %s9936_s10 = inlined_call_operand.vmem [shape: f32[16,8], index: 10, kind: input, shape index: {}]   ;;  %s9937_s11 = inlined_call_operand.vmem [shape: f32[16,128], index: 11, kind: input, shape index: {}]   ;;  %s9938_s12 = inlined_call_operand.vmem [shape: f32[1,128], index: 12, kind: input, shape index: {}]   ;;  %s9939_s13 = inlined_call_operand.vmem [shape: f32[12,128], index: 13, kind: input, shape index: {}]   ;;  %s9940_s14 = inlined_call_operand.vmem [shape: f32[1,128], index: 14, kind: input, shape index: {}]   ;;  %s9941_s15 = inlined_call_operand.vmem [shape: f32[128,16], index: 15, kind: input, shape index: {}]   ;;  %s9942_s16 = inlined_call_operand.vmem [shape: f32[8,16], index: 16, kind: input, shape index: {}]   ;;  %s9943_s17 = inlined_call_operand.vmem [shape: f32[1,16], index: 17, kind: input, shape index: {}]   ;;  %s9944_s18 = inlined_call_operand.vmem [shape: f32[16,128], index: 18, kind: input, shape index: {}]   ;;  %s9945_s19 = inlined_call_operand.vmem [shape: f32[1,128], index: 19, kind: input, shape index: {}]   ;;  %s9946_s20 = inlined_call_operand.vmem [shape: f32[12,128], index: 20, kind: input, shape index: {}]   ;;  %s9947_s21 = inlined_call_operand.vmem [shape: f32[1,128], index: 21, kind: input, shape index: {}]   ;;  %s9948_s22 = inlined_call_operand.vmem [shape: f32[10,128], index: 22, kind: input, shape index: {}]   ;;  %s9949_s23 = inlined_call_operand.vmem [shape: f32[1,128], index: 23, kind: input, shape index: {}]   ;;  %s9950_s24 = inlined_call_operand.vmem [shape: f32[1,10], index: 24, kind: input, shape index: {}]   ;;  %s9951_s25 = inlined_call_operand.vmem [shape: f32[128,16], index: 25, kind: input, shape index: {}]   ;;  %s9952_s26 = inlined_call_operand.vmem [shape: f32[8,16], index: 26, kind: input, shape index: {}]   ;;  %s9953_s27 = inlined_call_operand.vmem [shape: f32[1,16], index: 27, kind: input, shape index: {}]   ;;  %s9954_s28 = inlined_call_operand.hbm [shape: f32[2,8,16], index: 28, kind: output, shape index: {}]  }
   0x1   :  { %9981 = sst [smem:[#allocation17_spill]] %s9926_s0 }
   0x2   :  { %9982 = sst [smem:[#allocation18_spill]] %s9927_s1 }
   0x3   :  { %9983 = sst [smem:[#allocation19_spill]] %s9928_s2 }
   0x4   :  { %9984 = sst [smem:[#allocation20_spill]] %s9929_s3 }
   0x5   :  { %9985 = sst [smem:[#allocation21_spill]] %s9930_s4 }
   0x6   :  { %9986 = sst [smem:[#allocation22_spill]] %s9931_s5 }
   0x7   :  { %9987 = sst [smem:[#allocation23_spill]] %s9932_s6 }
   0x8   :  { %9988 = sst [smem:[#allocation24_spill]] %s9933_s7 }
   0x9   :  { %9989 = sst [smem:[#allocation25_spill]] %s9934_s8 }
   0xa   :  { %9990 = sst [smem:[#allocation26_spill]] %s9935_s9 }
   0xb   :  { %9991 = sst [smem:[#allocation27_spill]] %s9936_s10 }
   0xc   :  { %9992 = sst [smem:[#allocation28_spill]] %s9937_s11 }
   0xd   :  { %9993 = sst [smem:[#allocation29_spill]] %s9938_s12 }
   0xe   :  { %9994 = sst [smem:[#allocation30_spill]] %s9954_s28 }
   0xf   :  { %33 = vsyncpa [#allocation7], 0 }
  0x10   :  { %35 = vsyncpa [#allocation7 + $0x1], 0  ;;  %s8595_s8 = smov 0   ;;  %s8597_s5 = smov 0  }
  0x11   :  { %s8599_s9 = smov 0   ;;  %s8601_s30 = smov 0  }
  0x12 LB: > { %9995 = sst [smem:[#allocation9_spill]] %s8430_s8  ;;  %s8616_s3 = sadd.s32 4294967295, %s8442_s30   ;;  %s8442_s30 = sphi %s8601_s30, %s10032_s30   ;;  %s8438_s9 = sphi %s8599_s9, %s10034_s9   ;;  %s8434_s5 = sphi %s8597_s5, %s10036_s5   ;;  %s8430_s8 = sphi %s8595_s8, %s10035_s8  }
  0x13   : > { %9996 = sst [smem:[#allocation10_spill]] %s8438_s9  ;;  %s6177_s6 = sadd.s32 4294967294, %s8442_s30  }
  0x14   : > { %9997 = sst [smem:[#allocation11_spill]] %s8442_s30  ;;  %s8620_s10 = sadd.s32 1, %s8442_s30  }
  0x15   : > { %9998 = sst [smem:[#allocation12_spill]] %s8616_s3  ;;  %s656_s0 = sadd.s32 1, %s8438_s9 }
  0x16   : > { %9999 = sst [smem:[#allocation13_spill]] %s8620_s10  ;;  %s653_s11 = ssub.s32 %s8442_s30, %s8620_s10 }
  0x17   : > { %p666_p0 = scmp.ne.s32.totalorder %s8438_s9, %s8434_s5  ;;  %p654_p1 = scmp.eq.s32.totalorder %s653_s11, 0 }
  0x18   : > { %p667_p2 = scmp.eq.s32.totalorder %s8616_s3, 1  ;;  %p672_p3 = scmp.ne.s32.totalorder %s8434_s5, %s8430_s8 }
  0x19   : > { %p673_p4 = scmp.eq.s32.totalorder %s6177_s6, 1  ;;  %p6180_p7 = scmp.ge.s32.totalorder %s8442_s30, 1 }
  0x1a   : > { %s8631_s29 = scalar_select %p654_p1, %s8438_s9, %s656_s0  }
  0x1b   : > { %p8633_p5 = por %p667_p2, %p666_p0  ;;  %p8637_p6 = por %p673_p4, %p672_p3 }
  0x1c   : > { %10000 = sst [smem:[#allocation14_spill]] %s8631_s29  ;;  %p794_p8 = scmp.lt.s32.totalorder %s8442_s30, 3 }
  0x1d   : > { %s10001_s2 = scalar_select %p8633_p5, 1, 0 }
  0x1e   : > { %s10003_s7 = scalar_select %p8637_p6, 1, 0 }
  0x1f   : > { %10002 = sst [smem:[#allocation15_spill]] %s10001_s2  ;;  %p795_p9 = pnand %p6180_p7, %p794_p8 }
  0x20   : > { %10004 = sst [smem:[#allocation16_spill]] %s10003_s7  ;;  %p882_p10 = scmp.lt.s32.totalorder (!%p795_p9), %s8616_s3, 1  ;;  %vm912_vm0 = vcmask (!%p795_p9), 64512   ;;  %v1257_v11 = vld [vmem:[%s9939_s13] sm:$0xff] (!%p795_p9)  ;;  %v1258_v12 = vld [vmem:[%s9939_s13 + $0x8] sm:$0xf] (!%p795_p9) }
  0x21   : > { %798 = sbr.rel (%p795_p9) target bundleno = 9563 (0x255b), region = 132  ;;  %s10005_s4 = sld [smem:[#allocation17_spill]] (!%p795_p9)  ;;  %vm1273_vm1 = vcmask (!%p795_p9), 1043456   ;;  %v7569_v13 = vpack.c.bf16 (!%p795_p9), %v1258_v12, %v1257_v11  ;;  %vm8444_vm2 = vmmov (!%p795_p9), 1   ;;  %vm1081_vm4 = vcmask (!%p795_p9), 130048   ;;  %v1370_v23 = vld [vmem:[%s9942_s16] sm:$0xff] (!%p795_p9) }
  0x22   : > { %s10006_s11 = sld [smem:[#allocation18_spill]] (!%p795_p9)  ;;  %s10007_s7 = sld [smem:[#allocation28_spill]] (!%p795_p9)  ;;  %vm8711_vm3 = vmpackc.low (!%p795_p9), %vm1273_vm1, %vm8444_vm2  ;;  %vm1266_vm5 = vcmask (!%p795_p9), 97280   ;;  %v1354_v24 = vld [vmem:[%s9941_s15] sm:$0xff] (!%p795_p9)  ;;  %v1355_v25 = vld [vmem:[%s9941_s15 + $0x8] sm:$0xff] (!%p795_p9)  ;;  %v9976_v12 = vmov (!%p795_p9), 0.0|0.0  }
  0x23   : > { %s10008_s30 = sld [smem:[#allocation23_spill]] (!%p795_p9)  ;;  %s10012_s2 = sld [smem:[#allocation25_spill]] (!%p795_p9)  ;;  %v7575_v26 = vpack.c.bf16 (!%p795_p9), %v1355_v25, %v1354_v24  ;;  %v6198_v38 = vld [vmem:[%s9940_s14] ss:$0 sm:$0xff] (!%p795_p9)  ;;  %v1356_v39 = vld [vmem:[%s9941_s15 + $0x10] sm:$0xff] (!%p795_p9)  ;;  %v1357_v40 = vld [vmem:[%s9941_s15 + $0x18] sm:$0xff] (!%p795_p9) }
  0x24   : > { %s10014_s0 = sld [smem:[#allocation29_spill]] (!%p795_p9)  ;;  %v7579_v47 = vpack.c.bf16 (!%p795_p9), %v1357_v40, %v1356_v39  ;;  %v1358_v50 = vld [vmem:[%s9941_s15 + $0x20] sm:$0xff] (!%p795_p9)  ;;  %v1359_v51 = vld [vmem:[%s9941_s15 + $0x28] sm:$0xff] (!%p795_p9)  ;;  %v1360_v55 = vld [vmem:[%s9941_s15 + $0x30] sm:$0xff] (!%p795_p9)  ;;  %vm8446_vm6 = vmmov (!%p795_p9), 0   ;;  %s10015_s8 = sld [smem:[#allocation19_spill]] (!%p795_p9) }
  0x25   : > { %v7583_v54 = vpack.c.bf16 (!%p795_p9), %v1359_v51, %v1358_v50  ;;  %v1361_v56 = vld [vmem:[%s9941_s15 + $0x38] sm:$0xff] (!%p795_p9)  ;;  %v1362_v58 = vld [vmem:[%s9941_s15 + $0x40] sm:$0xff] (!%p795_p9)  ;;  %v1363_v59 = vld [vmem:[%s9941_s15 + $0x48] sm:$0xff] (!%p795_p9)  ;;  %v8448_v25 = vmov (!%p795_p9), 0   ;;  %s10021_s1 = sld [smem:[#allocation21_spill]] (!%p795_p9)  ;;  %vm2329_vm9 = vcmask (!%p795_p9), 1041408  }
  0x26   : > { %v7587_v57 = vpack.c.bf16 (!%p795_p9), %v1361_v56, %v1360_v55  ;;  %v7591_v60 = vpack.c.bf16 (!%p795_p9), %v1363_v59, %v1362_v58  ;;  %v1364_v61 = vld [vmem:[%s9941_s15 + $0x50] sm:$0xff] (!%p795_p9)  ;;  %v1365_v62 = vld [vmem:[%s9941_s15 + $0x58] sm:$0xff] (!%p795_p9)  ;;  %8239 = vset.pattern.permute.xlu0 (!%p795_p9), %v8448_v25  ;;  %8240 = vset.pattern.permute.xlu1 (!%p795_p9), %v8448_v25  ;;  %vm8987_vm10 = vmpackc.low (!%p795_p9), %vm2329_vm9, %vm8444_vm2  ;;  %vm2232_vm11 = vcmask (!%p795_p9), 80896   ;;  %vm2999_vm12 = vcmask (!%p795_p9), 122880  }
  0x27   : > { %v8647_v0 = vld [vmem:[%s10005_s4] sm:$0xff] (!%p795_p9)  ;;  %v8679_v5 = vld [vmem:[%s10005_s4 + $0x8] sm:$0xff] (!%p795_p9)  ;;  %v7595_v63 = vpack.c.bf16 (!%p795_p9), %v1365_v62, %v1364_v61 }
  0x28   : > { %v8652_v1 = vld [vmem:[%s10006_s11] sm:$0xff]  ;;  %6718 = vmatprep.mubr.msk.f32.mxu0 %vm912_vm0, %v8647_v0  ;;  %s8659_s29 = scalar_select %p882_p10, %s8616_s3, 1  ;;  %v1168_v3 = vld [vmem:[%s10007_s7 + $0x8] sm:$0xff] }
  0x29   : > { %6723 = vmatprep.mubr.msk.f32.mxu1 %vm912_vm0, %v8652_v1  ;;  %v1167_v2 = vld [vmem:[%s10007_s7] sm:$0xff]  ;;  %v8684_v6 = vld [vmem:[%s10006_s11 + $0x8] sm:$0xff]  ;;  %s10009_s3 = sld [smem:[#allocation27_spill]] }
  0x2a   : > { %s6182_s6 = sshll.u32 %s8659_s29, 3  ;;  %v7565_v7 = vpack.c.bf16 %v1168_v3, %v1167_v2  ;;  %s6277_s10 = sshll.u32 %s8659_s29, 4  ;;  %v6195_v31 = vld [vmem:[%s10014_s0] ss:$0 sm:$0xff]  ;;  %v1367_v3 = vld [vmem:[%s9941_s15 + $0x68] sm:$0xff] }
  0x2b   : > { %s8671_s28 = scalar_lea.vmem %s10008_s30, %s6182_s6  ;;  %s895_s12 = scalar_lea.vmem %s10012_s2, %s6277_s10  ;;  %v1366_v2 = vld [vmem:[%s9941_s15 + $0x60] sm:$0xff] }
  0x2c   : > { %v8674_v4 = vld [vmem:[%s8671_s28] sm:$0xff]  ;;  %v8729_v22 = vld [vmem:[%s895_s12 + $0x8] sm:$0xff]  ;;  %s6279_s2 = sshll.u32 %s8659_s29, 8  ;;  %s10018_s6 = sld [smem:[#allocation26_spill]] }
  0x2d   : > { %6716 = vmatprep.subr.mxu0 %v8674_v4  ;;  %6721 = vmatprep.subr.mxu1 %v8674_v4  ;;  %v8723_v21 = vld [vmem:[%s895_s12] sm:$0xff]  ;;  %s879_s29 = sand.u32 1, %s8434_s5   ;;  %s10028_s12 = sld [smem:[#allocation30_spill]] }
  0x2e   : > { %6717 = vmatpush3.msra.mxu0 %v8674_v4  ;;  %6722 = vmatpush3.msra.mxu1 %v8674_v4  ;;  %v905_v24 = vld [vmem:[%s10015_s8] sm:$0xff]  ;;  %s6181_s9 = sshll.u32 %s879_s29, 3 }
  0x2f   : > { %6719 = vmatmul.mubr.msk.f32.vlgmr.msra.gmra.mrb[0].mxu0 %vm912_vm0, %v8679_v5  ;;  %6724 = vmatmul.mubr.msk.f32.vlgmr.msra.gmra.mrb[0].mxu1 %vm912_vm0, %v8684_v6  ;;  %v910_v8 = vld [vmem:[%s10009_s3] sm:$0xff]  ;;  %v911_v9 = vld [vmem:[%s10009_s3 + $0x8] sm:$0xff]  ;;  %s10013_s3 = sld [smem:[#allocation24_spill]] }
  0x30   : > { %7566 = vmatprep.subr.bf16.mxu1 %v7565_v7  ;;  %v8700_v10 = vpack.c.bf16 %v911_v9, %v910_v8  ;;  %v1368_v8 = vld [vmem:[%s9941_s15 + $0x70] sm:$0xff]  ;;  %v1369_v9 = vld [vmem:[%s9941_s15 + $0x78] sm:$0xff]  ;;  %v4154_v61 = vld [vmem:[%s10021_s1 + $0x6] sm:$0x1] }
  0x31   : > { %7568 = vmatpush3.bf16.msra.mxu1 %v7565_v7  ;;  %v7599_v7 = vpack.c.bf16 %v1367_v3, %v1366_v2  ;;  %v7603_v11 = vpack.c.bf16 %v1369_v9, %v1368_v8  ;;  %v2989_v62 = vld [vmem:[%s10021_s1] sm:$0x1] }
  0x32   : > { %7562 = vmatprep.subr.bf16.mxu0 %v8700_v10  ;;  %6747 = vmatprep.subr.mxu1 %v1370_v23  ;;  %s8839_s0 = scalar_lea.vmem %s10018_s6, %s6279_s2  ;;  %v2990_v2 = vmul.f32 0.2, %v2989_v62  ;;  %s10026_s6 = sld [smem:[#allocation12_spill]] }
  0x33   : > { %7564 = vmatpush3.bf16.msra.mxu0 %v8700_v10  ;;  %v1889_v39 = vld [vmem:[%s8839_s0 + $0xc8] sm:$0xff]  ;;  %v1891_v40 = vld [vmem:[%s8839_s0 + $0xd8] sm:$0xff]  ;;  %v1868_v3 = vld [vmem:[%s8839_s0 + $0x20] sm:$0xff] }
  0x34   : > { %7571 = vmatprep.subr.msk.bf16.mxu0 %vm8711_vm3, %v7569_v13  ;;  %v1865_v50 = vld [vmem:[%s8839_s0 + $0x8] sm:$0xff]  ;;  %v1867_v59 = vld [vmem:[%s8839_s0 + $0x18] sm:$0xff] }
  0x35   : > { %s890_s4 = scalar_lea.vmem %s10013_s3, %s6277_s10  ;;  %s10016_s3 = smov %s10015_s8  ;;  %v1869_v8 = vld [vmem:[%s8839_s0 + $0x28] sm:$0xff] }
  0x36   : > { %v1075_v27 = vld [vmem:[%s890_s4] sm:$0xff]  ;;  %v1076_v29 = vld [vmem:[%s890_s4 + $0x8] sm:$0xff]  ;;  %s10017_s10 = sld [smem:[#allocation22_spill]]  ;;  %s10019_s8 = sld [smem:[#allocation20_spill]] }
  0x37   : > { %v1077_v33 = vmul.f32 0.8, %v1075_v27  ;;  %v1078_v34 = vmul.f32 0.8, %v1076_v29 }
  0x38   : > { %s6274_s11 = sshll.u32 %s10026_s6, 7  ;;  %s6069_s6 = scalar_lea.sflag [#allocation7], %s879_s29 }
  0x39   : > { %s9880_s7 = scalar_lea.hbm %s10028_s12, %s6274_s11 }
  0x3c   : > { %s10020_s4 = smov %s10019_s8 }
  0x3d   : > { %v3549_v51 = vld [vmem:[%s10020_s4 + $0x38] sm:$0xff]  ;;  %v2966_v55 = vld [vmem:[%s10020_s4 + $0x8] sm:$0xff]  ;;  %v4518_v9 = vld [vmem:[%s10020_s4 + $0x80] sm:$0xff] }
  0x3e   : > { %v3937_v58 = vld [vmem:[%s10020_s4 + $0x58] sm:$0xff] }
 0x102   : > { %v6720_v15 = vpop.f32.mrb[0].mxu0  ;;  %v6725_v16 = vpop.f32.mrb[0].mxu1 }
 0x103   : > { %v1080_v17 = vmul.f32 %v6725_v16, %v6720_v15  ;;  %v985_v18 = vpop.f32.mrb[1].mxu0  ;;  %v1066_v19 = vpop.f32.mrb[1].mxu1 }
 0x104   : > { %v1079_v20 = vmul.f32 %v1066_v19, %v985_v18  ;;  %6737 = vmatprep.mubr.msk.f32.mxu1 %vm1081_vm4, %v985_v18 }
 0x105   : > { %6738 = vmatmul.mubr.msk.f32.vlgmr.msra.gmra.mrb[2].mxu1 %vm1081_vm4, %v6720_v15  ;;  %v6204_v15 = vld [vmem:[%s9943_s17] ss:$0 sm:$0xff] }
 0x106   : > { %6730 = vmatprep.mubr.msk.f32.mxu0 %vm1081_vm4, %v1079_v20  ;;  %6748 = vmatpush3.msra.mxu1 %v1370_v23 }
 0x107   : > { %6731 = vmatmul.mubr.msk.f32.vlgmr.msra.gmra.mrb[2].mxu0 %vm1081_vm4, %v1080_v17  ;;  %7576 = vmatprep.subr.bf16.mxu1 %v7575_v26 }
 0x108   : > { %7574 = vmatpush3.bf16.msk.msra.mxu0 %vm8711_vm3, %v7569_v13  ;;  %6744 = vmatprep.mubr.msk.f32.mxu0 %vm1266_vm5, %v8723_v21  ;;  %v9978_v13 = vmov 0.0  }
 0x109   : > { %7607 = vmatprep.subr.bf16.mxu0 %v9976_v12 }
 0x10b   : > { %6745 = vmatmul.mubr.msk.f32.vlgmr.msra.gmra.mrb[4].mxu0 %vm1266_vm5, %v8729_v22 }
 0x10c   : > { %6791 = vmatprep.mubr.msk.f32.mxu0 %vm8446_vm6, %v9978_v13 }
 0x1d8   : > { %v6739_v28 = vpop.f32.mrb[2].mxu1 }
 0x1d9   : > { %v1248_v30 = vpop.f32.mrb[3].mxu1  ;;  %v1254_v43 = vadd.f32 %v6739_v28, %v6195_v31 }
 0x1da   : > { %v6732_v32 = vpop.f32.mrb[2].mxu0  ;;  %v1249_v48 = vadd.f32 %v6195_v31, %v1248_v30  ;;  %v906_v30 = vld [vmem:[%s10017_s10] sm:$0xff]  ;;  %s8449_s10 = smov [#allocation6]  }
 0x1db   : > { %v1164_v35 = vmul.f32 0.2, %v6732_v32  ;;  %v1154_v36 = vpop.f32.mrb[3].mxu0  ;;  %vm1611_vm7 = vcmp.gt.f32.partialorder %v906_v30, 0.0  ;;  %v1875_v32 = vld [vmem:[%s8839_s0 + $0x58] sm:$0xff]  ;;  %v1878_v30 = vld [vmem:[%s8839_s0 + $0x70] sm:$0xff] }
 0x1dc   : > { %v1163_v37 = vmul.f32 0.2, %v1154_v36  ;;  %v1619_v31 = vsel %vm1611_vm7, 1, %v8448_v25  ;;  %v1883_v36 = vld [vmem:[%s8839_s0 + $0x98] sm:$0xff]  ;;  %v1874_v25 = vld [vmem:[%s8839_s0 + $0x50] sm:$0xff]  ;;  %s8384_s11 = sshll.u32 %s8449_s10, 4  ;;  %s8385_s11 = int_to_ptr.vmem [resolvable:$false] %s8384_s11 }
 0x1dd   : > { %v8761_v44 = vadd.f32 %v1164_v35, %v1078_v34  ;;  %v1879_v34 = vld [vmem:[%s8839_s0 + $0x78] sm:$0xff]  ;;  %v1881_v35 = vld [vmem:[%s8839_s0 + $0x88] sm:$0xff]  ;;  %s8386_s2 = scalar_lea.vmem %s8385_s11, 256 }
 0x1de   : > { %v8759_v41 = vadd.f32 %v1163_v37, %v1077_v33  ;;  %v6746_v42 = vpop.f32.mrb[4].mxu0  ;;  %v1877_v33 = vld [vmem:[%s8839_s0 + $0x68] sm:$0xff] }
 0x1df   : > { %v1349_v45 = vadd.f32 %v6746_v42, %v6198_v38  ;;  %v1343_v46 = vpop.f32.mrb[5].mxu0  ;;  %v1885_v37 = vld [vmem:[%s8839_s0 + $0xa8] sm:$0xff] }
 0x1e0   : > { %v1344_v49 = vadd.f32 %v6198_v38, %v1343_v46  ;;  %6749 = vmatprep.mubr.msk.f32.mxu1 %vm912_vm0, %v8759_v41  ;;  %v1887_v38 = vld [vmem:[%s8839_s0 + $0xb8] sm:$0xff]  ;;  %v1893_v42 = vld [vmem:[%s8839_s0 + $0xe8] sm:$0xff]  ;;  %v3354_v46 = vld [vmem:[%s10020_s4 + $0x20] sm:$0xff] }
 0x1e1   : > { %v1353_v52 = vmul.f32 %v1349_v45, %v1254_v43  ;;  %6750 = vmatmul.mubr.msk.f32.vlgmr.msra.gmra.mrb[4].mxu1 %vm912_vm0, %v8761_v44  ;;  %v1895_v43 = vld [vmem:[%s8839_s0 + $0xf8] sm:$0xff] }
 0x1e2   : > { %v1352_v53 = vmul.f32 %v1344_v49, %v1249_v48  ;;  %7578 = vmatpush3.bf16.msra.mxu1 %v7575_v26  ;;  %v3161_v45 = vld [vmem:[%s10019_s8 + $0x18] sm:$0xff]  ;;  %v1864_v49 = vld [vmem:[%s8839_s0] sm:$0xff]  ;;  %s881_s8 = scalar_lea.vmem [#allocation6], %s6181_s9 }
 0x1e3   : > { %7580 = vmatprep.subr.bf16.mxu1 %v7579_v47  ;;  %1899 = vperm.xlu1 %8240, %v1864_v49   ;;  %v5877_v49 = vld [vmem:[%s10020_s4 + $0xf8] sm:$0xff]  ;;  %s6082_s30 = sshll.u32 %s881_s8, 4  ;;  %s9882_s30 = int_to_ptr.vmem [resolvable:$true] %s6082_s30 }
 0x1e4   : > { %6784 = vmatprep.mubr.f32.mxu1 %v1352_v53  ;;  %v3742_v53 = vld [vmem:[%s10020_s4 + $0x40] sm:$0xff]  ;;  %s8380_s9 = scalar_lea.vmem %s9882_s30, 128  ;;  %p8387_p0 = scmp.lt.s32.totalorder %s9882_s30, %s8385_s11 }
 0x1e5   : > { %p8381_p11 = scmp.ne.s32.totalorder %s9882_s30, %s8380_s9  ;;  %p8388_p1 = scmp.lt.s32.totalorder %s8386_s2, %s8380_s9 }
 0x1e6   : > { %7582 = vmatpush3.bf16.msra.mxu1 %v7579_v47  ;;  %v3378_v47 = vld [vmem:[%s10021_s1 + $0x2] sm:$0x1] }
 0x1e7   : > { %7584 = vmatprep.subr.bf16.mxu1 %v7583_v54  ;;  %v3379_v48 = vmul.f32 0.2, %v3378_v47  ;;  %1904 = vperm.xlu1 %8240, %v1865_v50   ;;  %p8382_p12 = pnand %p8381_p11, %p8633_p5  ;;  %p8389_p2 = por %p8388_p1, %p8387_p0 }
 0x1e9   : > { %p8383_p13 = pneg %p8382_p12 }
 0x1ea   : > { %7586 = vmatpush3.bf16.msra.mxu1 %v7583_v54  ;;  %v3766_v54 = vld [vmem:[%s10021_s1 + $0x4] sm:$0x1] }
 0x1eb   : > { %7588 = vmatprep.subr.bf16.mxu1 %v7587_v57  ;;  %v3767_v56 = vmul.f32 0.2, %v3766_v54  ;;  %v2224_v54 = vld [vmem:[%s9948_s22 + $0x8] sm:$0x3]  ;;  %p8390_p3 = pnand %p8389_p2, %p8383_p13 }
 0x1ee   : > { %7590 = vmatpush3.bf16.msra.mxu1 %v7587_v57  ;;  %v1866_v57 = vld [vmem:[%s8839_s0 + $0x10] sm:$0xff] }
 0x1ef   : > { %7592 = vmatprep.subr.bf16.mxu1 %v7591_v60 }
 0x1f2   : > { %7594 = vmatpush3.bf16.msra.mxu1 %v7591_v60  ;;  %v4130_v60 = vld [vmem:[%s10020_s4 + $0x60] sm:$0xff] }
 0x1f3   : > { %7596 = vmatprep.subr.bf16.mxu1 %v7595_v63 }
 0x1f6   : > { %7598 = vmatpush3.bf16.msra.mxu1 %v7595_v63  ;;  %v4155_v63 = vmul.f32 0.2, %v4154_v61  ;;  %v3960_v61 = vld [vmem:[%s10021_s1 + $0x5] sm:$0x1] }
 0x1f7   : > { %7600 = vmatprep.subr.bf16.mxu1 %v7599_v7  ;;  %v3961_v62 = vmul.f32 0.2, %v3960_v61 }
 0x1fa   : > { %7602 = vmatpush3.bf16.msra.mxu1 %v7599_v7  ;;  %v4325_v7 = vld [vmem:[%s10020_s4 + $0x78] sm:$0xff] }
 0x1fb   : > { %7604 = vmatprep.subr.bf16.mxu1 %v7603_v11 }
 0x1fe   : > { %7606 = vmatpush3.bf16.msra.mxu1 %v7603_v11  ;;  %v4542_v11 = vld [vmem:[%s10021_s1 + $0x8] sm:$0x1] }
 0x201   : > { %6785 = vmatmul.mubr.f32.vlgmr.msra.gmra.mrb[4].mxu1 %v1353_v52  ;;  %v2965_v52 = vld [vmem:[%s10020_s4] sm:$0xff] }
 0x202   : > { %6867 = vmatprep.mubr.msk.f32.mxu1 %vm1266_vm5, %v8723_v21  ;;  %2969 = vperm.xlu1 %8240, %v2965_v52  }
 0x206   : > { %2974 = vperm.xlu1 %8240, %v2966_v55  }
 0x20a   : > { %1909 = vperm.xlu1 %8240, %v1866_v57  }
 0x20e   : > { %1914 = vperm.xlu1 %8240, %v1867_v59   ;;  %v3743_v59 = vld [vmem:[%s10020_s4 + $0x48] sm:$0xff] }
 0x212   : > { %2994 = vperm.xlu1 %8240, %v2990_v2   ;;  %v4324_v2 = vld [vmem:[%s10020_s4 + $0x70] sm:$0xff] }
 0x216   : > { %1919 = vperm.xlu1 %8240, %v1868_v3   ;;  %v4348_v3 = vld [vmem:[%s10021_s1 + $0x7] sm:$0x1] }
 0x21a   : > { %1924 = vperm.xlu1 %8240, %v1869_v8  }
 0x262   : > { %v1900_v8 = vpop.permute.xlu1 %1899 }
 0x2d4   : > { %v6786_v16 = vpop.f32.mrb[4].mxu1 }
 0x2d5   : > { %v1535_v17 = vadd.f32 %v6786_v16, %v6204_v15  ;;  %v1518_v18 = vpop.f32.mrb[5].mxu1  ;;  %v4543_v16 = vmul.f32 0.2, %v4542_v11  ;;  %v1905_v11 = vpop.permute.xlu1 %1904 }
 0x2d6   : > { %v1534_v19 = vadd.f32 %v6204_v15, %v1518_v18  ;;  %v1870_v15 = vld [vmem:[%s8839_s0 + $0x30] sm:$0xff]  ;;  %v4713_v18 = vld [vmem:[%s10020_s4 + $0x98] sm:$0xff] }
 0x2d7   : > { %8241 = vtanh.f32 %v1535_v17  ;;  %1929 = vperm.xlu1 %8240, %v1870_v15   ;;  %v1871_v17 = vld [vmem:[%s8839_s0 + $0x38] sm:$0xff]  ;;  %v4712_v15 = vld [vmem:[%s10020_s4 + $0x90] sm:$0xff] }
 0x2d8   : > { %8243 = vtanh.f32 %v1534_v19  ;;  %v1872_v19 = vld [vmem:[%s8839_s0 + $0x40] sm:$0xff] }
 0x2db   : > { %1934 = vperm.xlu1 %8240, %v1871_v17  }
 0x2df   : > { %1939 = vperm.xlu1 %8240, %v1872_v19   ;;  %v4907_v19 = vld [vmem:[%s10020_s4 + $0xa8] sm:$0xff] }
 0x2e1   : > { %v8811_v20 = vpop.eup %8241 }
 0x2e2   : > { %v8813_v21 = vpop.eup %8243  ;;  %2788 = vst.msk [vmem:[#allocation5 + $0x8] sm:$0xff] %vm1081_vm4, %v8811_v20 }
 0x2e3   : > { %2787 = vst.msk [vmem:[#allocation5] sm:$0xff] %vm1081_vm4, %v8813_v21  ;;  %v7608_v23 = vpack.c.bf16 %v8811_v20, %v8813_v21  ;;  %1949 = vperm.xlu1 %8240, %v1874_v25   ;;  %v5124_v25 = vld [vmem:[%s10021_s1 + $0xb] sm:$0x1] }
 0x2e5   : > { %7609 = vmatpush3.bf16.msra.mxu0 %v7608_v23  ;;  %v4906_v23 = vld [vmem:[%s10020_s4 + $0xa0] sm:$0xff] }
 0x2e8   : > { %6792 = vmatmul.mubr.msk.f32.vlgmr.msra.gmra.mrb[6].mxu0 %vm1081_vm4, %v905_v24  ;;  %v4930_v24 = vld [vmem:[%s10021_s1 + $0xa] sm:$0x1] }
 0x2e9   : > { %6796 = vmatprep.mubr.msk.f32.mxu0 %vm912_vm0, %v8647_v0  ;;  %v1873_v0 = vld [vmem:[%s8839_s0 + $0x48] sm:$0xff] }
 0x3bb   : > { %v8827_v26 = vpop.f32.mrb[6].mxu0 }
 0x3bc   : > { %v6793_v27 = vpop.f32.mrb[7].mxu0  ;;  %v1612_v28 = vmul.f32 %v8827_v26, %v8827_v26 }
 0x3bd   : > { %v4931_v27 = vmul.f32 0.2, %v4930_v24  ;;  %v5100_v24 = vld [vmem:[%s10020_s4 + $0xb0] sm:$0xff] }
 0x3be   : > { %v1613_v29 = vsel %vm1081_vm4, %v1612_v28, 0.0  ;;  %v1876_v28 = vld [vmem:[%s8839_s0 + $0x60] sm:$0xff] }
 0x3bf   : > { %1614 = vadd.xlane.f32.xlu0 %v1613_v29  ;;  %v5101_v29 = vld [vmem:[%s10020_s4 + $0xb8] sm:$0xff]  ;;  %1959 = vperm.xlu1 %8240, %v1876_v28  }
 0x3c3   : > { %1969 = vperm.xlu1 %8240, %v1878_v30  }
 0x3d5   : > { %1621 = vperm.xlu0 %8239, %v1619_v31   ;;  %v5294_v31 = vld [vmem:[%s10020_s4 + $0xc0] sm:$0xff] }
 0x3d9   : > { %1944 = vperm.xlu0 %8239, %v1873_v0   ;;  %v5318_v0 = vld [vmem:[%s10021_s1 + $0xc] sm:$0x1] }
 0x3dd   : > { %1954 = vperm.xlu0 %8239, %v1875_v32   ;;  %v1880_v32 = vld [vmem:[%s8839_s0 + $0x80] sm:$0xff] }
 0x3de   : > { %1979 = vperm.xlu1 %8240, %v1880_v32  }
 0x3e1   : > { %1964 = vperm.xlu0 %8239, %v1877_v33   ;;  %v5319_v33 = vmul.f32 0.2, %v5318_v0  ;;  %v5512_v0 = vld [vmem:[%s10021_s1 + $0xd] sm:$0x1] }
 0x3e2   : > { %v5513_v32 = vmul.f32 0.2, %v5512_v0 }
 0x3e5   : > { %1974 = vperm.xlu0 %8239, %v1879_v34  }
 0x3e9   : > { %1984 = vperm.xlu0 %8239, %v1881_v35   ;;  %v1882_v35 = vld [vmem:[%s8839_s0 + $0x90] sm:$0xff] }
 0x3ea   : > { %1989 = vperm.xlu1 %8240, %v1882_v35   ;;  %v5876_v35 = vld [vmem:[%s10020_s4 + $0xf0] sm:$0xff] }
 0x3ed   : > { %1994 = vperm.xlu0 %8239, %v1883_v36  }
 0x3f1   : > { %2004 = vperm.xlu0 %8239, %v1885_v37   ;;  %v5489_v37 = vld [vmem:[%s10020_s4 + $0xd8] sm:$0xff] }
 0x3f5   : > { %2014 = vperm.xlu0 %8239, %v1887_v38   ;;  %v1884_v38 = vld [vmem:[%s8839_s0 + $0xa0] sm:$0xff] }
 0x3f6   : > { %1999 = vperm.xlu1 %8240, %v1884_v38  }
 0x3f9   : > { %2024 = vperm.xlu0 %8239, %v1889_v39   ;;  %v5682_v39 = vld [vmem:[%s10020_s4 + $0xe0] sm:$0xff] }
 0x3fd   : > { %2034 = vperm.xlu0 %8239, %v1891_v40   ;;  %v5706_v40 = vld [vmem:[%s10021_s1 + $0xe] sm:$0x1] }
 0x401   : > { %2044 = vperm.xlu0 %8239, %v1893_v42   ;;  %v1886_v42 = vld [vmem:[%s8839_s0 + $0xb0] sm:$0xff] }
 0x402   : > { %2009 = vperm.xlu1 %8240, %v1886_v42  }
 0x405   : > { %2054 = vperm.xlu0 %8239, %v1895_v43   ;;  %v5707_v43 = vmul.f32 0.2, %v5706_v40  ;;  %v2591_v40 = vld [vmem:[%s9946_s20 + $0x8] sm:$0xf] }
 0x409   : > { %3169 = vperm.xlu0 %8239, %v3161_v45  }
 0x40d   : > { %3358 = vperm.xlu0 %8239, %v3354_v46   ;;  %v1888_v46 = vld [vmem:[%s8839_s0 + $0xc0] sm:$0xff] }
 0x40e   : > { %2019 = vperm.xlu1 %8240, %v1888_v46  }
 0x411   : > { %3383 = vperm.xlu0 %8239, %v3379_v48  }
 0x415   : > { %3557 = vperm.xlu0 %8239, %v3549_v51   ;;  %v1890_v51 = vld [vmem:[%s8839_s0 + $0xd0] sm:$0xff] }
 0x416   : > { %2029 = vperm.xlu1 %8240, %v1890_v51   ;;  %v9069_v51 = vld [vmem:[%s9950_s24] ss:$0 sm:$0xff] }
 0x419   : > { %3746 = vperm.xlu0 %8239, %v3742_v53   ;;  %v2223_v53 = vld [vmem:[%s9948_s22] sm:$0xff] }
 0x41a   : > { %v8981_v55 = vpack.c.bf16 %v2224_v54, %v2223_v53 }
 0x41d   : > { %3771 = vperm.xlu0 %8239, %v3767_v56   ;;  %v3572_v56 = vld [vmem:[%s10021_s1 + $0x3] sm:$0x1] }
 0x421   : > { %3945 = vperm.xlu0 %8239, %v3937_v58   ;;  %v3573_v58 = vmul.f32 0.2, %v3572_v56 }
 0x425   : > { %4134 = vperm.xlu0 %8239, %v4130_v60   ;;  %v3936_v60 = vld [vmem:[%s10020_s4 + $0x50] sm:$0xff] }
 0x429   : > { %4159 = vperm.xlu0 %8239, %v4155_v63   ;;  %v4131_v63 = vld [vmem:[%s10020_s4 + $0x68] sm:$0xff] }
 0x42d   : > { %4333 = vperm.xlu0 %8239, %v4325_v7   ;;  %v4349_v7 = vmul.f32 0.2, %v4348_v3 }
 0x431   : > { %4522 = vperm.xlu0 %8239, %v4518_v9   ;;  %v4519_v9 = vld [vmem:[%s10020_s4 + $0x88] sm:$0xff] }
 0x435   : > { %4547 = vperm.xlu0 %8239, %v4543_v16   ;;  %v4736_v16 = vld [vmem:[%s10021_s1 + $0x9] sm:$0x1] }
 0x436   : > { %v4737_v17 = vmul.f32 0.2, %v4736_v16 }
 0x439   : > { %4721 = vperm.xlu0 %8239, %v4713_v18   ;;  %v9021_v18 = vpop.permute.xlu1 %2969 }
 0x43d   : > { %4910 = vperm.xlu0 %8239, %v4906_v23   ;;  %v9026_v23 = vpop.permute.xlu1 %2974 }
 0x441   : > { %4935 = vperm.xlu0 %8239, %v4931_v27   ;;  %v5125_v27 = vmul.f32 0.2, %v5124_v25  ;;  %v1910_v28 = vpop.permute.xlu1 %1909 }
 0x445   : > { %5109 = vperm.xlu0 %8239, %v5101_v29   ;;  %v5295_v29 = vld [vmem:[%s10020_s4 + $0xc8] sm:$0xff]  ;;  %v1915_v30 = vpop.permute.xlu1 %1914 }
 0x449   : > { %5298 = vperm.xlu0 %8239, %v5294_v31   ;;  %v5488_v31 = vld [vmem:[%s10020_s4 + $0xd0] sm:$0xff] }
 0x44c   : > { %v1615_v34 = vpop.xlane.xlu0 %1614 }
 0x44d   : > { %v1616_v36 = vadd.f32 1e-12, %v1615_v34  ;;  %5323 = vperm.xlu0 %8239, %v5319_v33   ;;  %v9043_v33 = vpop.permute.xlu1 %2994  ;;  %v5683_v34 = vld [vmem:[%s10020_s4 + $0xe8] sm:$0xff] }
 0x44f   : > { %8245 = vrsqrt.f32 %v1616_v36  ;;  %v5900_v36 = vld [vmem:[%s10021_s1 + $0xf] sm:$0x1] }
 0x450   : > { %v5901_v38 = vmul.f32 0.2, %v5900_v36 }
 0x451   : > { %5497 = vperm.xlu0 %8239, %v5489_v37   ;;  %v1920_v37 = vpop.permute.xlu1 %1919 }
 0x454   : > { %v8941_v45 = vpop.permute.xlu0 %1621 }
 0x455   : > { %5686 = vperm.xlu0 %8239, %v5682_v39   ;;  %vm1623_vm8 = vcmp.eq.s32.totalorder %v8941_v45, 1  ;;  %v2590_v39 = vld [vmem:[%s9946_s20] sm:$0xff]  ;;  %v1925_v42 = vpop.permute.xlu1 %1924 }
 0x459   : > { %v8246_v47 = vpop.eup %8245  ;;  %5711 = vperm.xlu0 %8239, %v5707_v43   ;;  %v7620_v43 = vpack.c.bf16 %v2591_v40, %v2590_v39  ;;  %v1930_v46 = vpop.permute.xlu1 %1929 }
 0x45a   : > { %v1618_v48 = vmul.f32 %v8246_v47, %v8827_v26  ;;  %v1892_v26 = vld [vmem:[%s8839_s0 + $0xe0] sm:$0xff]  ;;  %v2069_v3 = vsub.f32 %v1930_v46, %v9069_v51 }
 0x45b   : > { %2039 = vperm.xlu1 %8240, %v1892_v26   ;;  %7622 = vmatprep.subr.msk.bf16.mxu1 %vm8711_vm3, %v7620_v43  ;;  %v2063_v26 = vsub.f32 %v1900_v8, %v9069_v51 }
 0x45c   : > { %v1624_v50 = vsel %vm1623_vm8, %v1618_v48, %v8674_v4  ;;  %v1894_v4 = vld [vmem:[%s8839_s0 + $0xf0] sm:$0xff]  ;;  %7625 = vmatpush3.bf16.msk.msra.mxu1 %vm8711_vm3, %v7620_v43 }
 0x45d   : > { %5885 = vperm.xlu0 %8239, %v5877_v49   ;;  %6794 = vmatprep.subr.mxu0 %v1624_v50  ;;  %v1935_v47 = vpop.permute.xlu1 %1934  ;;  %v1945_v49 = vpop.permute.xlu0 %1944 }
 0x45e   : > { %6795 = vmatpush3.msra.mxu0 %v1624_v50  ;;  %v2070_v16 = vsub.f32 %v1935_v47, %v9069_v51 }
 0x45f   : > { %6797 = vmatmul.mubr.msk.f32.vlgmr.msra.gmra.mrb[8].mxu0 %vm912_vm0, %v8679_v5  ;;  %6799 = vmatprep.subr.mxu0 %v1624_v50  ;;  %v3160_v5 = vld [vmem:[%s10020_s4 + $0x10] sm:$0xff] }
 0x460   : > { %6800 = vmatpush3.msra.mxu0 %v1624_v50  ;;  %6801 = vmatprep.mubr.msk.f32.mxu0 %vm912_vm0, %v8652_v1  ;;  %v3184_v1 = vld [vmem:[%s10021_s1 + $0x1] sm:$0x1] }
 0x461   : > { %7611 = vmatprep.subr.bf16.mxu0 %v8700_v10  ;;  %2049 = vperm.xlu1 %8240, %v1894_v4   ;;  %v3185_v52 = vmul.f32 0.2, %v3184_v1  ;;  %v1940_v48 = vpop.permute.xlu1 %1939  ;;  %v1955_v4 = vpop.permute.xlu0 %1954  ;;  %v2095_v1 = vmul.f32 %v2063_v26, %v2063_v26 }
 0x462   : > { %6868 = vmatmul.mubr.msk.f32.vlgmr.msra.gmra.mrb[6].mxu1 %vm1266_vm5, %v8729_v22  ;;  %v2066_v22 = vsub.f32 %v1915_v30, %v9069_v51  ;;  %v2071_v25 = vsub.f32 %v1940_v48, %v9069_v51 }
 0x463   : > { %6802 = vmatmul.mubr.msk.f32.vlgmr.msra.gmra.mrb[10].mxu0 %vm912_vm0, %v8684_v6  ;;  %v3355_v6 = vld [vmem:[%s10020_s4 + $0x28] sm:$0xff]  ;;  %v2127_v54 = vmul.f32 -0.5, %v2095_v1 }
 0x464   : > { %7613 = vmatpush3.bf16.msra.mxu0 %v8700_v10  ;;  %v3548_v10 = vld [vmem:[%s10020_s4 + $0x30] sm:$0xff] }
 0x465   : > { %3164 = vperm.xlu1 %8240, %v3160_v5   ;;  %7616 = vmatprep.subr.msk.bf16.mxu0 %vm8987_vm10, %v8981_v55  ;;  %v1950_v50 = vpop.permute.xlu1 %1949  ;;  %v2064_v5 = vsub.f32 %v1905_v11, %v9069_v51  ;;  %v1965_v53 = vpop.permute.xlu0 %1964 }
 0x466   : > { %v2073_v36 = vsub.f32 %v1950_v50, %v9069_v51 }
 0x469   : > { %3189 = vperm.xlu1 %8240, %v3185_v52   ;;  %v1960_v14 = vpop.permute.xlu1 %1959  ;;  %v2065_v52 = vsub.f32 %v1910_v28, %v9069_v51 }
 0x46a   : > { %v2075_v43 = vsub.f32 %v1960_v14, %v9069_v51 }
 0x46b   : > { %v2097_v56 = vmul.f32 %v2065_v52, %v2065_v52  ;;  %v2074_v52 = vsub.f32 %v1955_v4, %v9069_v51 }
 0x46d   : > { %3363 = vperm.xlu1 %8240, %v3355_v6   ;;  %v2096_v6 = vmul.f32 %v2064_v5, %v2064_v5  ;;  %v2105_v5 = vmul.f32 %v2073_v36, %v2073_v36 }
 0x471   : > { %3552 = vperm.xlu1 %8240, %v3548_v10   ;;  %v2067_v10 = vsub.f32 %v1920_v37, %v9069_v51  ;;  %v2072_v37 = vsub.f32 %v1945_v49, %v9069_v51  ;;  %v2076_v49 = vsub.f32 %v1965_v53, %v9069_v51 }
 0x473   : > { %v2099_v61 = vmul.f32 %v2067_v10, %v2067_v10  ;;  %v2104_v1 = vmul.f32 %v2072_v37, %v2072_v37 }
 0x475   : > { %3577 = vperm.xlu1 %8240, %v3573_v58   ;;  %v1970_v58 = vpop.permute.xlu1 %1969  ;;  %v2131_v11 = vmul.f32 -0.5, %v2099_v61  ;;  %v2136_v61 = vmul.f32 -0.5, %v2104_v1 }
 0x477   : > { %v2167_v28 = vmul.f32 1.442695, %v2131_v11 }
 0x479   : > { %3751 = vperm.xlu1 %8240, %v3743_v59   ;;  %v2098_v59 = vmul.f32 %v2066_v22, %v2066_v22 }
 0x47b   : > { %v2130_v8 = vmul.f32 -0.5, %v2098_v59  ;;  %v2137_v59 = vmul.f32 -0.5, %v2105_v5 }
 0x47d   : > { %3940 = vperm.xlu1 %8240, %v3936_v60   ;;  %v2128_v60 = vmul.f32 -0.5, %v2096_v6 }
 0x481   : > { %3965 = vperm.xlu1 %8240, %v3961_v62   ;;  %v2068_v62 = vsub.f32 %v1925_v42, %v9069_v51 }
 0x485   : > { %4139 = vperm.xlu1 %8240, %v4131_v63   ;;  %v2159_v63 = vmul.f32 1.442695, %v2127_v54  ;;  %v2107_v54 = vmul.f32 %v2075_v43, %v2075_v43 }
 0x487   : > { %8247 = vpow2.f32 %v2159_v63  ;;  %v2108_v63 = vmul.f32 %v2076_v49, %v2076_v49 }
 0x489   : > { %4328 = vperm.xlu1 %8240, %v4324_v2   ;;  %v2129_v2 = vmul.f32 -0.5, %v2097_v56 }
 0x48d   : > { %4353 = vperm.xlu1 %8240, %v4349_v7   ;;  %v9078_v7 = vpop.permute.xlu0 %1974 }
 0x491   : > { %4527 = vperm.xlu1 %8240, %v4519_v9   ;;  %v2161_v9 = vmul.f32 1.442695, %v2128_v60  ;;  %v9082_v0 = vpop.permute.xlu0 %1984  ;;  %v8248_v50 = vpop.eup %8247  ;;  %v2077_v60 = vsub.f32 %v1970_v58, %v9069_v51 }
 0x493   : > { %8249 = vpow2.f32 %v2161_v9  ;;  %v2179_v9 = vmul.f32 1.442695, %v2137_v59  ;;  %v2109_v58 = vmul.f32 %v2077_v60, %v2077_v60 }
 0x495   : > { %4716 = vperm.xlu1 %8240, %v4712_v15   ;;  %v2100_v15 = vmul.f32 %v2068_v62, %v2068_v62  ;;  %v1995_v6 = vpop.permute.xlu0 %1994  ;;  %v2106_v62 = vmul.f32 %v2074_v52, %v2074_v52 }
 0x499   : > { %4741 = vperm.xlu1 %8240, %v4737_v17   ;;  %v1980_v17 = vpop.permute.xlu1 %1979 }
 0x49a   : > { %v2079_v11 = vsub.f32 %v1980_v17, %v9069_v51 }
 0x49d   : > { %4915 = vperm.xlu1 %8240, %v4907_v19   ;;  %v2163_v19 = vmul.f32 1.442695, %v2129_v2  ;;  %v8250_v4 = vpop.eup %8249  ;;  %v2139_v2 = vmul.f32 -0.5, %v2107_v54 }
 0x49f   : > { %8251 = vpow2.f32 %v2163_v19  ;;  %v2138_v19 = vmul.f32 -0.5, %v2106_v62 }
 0x4a1   : > { %5104 = vperm.xlu1 %8240, %v5100_v24   ;;  %v2101_v24 = vmul.f32 %v2069_v3, %v2069_v3  ;;  %v2181_v17 = vmul.f32 1.442695, %v2138_v19 }
 0x4a5   : > { %5129 = vperm.xlu1 %8240, %v5125_v27   ;;  %v2165_v27 = vmul.f32 1.442695, %v2130_v8  ;;  %v2005_v8 = vpop.permute.xlu0 %2004 }
 0x4a7   : > { %8253 = vpow2.f32 %v2165_v27  ;;  %v2141_v27 = vmul.f32 -0.5, %v2109_v58 }
 0x4a8   : > { %8255 = vpow2.f32 %v2167_v28  ;;  %v2111_v28 = vmul.f32 %v2079_v11, %v2079_v11 }
 0x4a9   : > { %5303 = vperm.xlu1 %8240, %v5295_v29   ;;  %v2132_v29 = vmul.f32 -0.5, %v2100_v15  ;;  %v8252_v53 = vpop.eup %8251  ;;  %v2187_v37 = vmul.f32 1.442695, %v2141_v27 }
 0x4ab   : > { %v2169_v39 = vmul.f32 1.442695, %v2132_v29 }
 0x4ad   : > { %5492 = vperm.xlu1 %8240, %v5488_v31   ;;  %v2102_v31 = vmul.f32 %v2070_v16, %v2070_v16  ;;  %8257 = vpow2.f32 %v2169_v39  ;;  %v2177_v16 = vmul.f32 1.442695, %v2136_v61  ;;  %v2143_v39 = vmul.f32 -0.5, %v2111_v28 }
 0x4af   : > { %v2134_v40 = vmul.f32 -0.5, %v2102_v31  ;;  %v2191_v5 = vmul.f32 1.442695, %v2143_v39 }
 0x4b1   : > { %5517 = vperm.xlu1 %8240, %v5513_v32   ;;  %v2133_v32 = vmul.f32 -0.5, %v2101_v24  ;;  %v2173_v10 = vmul.f32 1.442695, %v2134_v40  ;;  %v8254_v3 = vpop.eup %8253  ;;  %v2140_v24 = vmul.f32 -0.5, %v2108_v63 }
 0x4b2   : > { %v8256_v15 = vpop.eup %8255 }
 0x4b3   : > { %v2171_v46 = vmul.f32 1.442695, %v2133_v32  ;;  %v2080_v32 = vsub.f32 %v9082_v0, %v9069_v51  ;;  %v2082_v0 = vsub.f32 %v1995_v6, %v9069_v51 }
 0x4b5   : > { %5691 = vperm.xlu1 %8240, %v5683_v34   ;;  %8259 = vpow2.f32 %v2171_v46  ;;  %v2112_v46 = vmul.f32 %v2080_v32, %v2080_v32  ;;  %v2114_v49 = vmul.f32 %v2082_v0, %v2082_v0 }
 0x4b6   : > { %8261 = vpow2.f32 %v2173_v10  ;;  %v2084_v10 = vsub.f32 %v2005_v8, %v9069_v51 }
 0x4b7   : > { %v2146_v63 = vmul.f32 -0.5, %v2114_v49 }
 0x4b9   : > { %5880 = vperm.xlu1 %8240, %v5876_v35   ;;  %v2103_v35 = vmul.f32 %v2071_v25, %v2071_v25  ;;  %v2183_v25 = vmul.f32 1.442695, %v2139_v2  ;;  %v2116_v2 = vmul.f32 %v2084_v10, %v2084_v10 }
 0x4bb   : > { %v2135_v26 = vmul.f32 -0.5, %v2103_v35  ;;  %v2185_v35 = vmul.f32 1.442695, %v2140_v24  ;;  %v2148_v24 = vmul.f32 -0.5, %v2116_v2 }
 0x4bd   : > { %5905 = vperm.xlu1 %8240, %v5901_v38   ;;  %v1990_v38 = vpop.permute.xlu1 %1989  ;;  %v2175_v56 = vmul.f32 1.442695, %v2135_v26 }
 0x4be   : > { %v2081_v29 = vsub.f32 %v1990_v38, %v9069_v51 }
 0x4bf   : > { %8263 = vpow2.f32 %v2175_v56 }
 0x4c0   : > { %8265 = vpow2.f32 %v2179_v9  ;;  %v2113_v40 = vmul.f32 %v2081_v29, %v2081_v29 }
 0x4c1   : > { %v2000_v14 = vpop.permute.xlu1 %1999  ;;  %8267 = vpow2.f32 %v2177_v16 }
 0x4c2   : > { %8269 = vpow2.f32 %v2183_v25  ;;  %v2083_v38 = vsub.f32 %v2000_v14, %v9069_v51  ;;  %v2145_v1 = vmul.f32 -0.5, %v2113_v40 }
 0x4c3   : > { %8271 = vpow2.f32 %v2181_v17 }
 0x4c4   : > { %8273 = vpow2.f32 %v2185_v35  ;;  %v2115_v52 = vmul.f32 %v2083_v38, %v2083_v38  ;;  %v2195_v60 = vmul.f32 1.442695, %v2145_v1 }
 0x4c5   : > { %v2010_v57 = vpop.permute.xlu1 %2009  ;;  %8275 = vpow2.f32 %v2187_v37 }
 0x4c6   : > { %8277 = vpow2.f32 %v2191_v5 }
 0x4c9   : > { %v2020_v36 = vpop.permute.xlu1 %2019 }
 0x4ca   : > { %v2087_v61 = vsub.f32 %v2020_v36, %v9069_v51 }
 0x4cc   : > { %v2119_v16 = vmul.f32 %v2087_v61, %v2087_v61 }
 0x4cd   : > { %v2030_v6 = vpop.permute.xlu1 %2029 }
 0x4ce   : > { %v2089_v19 = vsub.f32 %v2030_v6, %v9069_v51  ;;  %v2151_v17 = vmul.f32 -0.5, %v2119_v16 }
 0x4d0   : > { %v2207_v38 = vmul.f32 1.442695, %v2151_v17  ;;  %v2772_v17 = vld [vmem:[%s9951_s25 + $0x8] sm:$0xff] }
 0x4da   : > { %v2040_v11 = vpop.permute.xlu1 %2039 }
 0x4db   : > { %v2091_v32 = vsub.f32 %v2040_v11, %v9069_v51 }
 0x4e0   : > { %v2050_v36 = vpop.permute.xlu1 %2049 }
 0x532   : > { %v6798_v30 = vpop.f32.mrb[8].mxu0 }
 0x533   : > { %v1691_v34 = vpop.f32.mrb[9].mxu0 }
 0x536   : > { %v6803_v42 = vpop.f32.mrb[10].mxu0 }
 0x537   : > { %v1778_v47 = vmul.f32 %v6803_v42, %v6798_v30  ;;  %v1766_v48 = vpop.f32.mrb[11].mxu0  ;;  %v8258_v30 = vpop.eup %8257 }
 0x538   : > { %v1777_v22 = vmul.f32 %v1766_v48, %v1691_v34  ;;  %v2015_v34 = vpop.permute.xlu0 %2014  ;;  %v2085_v48 = vsub.f32 %v2010_v57, %v9069_v51  ;;  %v2197_v57 = vmul.f32 1.442695, %v2146_v63 }
 0x539   : > { %v2086_v56 = vsub.f32 %v2015_v34, %v9069_v51 }
 0x53a   : > { %6808 = vmatprep.mubr.msk.f32.mxu0 %vm1081_vm4, %v1777_v22  ;;  %v2117_v59 = vmul.f32 %v2085_v48, %v2085_v48 }
 0x53b   : > { %6809 = vmatmul.mubr.msk.f32.vlgmr.msra.gmra.mrb[12].mxu0 %vm1081_vm4, %v1778_v47  ;;  %v2118_v9 = vmul.f32 %v2086_v56, %v2086_v56 }
 0x53c   : > { %7619 = vmatpush3.bf16.msk.msra.mxu0 %vm8987_vm10, %v8981_v55  ;;  %6815 = vmatprep.mubr.msk.f32.mxu0 %vm2232_vm11, %v8248_v50  ;;  %v2078_v55 = vsub.f32 %v9078_v7, %v9069_v51  ;;  %v8260_v7 = vpop.eup %8259  ;;  %v2025_v26 = vpop.permute.xlu0 %2024  ;;  %v2144_v50 = vmul.f32 -0.5, %v2112_v46  ;;  %v2149_v58 = vmul.f32 -0.5, %v2117_v59  ;;  %v2093_v46 = vsub.f32 %v2050_v36, %v9069_v51  ;;  %v2776_v36 = vld [vmem:[%s9951_s25 + $0x28] sm:$0xff] }
 0x53d   : > { %v8262_v42 = vpop.eup %8261  ;;  %v2088_v25 = vsub.f32 %v2025_v26, %v9069_v51  ;;  %v2150_v28 = vmul.f32 -0.5, %v2118_v9 }
 0x53e   : > { %v2110_v31 = vmul.f32 %v2078_v55, %v2078_v55  ;;  %v8264_v47 = vpop.eup %8263  ;;  %v2203_v29 = vmul.f32 1.442695, %v2149_v58 }
 0x53f   : > { %6816 = vmatmul.mubr.msk.f32.vlgmr.msra.gmra.mrb[14].mxu0 %vm2232_vm11, %v8250_v4  ;;  %v8266_v54 = vpop.eup %8265  ;;  %v2147_v4 = vmul.f32 -0.5, %v2115_v52  ;;  %v2120_v34 = vmul.f32 %v2088_v25, %v2088_v25  ;;  %v2205_v40 = vmul.f32 1.442695, %v2150_v28  ;;  %v2679_v25 = vld [vmem:[%s9952_s26] sm:$0xff]  ;;  %v2769_v28 = vld [vmem:[%s9944_s18 + $0x8] sm:$0xff] }
 0x540   : > { %6818 = vmatprep.mubr.msk.f32.mxu0 %vm2232_vm11, %v8252_v53  ;;  %v2142_v43 = vmul.f32 -0.5, %v2110_v31  ;;  %v8268_v14 = vpop.eup %8267  ;;  %v2193_v53 = vmul.f32 1.442695, %v2144_v50  ;;  %v2121_v31 = vmul.f32 %v2089_v19, %v2089_v19  ;;  %v2125_v50 = vmul.f32 %v2093_v46, %v2093_v46  ;;  %6870 = vmatprep.subr.mxu1 %v2679_v25 }
 0x541   : > { %v8270_v62 = vpop.eup %8269  ;;  %v2152_v0 = vmul.f32 -0.5, %v2120_v34  ;;  %6871 = vmatpush3.msra.mxu1 %v2679_v25 }
 0x542   : > { %v2189_v22 = vmul.f32 1.442695, %v2142_v43  ;;  %v8272_v8 = vpop.eup %8271  ;;  %v2123_v43 = vmul.f32 %v2091_v32, %v2091_v32 }
 0x543   : > { %6819 = vmatmul.mubr.msk.f32.gmra.mrb[16].mxu0 %vm2232_vm11, %v8254_v3  ;;  %v2035_v3 = vpop.permute.xlu0 %2034  ;;  %v8274_v55 = vpop.eup %8273  ;;  %v2209_v49 = vmul.f32 1.442695, %v2152_v0  ;;  %v1776_v0 = vmul.f32 0.8, %v8761_v44 }
 0x544   : > { %6821 = vmatprep.mubr.msk.f32.mxu0 %vm2232_vm11, %v8256_v15  ;;  %8279 = vpow2.f32 %v2189_v22  ;;  %v2199_v15 = vmul.f32 1.442695, %v2147_v4  ;;  %v8276_v27 = vpop.eup %8275  ;;  %v2090_v35 = vsub.f32 %v2035_v3, %v9069_v51  ;;  %v2155_v22 = vmul.f32 -0.5, %v2123_v43 }
 0x545   : > { %8281 = vpow2.f32 %v2195_v60  ;;  %v8278_v37 = vpop.eup %8277  ;;  %v2157_v60 = vmul.f32 -0.5, %v2125_v50 }
 0x546   : > { %8283 = vpow2.f32 %v2193_v53  ;;  %v2215_v59 = vmul.f32 1.442695, %v2155_v22 }
 0x547   : > { %6822 = vmatmul.mubr.msk.f32.gmra.mrb[18].mxu0 %vm2232_vm11, %v8258_v30  ;;  %v2045_v30 = vpop.permute.xlu0 %2044  ;;  %8285 = vpow2.f32 %v2199_v15  ;;  %v2219_v2 = vmul.f32 1.442695, %v2157_v60 }
 0x548   : > { %6824 = vmatprep.mubr.msk.f32.mxu0 %vm2232_vm11, %v8260_v7  ;;  %8287 = vpow2.f32 %v2197_v57  ;;  %v2201_v7 = vmul.f32 1.442695, %v2148_v24  ;;  %v2092_v48 = vsub.f32 %v2045_v30, %v9069_v51  ;;  %v2771_v30 = vld [vmem:[%s9951_s25] sm:$0xff] }
 0x549   : > { %8289 = vpow2.f32 %v2203_v29  ;;  %v9167_v32 = vpack.c.bf16 %v2772_v17, %v2771_v30 }
 0x54a   : > { %8291 = vpow2.f32 %v2201_v7  ;;  %v2124_v6 = vmul.f32 %v2092_v48, %v2092_v48  ;;  %v2774_v7 = vld [vmem:[%s9951_s25 + $0x18] sm:$0xff] }
 0x54b   : > { %6825 = vmatmul.mubr.msk.f32.gmra.mrb[20].mxu0 %vm2232_vm11, %v8262_v42  ;;  %v2153_v42 = vmul.f32 -0.5, %v2121_v31  ;;  %v2055_v5 = vpop.permute.xlu0 %2054  ;;  %8293 = vpow2.f32 %v2205_v40  ;;  %v2773_v31 = vld [vmem:[%s9951_s25 + $0x10] sm:$0xff]  ;;  %7666 = vmatprep.subr.bf16.mxu0 %v9167_v32  ;;  %v6869_v40 = vpop.f32.mrb[6].mxu1 }
 0x54c   : > { %6827 = vmatprep.mubr.msk.f32.mxu0 %vm2232_vm11, %v8264_v47  ;;  %v2122_v47 = vmul.f32 %v2090_v35, %v2090_v35  ;;  %8295 = vpow2.f32 %v2207_v38  ;;  %v9172_v34 = vpack.c.bf16 %v2774_v7, %v2773_v31  ;;  %v2775_v35 = vld [vmem:[%s9951_s25 + $0x20] sm:$0xff]  ;;  %7668 = vmatpush3.bf16.msra.mxu0 %v9167_v32 }
 0x54d   : > { %v2211_v52 = vmul.f32 1.442695, %v2153_v42  ;;  %v2668_v42 = vpop.f32.mrb[7].mxu1 }
 0x54e   : > { %v8280_v39 = vpop.eup %8279  ;;  %v2154_v10 = vmul.f32 -0.5, %v2122_v47  ;;  %7670 = vmatprep.subr.bf16.mxu0 %v9172_v34 }
 0x54f   : > { %6828 = vmatmul.mubr.msk.f32.gmra.mrb[22].mxu0 %vm2232_vm11, %v8268_v14  ;;  %v8282_v26 = vpop.eup %8281  ;;  %8297 = vpow2.f32 %v2211_v52 }
 0x550   : > { %6830 = vmatprep.mubr.msk.f32.mxu0 %vm2232_vm11, %v8266_v54  ;;  %v8284_v1 = vpop.eup %8283  ;;  %v2094_v54 = vsub.f32 %v2055_v5, %v9069_v51  ;;  %8299 = vpow2.f32 %v2209_v49  ;;  %v2213_v61 = vmul.f32 1.442695, %v2154_v10  ;;  %7672 = vmatpush3.bf16.msra.mxu0 %v9172_v34 }
 0x551   : > { %v8286_v14 = vpop.eup %8285  ;;  %8301 = vpow2.f32 %v2215_v59 }
 0x552   : > { %v8288_v56 = vpop.eup %8287  ;;  %v2126_v53 = vmul.f32 %v2094_v54, %v2094_v54  ;;  %8303 = vpow2.f32 %v2213_v61 }
 0x553   : > { %6831 = vmatmul.mubr.msk.f32.gmra.mrb[24].mxu0 %vm2232_vm11, %v8272_v8  ;;  %v8290_v4 = vpop.eup %8289  ;;  %8305 = vpow2.f32 %v2219_v2 }
 0x554   : > { %6833 = vmatprep.mubr.msk.f32.mxu0 %vm2232_vm11, %v8270_v62  ;;  %v2156_v62 = vmul.f32 -0.5, %v2124_v6  ;;  %v8292_v63 = vpop.eup %8291  ;;  %v2158_v8 = vmul.f32 -0.5, %v2126_v53 }
 0x555   : > { %v8294_v51 = vpop.eup %8293 }
 0x556   : > { %v2217_v3 = vmul.f32 1.442695, %v2156_v62  ;;  %v8296_v9 = vpop.eup %8295  ;;  %v2221_v58 = vmul.f32 1.442695, %v2158_v8 }
 0x557   : > { %6834 = vmatmul.mubr.msk.f32.gmra.mrb[26].mxu0 %vm2232_vm11, %v8274_v55 }
 0x558   : > { %6836 = vmatprep.mubr.msk.f32.mxu0 %vm2232_vm11, %v8276_v27  ;;  %8307 = vpow2.f32 %v2217_v3  ;;  %v2768_v27 = vld [vmem:[%s9944_s18] sm:$0xff] }
 0x559   : > { %v8298_v11 = vpop.eup %8297  ;;  %8309 = vpow2.f32 %v2221_v58  ;;  %v9155_v29 = vpack.c.bf16 %v2769_v28, %v2768_v27 }
 0x55a   : > { %v8300_v15 = vpop.eup %8299 }
 0x55b   : > { %6837 = vmatmul.mubr.msk.f32.gmra.mrb[28].mxu0 %vm2232_vm11, %v8280_v39  ;;  %v8302_v16 = vpop.eup %8301  ;;  %7627 = vmatprep.subr.bf16.mxu1 %v9155_v29  ;;  %v6247_v39 = vld [vmem:[%s9947_s21] ss:$0 sm:$0xff] }
 0x55c   : > { %6839 = vmatprep.mubr.msk.f32.mxu0 %vm2232_vm11, %v8278_v37  ;;  %v8304_v19 = vpop.eup %8303  ;;  %v9183_v37 = vpack.c.bf16 %v2776_v36, %v2775_v35  ;;  %v9191_v38 = vadd.f32 %v6869_v40, %v6247_v39  ;;  %v9193_v43 = vadd.f32 %v6247_v39, %v2668_v42 }
 0x55d   : > { %v8306_v55 = vpop.eup %8305 }
 0x55e   : > { %7674 = vmatprep.subr.bf16.mxu0 %v9183_v37  ;;  %2678 = vst [vmem:[#allocation3 + $0x8] sm:$0xff] %v9191_v38  ;;  %2677 = vst [vmem:[#allocation3] sm:$0xff] %v9193_v43 }
 0x55f   : > { %6840 = vmatmul.mubr.msk.f32.gmra.mrb[30].mxu0 %vm2232_vm11, %v8284_v1 }
 0x560   : > { %6842 = vmatprep.mubr.msk.f32.mxu0 %vm2232_vm11, %v8282_v26  ;;  %7676 = vmatpush3.bf16.msra.mxu0 %v9183_v37  ;;  %v1775_v26 = vmul.f32 0.8, %v8759_v41  ;;  %v9211_v41 = vld [vmem:[%s9949_s23] ss:$0 sm:$0xff] }
 0x562   : > { %v8308_v57 = vpop.eup %8307 }
 0x563   : > { %6843 = vmatmul.mubr.msk.f32.gmra.mrb[32].mxu0 %vm2232_vm11, %v8288_v56  ;;  %v8310_v24 = vpop.eup %8309 }
 0x564   : > { %6845 = vmatprep.mubr.msk.f32.mxu0 %vm2232_vm11, %v8286_v14 }
 0x567   : > { %6846 = vmatmul.mubr.msk.f32.gmra.mrb[34].mxu0 %vm2232_vm11, %v8292_v63 }
 0x568   : > { %6848 = vmatprep.mubr.msk.f32.mxu0 %vm2232_vm11, %v8290_v4 }
 0x56b   : > { %6849 = vmatmul.mubr.msk.f32.gmra.mrb[36].mxu0 %vm2232_vm11, %v8294_v51 }
 0x56c   : > { %6851 = vmatprep.mubr.msk.f32.mxu0 %vm2232_vm11, %v8296_v9 }
 0x56f   : > { %6852 = vmatmul.mubr.msk.f32.gmra.mrb[38].mxu0 %vm2232_vm11, %v8300_v15 }
 0x570   : > { %6854 = vmatprep.mubr.msk.f32.mxu0 %vm2232_vm11, %v8298_v11 }
 0x573   : > { %6855 = vmatmul.mubr.msk.f32.gmra.mrb[40].mxu0 %vm2232_vm11, %v8304_v19 }
 0x574   : > { %6857 = vmatprep.mubr.msk.f32.mxu0 %vm2232_vm11, %v8302_v16 }
 0x577   : > { %6858 = vmatmul.mubr.msk.f32.gmra.mrb[42].mxu0 %vm2232_vm11, %v8308_v57 }
 0x578   : > { %6860 = vmatprep.mubr.msk.f32.mxu0 %vm2232_vm11, %v8306_v55 }
 0x57b   : > { %6861 = vmatmul.mubr.msk.f32.gmra.mrb[44].mxu0 %vm2232_vm11, %v8310_v24 }
 0x60e   : > { %v6810_v46 = vpop.f32.mrb[12].mxu0 }
 0x60f   : > { %v1861_v47 = vmul.f32 0.2, %v6810_v46  ;;  %v1851_v48 = vpop.f32.mrb[13].mxu0 }
 0x610   : > { %v1860_v5 = vmul.f32 0.2, %v1851_v48 }
 0x611   : > { %v1863_v1 = vadd.f32 %v1861_v47, %v1776_v0 }
 0x612   : > { %v1862_v52 = vadd.f32 %v1860_v5, %v1775_v26  ;;  %v9199_v22 = vpop.f32.mrb[14].mxu0 }
 0x613   : > { %v9201_v50 = vpop.f32.mrb[15].mxu0 }
 0x614   : > { %6872 = vmatprep.mubr.msk.f32.mxu1 %vm912_vm0, %v1862_v52 }
 0x615   : > { %6873 = vmatmul.mubr.msk.f32.vlgmr.msra.gmra.mrb[8].mxu1 %vm912_vm0, %v1863_v1 }
 0x616   : > { %7629 = vmatpush3.bf16.msra.mxu1 %v9155_v29  ;;  %6879 = vmatprep.mubr.msk.f32.mxu1 %vm1081_vm4, %v8813_v21  ;;  %v6820_v44 = vpop.f32.mrb[16].mxu0 }
 0x617   : > { %v9214_v49 = vadd.f32 %v6820_v44, %v9211_v41  ;;  %v2409_v10 = vpop.f32.mrb[17].mxu0  ;;  %7631 = vmatprep.subr.bf16.mxu1 %v9167_v32 }
 0x618   : > { %v9218_v6 = vadd.f32 %v9211_v41, %v2409_v10 }
 0x619   : > { %6880 = vmatmul.mubr.msk.f32.vlgmr.msra.gmra.mrb[10].mxu1 %vm1081_vm4, %v8811_v20 }
 0x61a   : > { %v6823_v54 = vpop.f32.mrb[18].mxu0  ;;  %7633 = vmatpush3.bf16.msra.mxu1 %v9167_v32 }
 0x61b   : > { %v9224_v21 = vadd.f32 %v6823_v54, %v9211_v41  ;;  %v2419_v14 = vpop.f32.mrb[19].mxu0  ;;  %7635 = vmatprep.subr.bf16.mxu1 %v9172_v34 }
 0x61c   : > { %v9228_v56 = vadd.f32 %v9211_v41, %v2419_v14 }
 0x61e   : > { %v6826_v59 = vpop.f32.mrb[20].mxu0  ;;  %7637 = vmatpush3.bf16.msra.mxu1 %v9172_v34 }
 0x61f   : > { %v9232_v60 = vadd.f32 %v6826_v59, %v9211_v41  ;;  %v2429_v4 = vpop.f32.mrb[21].mxu0  ;;  %7639 = vmatprep.subr.bf16.mxu1 %v9183_v37 }
 0x620   : > { %v9236_v20 = vadd.f32 %v9211_v41, %v2429_v4 }
 0x622   : > { %v6829_v61 = vpop.f32.mrb[22].mxu0  ;;  %7641 = vmatpush3.bf16.msra.mxu1 %v9183_v37 }
 0x623   : > { %v9240_v62 = vadd.f32 %v6829_v61, %v9211_v41  ;;  %v2439_v53 = vpop.f32.mrb[23].mxu0 }
 0x624   : > { %v9243_v63 = vadd.f32 %v9211_v41, %v2439_v53 }
 0x626   : > { %v6832_v2 = vpop.f32.mrb[24].mxu0 }
 0x627   : > { %v9246_v51 = vadd.f32 %v6832_v2, %v9211_v41  ;;  %v2449_v3 = vpop.f32.mrb[25].mxu0 }
 0x628   : > { %v9249_v8 = vadd.f32 %v9211_v41, %v2449_v3 }
 0x62a   : > { %v6835_v9 = vpop.f32.mrb[26].mxu0 }
 0x62b   : > { %v9252_v58 = vadd.f32 %v6835_v9, %v9211_v41  ;;  %v2459_v11 = vpop.f32.mrb[27].mxu0 }
 0x62c   : > { %v9255_v15 = vadd.f32 %v9211_v41, %v2459_v11  ;;  %v2777_v11 = vld [vmem:[%s9951_s25 + $0x30] sm:$0xff] }
 0x62e   : > { %v6838_v16 = vpop.f32.mrb[28].mxu0 }
 0x62f   : > { %v9258_v19 = vadd.f32 %v6838_v16, %v9211_v41  ;;  %v2469_v55 = vpop.f32.mrb[29].mxu0  ;;  %v2778_v16 = vld [vmem:[%s9951_s25 + $0x38] sm:$0xff] }
 0x630   : > { %v9261_v57 = vadd.f32 %v9211_v41, %v2469_v55  ;;  %v9317_v55 = vpack.c.bf16 %v2778_v16, %v2777_v11 }
 0x632   : > { %v6841_v24 = vpop.f32.mrb[30].mxu0  ;;  %7643 = vmatprep.subr.bf16.mxu1 %v9317_v55  ;;  %7678 = vmatprep.subr.bf16.mxu0 %v9317_v55 }
 0x633   : > { %v9264_v25 = vadd.f32 %v6841_v24, %v9211_v41  ;;  %v2479_v27 = vpop.f32.mrb[31].mxu0  ;;  %7645 = vmatpush3.bf16.msra.mxu1 %v9317_v55  ;;  %v2779_v24 = vld [vmem:[%s9951_s25 + $0x40] sm:$0xff]  ;;  %7680 = vmatpush3.bf16.msra.mxu0 %v9317_v55 }
 0x634   : > { %v9267_v28 = vadd.f32 %v9211_v41, %v2479_v27  ;;  %v2780_v27 = vld [vmem:[%s9951_s25 + $0x48] sm:$0xff] }
 0x636   : > { %v6844_v30 = vpop.f32.mrb[32].mxu0 }
 0x637   : > { %v9270_v17 = vadd.f32 %v6844_v30, %v9211_v41  ;;  %v2489_v31 = vpop.f32.mrb[33].mxu0  ;;  %v9329_v30 = vpack.c.bf16 %v2780_v27, %v2779_v24 }
 0x638   : > { %v9273_v7 = vadd.f32 %v9211_v41, %v2489_v31  ;;  %v2781_v31 = vld [vmem:[%s9951_s25 + $0x50] sm:$0xff] }
 0x639   : > { %7647 = vmatprep.subr.bf16.mxu1 %v9329_v30  ;;  %7682 = vmatprep.subr.bf16.mxu0 %v9329_v30 }
 0x63a   : > { %v6847_v35 = vpop.f32.mrb[34].mxu0  ;;  %7649 = vmatpush3.bf16.msra.mxu1 %v9329_v30  ;;  %7684 = vmatpush3.bf16.msra.mxu0 %v9329_v30 }
 0x63b   : > { %v9276_v36 = vadd.f32 %v6847_v35, %v9211_v41  ;;  %v2499_v39 = vpop.f32.mrb[35].mxu0  ;;  %v2782_v35 = vld [vmem:[%s9951_s25 + $0x58] sm:$0xff] }
 0x63c   : > { %v9279_v40 = vadd.f32 %v9211_v41, %v2499_v39  ;;  %v9341_v39 = vpack.c.bf16 %v2782_v35, %v2781_v31 }
 0x63e   : > { %v6850_v42 = vpop.f32.mrb[36].mxu0  ;;  %7651 = vmatprep.subr.bf16.mxu1 %v9341_v39  ;;  %7686 = vmatprep.subr.bf16.mxu0 %v9341_v39 }
 0x63f   : > { %v9282_v46 = vadd.f32 %v6850_v42, %v9211_v41  ;;  %v2509_v0 = vpop.f32.mrb[37].mxu0  ;;  %7653 = vmatpush3.bf16.msra.mxu1 %v9341_v39  ;;  %v2783_v42 = vld [vmem:[%s9951_s25 + $0x60] sm:$0xff]  ;;  %7688 = vmatpush3.bf16.msra.mxu0 %v9341_v39 }
 0x640   : > { %v9285_v47 = vadd.f32 %v9211_v41, %v2509_v0  ;;  %v2784_v0 = vld [vmem:[%s9951_s25 + $0x68] sm:$0xff] }
 0x642   : > { %v6853_v48 = vpop.f32.mrb[38].mxu0 }
 0x643   : > { %v9288_v26 = vadd.f32 %v6853_v48, %v9211_v41  ;;  %v2519_v5 = vpop.f32.mrb[39].mxu0  ;;  %v9353_v48 = vpack.c.bf16 %v2784_v0, %v2783_v42  ;;  %v2405_v0 = vadd.f32 %v9199_v22, %v9211_v41 }
 0x644   : > { %v9291_v1 = vadd.f32 %v9211_v41, %v2519_v5  ;;  %v2785_v5 = vld [vmem:[%s9951_s25 + $0x70] sm:$0xff] }
 0x645   : > { %7655 = vmatprep.subr.bf16.mxu1 %v9353_v48  ;;  %7690 = vmatprep.subr.bf16.mxu0 %v9353_v48 }
 0x646   : > { %v6856_v52 = vpop.f32.mrb[40].mxu0  ;;  %7657 = vmatpush3.bf16.msra.mxu1 %v9353_v48  ;;  %7692 = vmatpush3.bf16.msra.mxu0 %v9353_v48 }
 0x647   : > { %v9294_v44 = vadd.f32 %v6856_v52, %v9211_v41  ;;  %v2529_v10 = vpop.f32.mrb[41].mxu0  ;;  %v2786_v52 = vld [vmem:[%s9951_s25 + $0x78] sm:$0xff] }
 0x648   : > { %v9297_v54 = vadd.f32 %v9211_v41, %v2529_v10  ;;  %v9365_v10 = vpack.c.bf16 %v2786_v52, %v2785_v5  ;;  %v2400_v52 = vadd.f32 %v9211_v41, %v9201_v50 }
 0x64a   : > { %v6859_v14 = vpop.f32.mrb[42].mxu0  ;;  %7659 = vmatprep.subr.bf16.mxu1 %v9365_v10  ;;  %7694 = vmatprep.subr.bf16.mxu0 %v9365_v10 }
 0x64b   : > { %v9300_v59 = vadd.f32 %v6859_v14, %v9211_v41  ;;  %v2539_v4 = vpop.f32.mrb[43].mxu0  ;;  %7661 = vmatpush3.bf16.msra.mxu1 %v9365_v10  ;;  %7696 = vmatpush3.bf16.msra.mxu0 %v9365_v10  ;;  %v2790_v14 = vlaneseq }
 0x64c   : > { %v9303_v61 = vadd.f32 %v9211_v41, %v2539_v4  ;;  %7662 = vmatprep.subr.bf16.mxu1 %v9976_v12  ;;  %7701 = vmatprep.subr.bf16.mxu0 %v9167_v32 }
 0x64d   : > { %v2791_v4 = vshrl.u32 %v2790_v14, 7 }
 0x64e   : > { %v6862_v53 = vpop.f32.mrb[44].mxu0 }
 0x64f   : > { %v9306_v2 = vadd.f32 %v6862_v53, %v9211_v41  ;;  %v2549_v3 = vpop.f32.mrb[45].mxu0  ;;  %v2792_v53 = vsub.s32 0, %v2791_v4 }
 0x650   : > { %v9309_v9 = vadd.f32 %v9211_v41, %v2549_v3  ;;  %v9376_v3 = vld [vmem:[%s9945_s19] sm:$0x1] }
 0x651   : > { %v2793_v24 = vrot.slane %v9376_v3, %v2792_v53 }
 0x6e8   : > { %v6874_v11 = vpop.f32.mrb[8].mxu1 }
 0x6e9   : > { %v2759_v16 = vpop.f32.mrb[9].mxu1 }
 0x6ec   : > { %v6881_v27 = vpop.f32.mrb[10].mxu1 }
 0x6ed   : > { %v2873_v31 = vadd.f32 %v6881_v27, %v2793_v24  ;;  %v2867_v35 = vpop.f32.mrb[11].mxu1 }
 0x6ee   : > { %v2868_v42 = vadd.f32 %v2867_v35, %v2793_v24 }
 0x6ef   : > { %v2879_v5 = vmul.f32 %v2873_v31, %v9191_v38 }
 0x6f0   : > { %v2878_v14 = vmul.f32 %v2868_v42, %v9193_v43 }
 0x6f1   : > { %2881 = vst [vmem:[#allocation4 + $0x8] sm:$0xff] %v2879_v5  ;;  %v2887_v4 = vmul.f32 %v2879_v5, %v2405_v0  ;;  %v3082_v12 = vmul.f32 %v2879_v5, %v9214_v49  ;;  %v9387_v53 = vmul.f32 %v2879_v5, %v9224_v21  ;;  %v9390_v27 = vmul.f32 %v2879_v5, %v9232_v60  ;;  %v6251_v21 = vld [vmem:[%s9953_s27] ss:$0 sm:$0xff] }
 0x6f2   : > { %2880 = vst [vmem:[#allocation4] sm:$0xff] %v2878_v14  ;;  %v2886_v24 = vmul.f32 %v2878_v14, %v2400_v52  ;;  %v9393_v22 = vmul.f32 %v2879_v5, %v9240_v62  ;;  %v9396_v38 = vmul.f32 %v2879_v5, %v9246_v51  ;;  %v9399_v43 = vmul.f32 %v2879_v5, %v9252_v58 }
 0x6f3   : > { %v9402_v50 = vmul.f32 %v2879_v5, %v9258_v19  ;;  %v9405_v41 = vmul.f32 %v2879_v5, %v9264_v25  ;;  %v10024_v49 = vmov 0.0|0.0   ;;  %v9414_v60 = vadd.f32 %v6874_v11, %v6251_v21 }
 0x6f4   : > { %6914 = vmatprep.mubr.f32.mxu1 %v2886_v24  ;;  %v9416_v62 = vadd.f32 %v6251_v21, %v2759_v16 }
 0x6f5   : > { %6915 = vmatmul.mubr.f32.vlgmr.msra.gmra.mrb[12].mxu1 %v2887_v4 }
 0x6f6   : > { %7664 = vmatpush3.bf16.msra.mxu1 %v9155_v29  ;;  %6921 = vmatprep.mubr.msk.f32.mxu1 %vm8446_vm6, %v9978_v13 }
 0x6f7   : > { %7697 = vmatprep.subr.bf16.mxu1 %v10024_v49 }
 0x7c8   : > { %v6916_v51 = vpop.f32.mrb[12].mxu1 }
 0x7c9   : > { %v2960_v58 = vadd.f32 %v6916_v51, %v9414_v60  ;;  %v2954_v19 = vpop.f32.mrb[13].mxu1 }
 0x7ca   : > { %v2955_v25 = vadd.f32 %v2954_v19, %v9416_v62  ;;  %v2988_v19 = vld [vmem:[#allocation5] sm:$0x1] }
 0x7cb   : > { %8311 = vtanh.f32 %v2960_v58 }
 0x7cc   : > { %8313 = vtanh.f32 %v2955_v25 }
 0x7d5   : > { %v8312_v31 = vpop.eup %8311 }
 0x7d6   : > { %v8314_v35 = vpop.eup %8313  ;;  %v2978_v42 = vmul.f32 %v8312_v31, %v9026_v23 }
 0x7d7   : > { %v2977_v0 = vmul.f32 %v8314_v35, %v9021_v18  ;;  %v10025_v18 = vmov 0.0  }
 0x7d8   : > { %v2980_v5 = vsel %vm1081_vm4, %v2978_v42, 0.0  ;;  %v3074_v42 = vld [vmem:[#allocation3] sm:$0x1] }
 0x7d9   : > { %v2979_v11 = vsel %vm1081_vm4, %v2977_v0, 0.0 }
 0x7da   : > { %v2981_v16 = vadd.f32 %v2980_v5, %v2979_v11 }
 0x7dc   : > { %v2982_v52 = vrot.slane %v2981_v16, 4 }
 0x7de   : > { %v2983_v14 = vadd.f32 %v2982_v52, %v2981_v16  ;;  %v3170_v52 = vpop.permute.xlu0 %3169 }
 0x7e0   : > { %v2984_v4 = vrot.slane %v2983_v14, 2 }
 0x7e2   : > { %v2985_v24 = vadd.f32 %v2984_v4, %v2983_v14  ;;  %v3165_v4 = vpop.permute.xlu1 %3164 }
 0x7e4   : > { %v2986_v21 = vrot.slane %v2985_v24, 1 }
 0x7e6   : > { %v2987_v51 = vadd.f32 %v2986_v21, %v2985_v24 }
 0x7e8   : > { %v2991_v58 = vsub.f32 %v2987_v51, %v2988_v19 }
 0x7ea   : > { %v2997_v25 = vmul.f32 %v9043_v33, %v2991_v58 }
 0x7ec   : > { %v2998_v13 = vadd.f32 %v2997_v25, %v2988_v19 }
 0x7ee   : > { %3000 = vst.msk [vmem:[#allocation5] sm:$0x1] %vm2999_vm12, %v2998_v13  ;;  %6922 = vmatmul.mubr.msk.f32.vlgmr.msra.gmra.mrb[14].mxu1 %vm1081_vm4, %v2998_v13 }
 0x7ef   : > { %7699 = vmatpush3.bf16.msra.mxu1 %v9155_v29  ;;  %6963 = vmatprep.mubr.msk.f32.mxu1 %vm8446_vm6, %v10025_v18 }
 0x7f0   : > { %7732 = vmatprep.subr.bf16.mxu1 %v10024_v49 }
 0x8c1   : > { %v3070_v23 = vpop.f32.mrb[14].mxu1 }
 0x8c2   : > { %v3071_v31 = vadd.f32 %v3070_v23, %v9376_v3  ;;  %v6923_v35 = vpop.f32.mrb[15].mxu1 }
 0x8c4   : > { %v3075_v0 = vmul.f32 %v3074_v42, %v3071_v31 }
 0x8c6   : > { %3076 = vst [vmem:[#allocation4] sm:$0x1] %v3075_v0 }
 0x8cd   : > { %v3079_v33 = vld [vmem:[#allocation4] sm:$0xff] }
 0x8ce   : > { %v3081_v5 = vmul.f32 %v3079_v33, %v9218_v6  ;;  %v3183_v33 = vld [vmem:[#allocation5 + $0x1] sm:$0x1] }
 0x8d0   : > { %6956 = vmatprep.mubr.f32.mxu0 %v3081_v5 }
 0x8d1   : > { %6957 = vmatmul.mubr.f32.vlgmr.msra.gmra.mrb[46].mxu0 %v3082_v12 }
 0x8d2   : > { %7703 = vmatpush3.bf16.msra.mxu0 %v9167_v32 }
 0x8d3   : > { %7705 = vmatprep.subr.bf16.mxu0 %v9172_v34 }
 0x8d6   : > { %7707 = vmatpush3.bf16.msra.mxu0 %v9172_v34 }
 0x8d7   : > { %7709 = vmatprep.subr.bf16.mxu0 %v9183_v37 }
 0x8da   : > { %7711 = vmatpush3.bf16.msra.mxu0 %v9183_v37 }
 0x8db   : > { %7713 = vmatprep.subr.bf16.mxu0 %v9317_v55 }
 0x8de   : > { %7715 = vmatpush3.bf16.msra.mxu0 %v9317_v55 }
 0x8df   : > { %7717 = vmatprep.subr.bf16.mxu0 %v9329_v30 }
 0x8e2   : > { %7719 = vmatpush3.bf16.msra.mxu0 %v9329_v30 }
 0x8e3   : > { %7721 = vmatprep.subr.bf16.mxu0 %v9341_v39 }
 0x8e6   : > { %7723 = vmatpush3.bf16.msra.mxu0 %v9341_v39 }
 0x8e7   : > { %7725 = vmatprep.subr.bf16.mxu0 %v9353_v48 }
 0x8ea   : > { %7727 = vmatpush3.bf16.msra.mxu0 %v9353_v48 }
 0x8eb   : > { %7729 = vmatprep.subr.bf16.mxu0 %v9365_v10 }
 0x8ee   : > { %7731 = vmatpush3.bf16.msra.mxu0 %v9365_v10 }
 0x8ef   : > { %7767 = vmatprep.subr.bf16.mxu0 %v10024_v49 }
 0x9a4   : > { %v6958_v12 = vpop.f32.mrb[46].mxu0 }
 0x9a5   : > { %v3155_v13 = vadd.f32 %v6958_v12, %v9414_v60  ;;  %v3149_v6 = vpop.f32.mrb[47].mxu0  ;;  %v3190_v12 = vpop.permute.xlu1 %3189 }
 0x9a6   : > { %v3150_v11 = vadd.f32 %v3149_v6, %v9416_v62 }
 0x9a7   : > { %8315 = vtanh.f32 %v3155_v13 }
 0x9a8   : > { %8317 = vtanh.f32 %v3150_v11 }
 0x9b1   : > { %v8316_v16 = vpop.eup %8315 }
 0x9b2   : > { %v8318_v14 = vpop.eup %8317  ;;  %v3173_v24 = vmul.f32 %v8316_v16, %v3170_v52 }
 0x9b3   : > { %v3172_v21 = vmul.f32 %v8318_v14, %v3165_v4  ;;  %v3268_v14 = vld [vmem:[#allocation3 + $0x1] sm:$0x1] }
 0x9b4   : > { %v3175_v51 = vsel %vm1081_vm4, %v3173_v24, 0.0 }
 0x9b5   : > { %v3174_v19 = vsel %vm1081_vm4, %v3172_v21, 0.0 }
 0x9b6   : > { %v3176_v58 = vadd.f32 %v3175_v51, %v3174_v19 }
 0x9b8   : > { %v3177_v25 = vrot.slane %v3176_v58, 4 }
 0x9ba   : > { %v3178_v23 = vadd.f32 %v3177_v25, %v3176_v58 }
 0x9bc   : > { %v3179_v31 = vrot.slane %v3178_v23, 2 }
 0x9be   : > { %v3180_v35 = vadd.f32 %v3179_v31, %v3178_v23 }
 0x9c0   : > { %v3181_v42 = vrot.slane %v3180_v35, 1 }
 0x9c2   : > { %v3182_v0 = vadd.f32 %v3181_v42, %v3180_v35  ;;  %v3359_v35 = vpop.permute.xlu0 %3358 }
 0x9c4   : > { %v3186_v5 = vsub.f32 %v3182_v0, %v3183_v33 }
 0x9c6   : > { %v3192_v13 = vmul.f32 %v3190_v12, %v3186_v5 }
 0x9c8   : > { %v3193_v6 = vadd.f32 %v3192_v13, %v3183_v33 }
 0x9ca   : > { %3194 = vst.msk [vmem:[#allocation5 + $0x1] sm:$0x1] %vm2999_vm12, %v3193_v6  ;;  %6964 = vmatmul.mubr.msk.f32.vlgmr.msra.gmra.mrb[16].mxu1 %vm1081_vm4, %v3193_v6 }
 0x9cb   : > { %7734 = vmatpush3.bf16.msra.mxu1 %v9155_v29  ;;  %7005 = vmatprep.mubr.msk.f32.mxu1 %vm8446_vm6, %v10025_v18 }
 0x9cc   : > { %7736 = vmatprep.subr.bf16.mxu1 %v9167_v32 }
 0xa9d   : > { %v3264_v11 = vpop.f32.mrb[16].mxu1 }
 0xa9e   : > { %v3265_v16 = vadd.f32 %v3264_v11, %v9376_v3  ;;  %v6965_v52 = vpop.f32.mrb[17].mxu1 }
 0xaa0   : > { %v3269_v4 = vmul.f32 %v3268_v14, %v3265_v16  ;;  %v3377_v14 = vld [vmem:[#allocation5 + $0x2] sm:$0x1] }
 0xaa2   : > { %3270 = vst [vmem:[#allocation4 + $0x1] sm:$0x1] %v3269_v4 }
 0xaa9   : > { %v3273_v24 = vld [vmem:[#allocation4] sm:$0xff] }
 0xaaa   : > { %v3275_v21 = vmul.f32 %v3273_v24, %v9228_v56  ;;  %v3364_v56 = vpop.permute.xlu1 %3363  ;;  %v3384_v24 = vpop.permute.xlu0 %3383 }
 0xaac   : > { %6998 = vmatprep.mubr.f32.mxu0 %v3275_v21 }
 0xaad   : > { %6999 = vmatmul.mubr.f32.vlgmr.msra.gmra.mrb[48].mxu0 %v9387_v53 }
 0xaae   : > { %7769 = vmatpush3.bf16.msra.mxu0 %v9155_v29  ;;  %7047 = vmatprep.mubr.msk.f32.mxu0 %vm8446_vm6, %v10025_v18 }
 0xaaf   : > { %7771 = vmatprep.subr.bf16.mxu0 %v9167_v32 }
 0xb80   : > { %v7000_v51 = vpop.f32.mrb[48].mxu0 }
 0xb81   : > { %v3349_v19 = vadd.f32 %v7000_v51, %v9414_v60  ;;  %v3343_v58 = vpop.f32.mrb[49].mxu0 }
 0xb82   : > { %v3344_v25 = vadd.f32 %v3343_v58, %v9416_v62 }
 0xb83   : > { %8319 = vtanh.f32 %v3349_v19 }
 0xb84   : > { %8321 = vtanh.f32 %v3344_v25 }
 0xb8d   : > { %v8320_v23 = vpop.eup %8319 }
 0xb8e   : > { %v8322_v31 = vpop.eup %8321  ;;  %v3367_v53 = vmul.f32 %v8320_v23, %v3364_v56  ;;  %v3462_v23 = vld [vmem:[#allocation3 + $0x2] sm:$0x1] }
 0xb8f   : > { %v3366_v42 = vmul.f32 %v8322_v31, %v3359_v35 }
 0xb90   : > { %v3369_v0 = vsel %vm1081_vm4, %v3367_v53, 0.0 }
 0xb91   : > { %v3368_v33 = vsel %vm1081_vm4, %v3366_v42, 0.0 }
 0xb92   : > { %v3370_v5 = vadd.f32 %v3369_v0, %v3368_v33 }
 0xb94   : > { %v3371_v12 = vrot.slane %v3370_v5, 4 }
 0xb96   : > { %v3372_v13 = vadd.f32 %v3371_v12, %v3370_v5 }
 0xb98   : > { %v3373_v6 = vrot.slane %v3372_v13, 2 }
 0xb9a   : > { %v3374_v11 = vadd.f32 %v3373_v6, %v3372_v13  ;;  %v3553_v13 = vpop.permute.xlu1 %3552 }
 0xb9c   : > { %v3375_v16 = vrot.slane %v3374_v11, 1 }
 0xb9e   : > { %v3376_v52 = vadd.f32 %v3375_v16, %v3374_v11 }
 0xba0   : > { %v3380_v4 = vsub.f32 %v3376_v52, %v3377_v14 }
 0xba2   : > { %v3386_v21 = vmul.f32 %v3384_v24, %v3380_v4 }
 0xba4   : > { %v3387_v51 = vadd.f32 %v3386_v21, %v3377_v14 }
 0xba6   : > { %3388 = vst.msk [vmem:[#allocation5 + $0x2] sm:$0x1] %vm2999_vm12, %v3387_v51  ;;  %7006 = vmatmul.mubr.msk.f32.vlgmr.msra.gmra.mrb[18].mxu1 %vm1081_vm4, %v3387_v51 }
 0xba7   : > { %7738 = vmatpush3.bf16.msra.mxu1 %v9167_v32 }
 0xba8   : > { %7740 = vmatprep.subr.bf16.mxu1 %v9172_v34 }
 0xbab   : > { %7742 = vmatpush3.bf16.msra.mxu1 %v9172_v34 }
 0xbac   : > { %7744 = vmatprep.subr.bf16.mxu1 %v9183_v37 }
 0xbaf   : > { %7746 = vmatpush3.bf16.msra.mxu1 %v9183_v37 }
 0xbb0   : > { %7748 = vmatprep.subr.bf16.mxu1 %v9317_v55 }
 0xbb3   : > { %7750 = vmatpush3.bf16.msra.mxu1 %v9317_v55 }
 0xbb4   : > { %7752 = vmatprep.subr.bf16.mxu1 %v9329_v30 }
 0xbb7   : > { %7754 = vmatpush3.bf16.msra.mxu1 %v9329_v30 }
 0xbb8   : > { %7756 = vmatprep.subr.bf16.mxu1 %v9341_v39 }
 0xbbb   : > { %7758 = vmatpush3.bf16.msra.mxu1 %v9341_v39 }
 0xbbc   : > { %7760 = vmatprep.subr.bf16.mxu1 %v9353_v48 }
 0xbbf   : > { %7762 = vmatpush3.bf16.msra.mxu1 %v9353_v48 }
 0xbc0   : > { %7764 = vmatprep.subr.bf16.mxu1 %v9365_v10 }
 0xbc3   : > { %7766 = vmatpush3.bf16.msra.mxu1 %v9365_v10 }
 0xbc4   : > { %7802 = vmatprep.subr.bf16.mxu1 %v10024_v49 }
 0xc79   : > { %v3458_v19 = vpop.f32.mrb[18].mxu1 }
 0xc7a   : > { %v3459_v58 = vadd.f32 %v3458_v19, %v9376_v3  ;;  %v7007_v25 = vpop.f32.mrb[19].mxu1 }
 0xc7c   : > { %v3463_v56 = vmul.f32 %v3462_v23, %v3459_v58  ;;  %v3571_v58 = vld [vmem:[#allocation5 + $0x3] sm:$0x1]  ;;  %v3578_v23 = vpop.permute.xlu1 %3577 }
 0xc7e   : > { %3464 = vst [vmem:[#allocation4 + $0x2] sm:$0x1] %v3463_v56 }
 0xc85   : > { %v3467_v31 = vld [vmem:[#allocation4] sm:$0xff] }
 0xc86   : > { %v3469_v35 = vmul.f32 %v3467_v31, %v9236_v20  ;;  %v3558_v20 = vpop.permute.xlu0 %3557 }
 0xc88   : > { %7040 = vmatprep.mubr.f32.mxu1 %v3469_v35 }
 0xc89   : > { %7041 = vmatmul.mubr.f32.vlgmr.msra.gmra.mrb[20].mxu1 %v9390_v27 }
 0xc8a   : > { %7804 = vmatpush3.bf16.msra.mxu1 %v9155_v29  ;;  %7089 = vmatprep.mubr.msk.f32.mxu1 %vm8446_vm6, %v10025_v18 }
 0xc8b   : > { %7806 = vmatprep.subr.bf16.mxu1 %v9167_v32 }
 0xd5c   : > { %v7042_v53 = vpop.f32.mrb[20].mxu1 }
 0xd5d   : > { %v3543_v42 = vadd.f32 %v7042_v53, %v9414_v60  ;;  %v3537_v0 = vpop.f32.mrb[21].mxu1 }
 0xd5e   : > { %v3538_v33 = vadd.f32 %v3537_v0, %v9416_v62  ;;  %v3656_v0 = vld [vmem:[#allocation3 + $0x3] sm:$0x1] }
 0xd5f   : > { %8323 = vtanh.f32 %v3543_v42 }
 0xd60   : > { %8325 = vtanh.f32 %v3538_v33 }
 0xd69   : > { %v8324_v5 = vpop.eup %8323 }
 0xd6a   : > { %v8326_v12 = vpop.eup %8325  ;;  %v3561_v27 = vmul.f32 %v8324_v5, %v3558_v20 }
 0xd6b   : > { %v3560_v6 = vmul.f32 %v8326_v12, %v3553_v13 }
 0xd6c   : > { %v3563_v11 = vsel %vm1081_vm4, %v3561_v27, 0.0 }
 0xd6d   : > { %v3562_v16 = vsel %vm1081_vm4, %v3560_v6, 0.0 }
 0xd6e   : > { %v3564_v52 = vadd.f32 %v3563_v11, %v3562_v16 }
 0xd70   : > { %v3565_v14 = vrot.slane %v3564_v52, 4 }
 0xd72   : > { %v3566_v4 = vadd.f32 %v3565_v14, %v3564_v52  ;;  %v3747_v52 = vpop.permute.xlu0 %3746 }
 0xd74   : > { %v3567_v24 = vrot.slane %v3566_v4, 2 }
 0xd76   : > { %v3568_v21 = vadd.f32 %v3567_v24, %v3566_v4 }
 0xd78   : > { %v3569_v51 = vrot.slane %v3568_v21, 1 }
 0xd7a   : > { %v3570_v19 = vadd.f32 %v3569_v51, %v3568_v21 }
 0xd7c   : > { %v3574_v25 = vsub.f32 %v3570_v19, %v3571_v58 }
 0xd7e   : > { %v3580_v56 = vmul.f32 %v3578_v23, %v3574_v25 }
 0xd80   : > { %v3581_v31 = vadd.f32 %v3580_v56, %v3571_v58 }
 0xd82   : > { %3582 = vst.msk [vmem:[#allocation5 + $0x3] sm:$0x1] %vm2999_vm12, %v3581_v31  ;;  %7048 = vmatmul.mubr.msk.f32.vlgmr.msra.gmra.mrb[50].mxu0 %vm1081_vm4, %v3581_v31  ;;  %v3765_v31 = vld [vmem:[#allocation5 + $0x4] sm:$0x1] }
 0xd83   : > { %7773 = vmatpush3.bf16.msra.mxu0 %v9167_v32 }
 0xd84   : > { %7775 = vmatprep.subr.bf16.mxu0 %v9172_v34 }
 0xd87   : > { %7777 = vmatpush3.bf16.msra.mxu0 %v9172_v34 }
 0xd88   : > { %7779 = vmatprep.subr.bf16.mxu0 %v9183_v37 }
 0xd8b   : > { %7781 = vmatpush3.bf16.msra.mxu0 %v9183_v37 }
 0xd8c   : > { %7783 = vmatprep.subr.bf16.mxu0 %v9317_v55 }
 0xd8f   : > { %7785 = vmatpush3.bf16.msra.mxu0 %v9317_v55 }
 0xd90   : > { %7787 = vmatprep.subr.bf16.mxu0 %v9329_v30 }
 0xd93   : > { %7789 = vmatpush3.bf16.msra.mxu0 %v9329_v30 }
 0xd94   : > { %7791 = vmatprep.subr.bf16.mxu0 %v9341_v39 }
 0xd97   : > { %7793 = vmatpush3.bf16.msra.mxu0 %v9341_v39 }
 0xd98   : > { %7795 = vmatprep.subr.bf16.mxu0 %v9353_v48 }
 0xd9b   : > { %7797 = vmatpush3.bf16.msra.mxu0 %v9353_v48 }
 0xd9c   : > { %7799 = vmatprep.subr.bf16.mxu0 %v9365_v10 }
 0xd9f   : > { %7801 = vmatpush3.bf16.msra.mxu0 %v9365_v10 }
 0xda0   : > { %7837 = vmatprep.subr.bf16.mxu0 %v10024_v49 }
 0xe55   : > { %v3652_v35 = vpop.f32.mrb[50].mxu0 }
 0xe56   : > { %v3653_v53 = vadd.f32 %v3652_v35, %v9376_v3  ;;  %v7049_v42 = vpop.f32.mrb[51].mxu0 }
 0xe58   : > { %v3657_v33 = vmul.f32 %v3656_v0, %v3653_v53  ;;  %v3772_v53 = vpop.permute.xlu0 %3771 }
 0xe5a   : > { %3658 = vst [vmem:[#allocation4 + $0x3] sm:$0x1] %v3657_v33 }
 0xe61   : > { %v3661_v5 = vld [vmem:[#allocation4] sm:$0xff] }
 0xe62   : > { %v3663_v20 = vmul.f32 %v3661_v5, %v9243_v63  ;;  %v3752_v63 = vpop.permute.xlu1 %3751 }
 0xe64   : > { %7082 = vmatprep.mubr.f32.mxu0 %v3663_v20 }
 0xe65   : > { %7083 = vmatmul.mubr.f32.vlgmr.msra.gmra.mrb[52].mxu0 %v9393_v22 }
 0xe66   : > { %7839 = vmatpush3.bf16.msra.mxu0 %v9155_v29  ;;  %7131 = vmatprep.mubr.msk.f32.mxu0 %vm8446_vm6, %v10025_v18 }
 0xe67   : > { %7841 = vmatprep.subr.bf16.mxu0 %v9167_v32 }
 0xf38   : > { %v7084_v12 = vpop.f32.mrb[52].mxu0 }
 0xf39   : > { %v3737_v13 = vadd.f32 %v7084_v12, %v9414_v60  ;;  %v3731_v27 = vpop.f32.mrb[53].mxu0  ;;  %v3850_v12 = vld [vmem:[#allocation3 + $0x4] sm:$0x1] }
 0xf3a   : > { %v3732_v6 = vadd.f32 %v3731_v27, %v9416_v62 }
 0xf3b   : > { %8327 = vtanh.f32 %v3737_v13 }
 0xf3c   : > { %8329 = vtanh.f32 %v3732_v6 }
 0xf45   : > { %v8328_v11 = vpop.eup %8327 }
 0xf46   : > { %v8330_v16 = vpop.eup %8329  ;;  %v3755_v22 = vmul.f32 %v8328_v11, %v3752_v63 }
 0xf47   : > { %v3754_v14 = vmul.f32 %v8330_v16, %v3747_v52 }
 0xf48   : > { %v3757_v4 = vsel %vm1081_vm4, %v3755_v22, 0.0 }
 0xf49   : > { %v3756_v24 = vsel %vm1081_vm4, %v3754_v14, 0.0 }
 0xf4a   : > { %v3758_v21 = vadd.f32 %v3757_v4, %v3756_v24  ;;  %v3941_v4 = vpop.permute.xlu1 %3940 }
 0xf4c   : > { %v3759_v51 = vrot.slane %v3758_v21, 4 }
 0xf4e   : > { %v3760_v19 = vadd.f32 %v3759_v51, %v3758_v21 }
 0xf50   : > { %v3761_v58 = vrot.slane %v3760_v19, 2 }
 0xf52   : > { %v3762_v25 = vadd.f32 %v3761_v58, %v3760_v19 }
 0xf54   : > { %v3763_v23 = vrot.slane %v3762_v25, 1 }
 0xf56   : > { %v3764_v56 = vadd.f32 %v3763_v23, %v3762_v25 }
 0xf58   : > { %v3768_v35 = vsub.f32 %v3764_v56, %v3765_v31 }
 0xf5a   : > { %v3774_v42 = vmul.f32 %v3772_v53, %v3768_v35  ;;  %v3959_v53 = vld [vmem:[#allocation5 + $0x5] sm:$0x1] }
 0xf5c   : > { %v3775_v0 = vadd.f32 %v3774_v42, %v3765_v31 }
 0xf5e   : > { %3776 = vst.msk [vmem:[#allocation5 + $0x4] sm:$0x1] %vm2999_vm12, %v3775_v0  ;;  %7090 = vmatmul.mubr.msk.f32.vlgmr.msra.gmra.mrb[22].mxu1 %vm1081_vm4, %v3775_v0  ;;  %v3966_v0 = vpop.permute.xlu1 %3965 }
 0xf5f   : > { %7808 = vmatpush3.bf16.msra.mxu1 %v9167_v32 }
 0xf60   : > { %7810 = vmatprep.subr.bf16.mxu1 %v9172_v34 }
 0xf63   : > { %7812 = vmatpush3.bf16.msra.mxu1 %v9172_v34 }
 0xf64   : > { %7814 = vmatprep.subr.bf16.mxu1 %v9183_v37 }
 0xf67   : > { %7816 = vmatpush3.bf16.msra.mxu1 %v9183_v37 }
 0xf68   : > { %7818 = vmatprep.subr.bf16.mxu1 %v9317_v55 }
 0xf6b   : > { %7820 = vmatpush3.bf16.msra.mxu1 %v9317_v55 }
 0xf6c   : > { %7822 = vmatprep.subr.bf16.mxu1 %v9329_v30 }
 0xf6f   : > { %7824 = vmatpush3.bf16.msra.mxu1 %v9329_v30 }
 0xf70   : > { %7826 = vmatprep.subr.bf16.mxu1 %v9341_v39 }
 0xf73   : > { %7828 = vmatpush3.bf16.msra.mxu1 %v9341_v39 }
 0xf74   : > { %7830 = vmatprep.subr.bf16.mxu1 %v9353_v48 }
 0xf77   : > { %7832 = vmatpush3.bf16.msra.mxu1 %v9353_v48 }
 0xf78   : > { %7834 = vmatprep.subr.bf16.mxu1 %v9365_v10 }
 0xf7b   : > { %7836 = vmatpush3.bf16.msra.mxu1 %v9365_v10 }
 0xf7c   : > { %7872 = vmatprep.subr.bf16.mxu1 %v10024_v49 }
0x1031   : > { %v3846_v33 = vpop.f32.mrb[22].mxu1 }
0x1032   : > { %v3847_v5 = vadd.f32 %v3846_v33, %v9376_v3  ;;  %v7091_v20 = vpop.f32.mrb[23].mxu1 }
0x1034   : > { %v3851_v13 = vmul.f32 %v3850_v12, %v3847_v5 }
0x1036   : > { %3852 = vst [vmem:[#allocation4 + $0x4] sm:$0x1] %v3851_v13 }
0x103d   : > { %v3855_v27 = vld [vmem:[#allocation4] sm:$0xff] }
0x103e   : > { %v3857_v6 = vmul.f32 %v3855_v27, %v9249_v8  ;;  %v3946_v8 = vpop.permute.xlu0 %3945  ;;  %v4044_v27 = vld [vmem:[#allocation3 + $0x5] sm:$0x1] }
0x1040   : > { %7124 = vmatprep.mubr.f32.mxu1 %v3857_v6 }
0x1041   : > { %7125 = vmatmul.mubr.f32.vlgmr.msra.gmra.mrb[24].mxu1 %v9396_v38 }
0x1042   : > { %7874 = vmatpush3.bf16.msra.mxu1 %v9155_v29  ;;  %7173 = vmatprep.mubr.msk.f32.mxu1 %vm8446_vm6, %v10025_v18 }
0x1043   : > { %7876 = vmatprep.subr.bf16.mxu1 %v9167_v32 }
0x1114   : > { %v7126_v11 = vpop.f32.mrb[24].mxu1 }
0x1115   : > { %v3931_v63 = vadd.f32 %v7126_v11, %v9414_v60  ;;  %v3925_v16 = vpop.f32.mrb[25].mxu1 }
0x1116   : > { %v3926_v52 = vadd.f32 %v3925_v16, %v9416_v62 }
0x1117   : > { %8331 = vtanh.f32 %v3931_v63 }
0x1118   : > { %8333 = vtanh.f32 %v3926_v52 }
0x1121   : > { %v8332_v22 = vpop.eup %8331 }
0x1122   : > { %v8334_v14 = vpop.eup %8333  ;;  %v3949_v38 = vmul.f32 %v8332_v22, %v3946_v8 }
0x1123   : > { %v3948_v24 = vmul.f32 %v8334_v14, %v3941_v4 }
0x1124   : > { %v3951_v21 = vsel %vm1081_vm4, %v3949_v38, 0.0  ;;  %v4135_v38 = vpop.permute.xlu0 %4134 }
0x1125   : > { %v3950_v51 = vsel %vm1081_vm4, %v3948_v24, 0.0 }
0x1126   : > { %v3952_v19 = vadd.f32 %v3951_v21, %v3950_v51 }
0x1128   : > { %v3953_v58 = vrot.slane %v3952_v19, 4 }
0x112a   : > { %v3954_v25 = vadd.f32 %v3953_v58, %v3952_v19 }
0x112c   : > { %v3955_v23 = vrot.slane %v3954_v25, 2 }
0x112e   : > { %v3956_v56 = vadd.f32 %v3955_v23, %v3954_v25 }
0x1130   : > { %v3957_v31 = vrot.slane %v3956_v56, 1 }
0x1132   : > { %v3958_v35 = vadd.f32 %v3957_v31, %v3956_v56 }
0x1134   : > { %v3962_v42 = vsub.f32 %v3958_v35, %v3959_v53 }
0x1136   : > { %v3968_v33 = vmul.f32 %v3966_v0, %v3962_v42  ;;  %v4160_v0 = vpop.permute.xlu0 %4159 }
0x1138   : > { %v3969_v5 = vadd.f32 %v3968_v33, %v3959_v53  ;;  %v4153_v53 = vld [vmem:[#allocation5 + $0x6] sm:$0x1] }
0x113a   : > { %3970 = vst.msk [vmem:[#allocation5 + $0x5] sm:$0x1] %vm2999_vm12, %v3969_v5  ;;  %7132 = vmatmul.mubr.msk.f32.vlgmr.msra.gmra.mrb[54].mxu0 %vm1081_vm4, %v3969_v5 }
0x113b   : > { %7843 = vmatpush3.bf16.msra.mxu0 %v9167_v32 }
0x113c   : > { %7845 = vmatprep.subr.bf16.mxu0 %v9172_v34 }
0x113f   : > { %7847 = vmatpush3.bf16.msra.mxu0 %v9172_v34 }
0x1140   : > { %7849 = vmatprep.subr.bf16.mxu0 %v9183_v37 }
0x1143   : > { %7851 = vmatpush3.bf16.msra.mxu0 %v9183_v37 }
0x1144   : > { %7853 = vmatprep.subr.bf16.mxu0 %v9317_v55 }
0x1147   : > { %7855 = vmatpush3.bf16.msra.mxu0 %v9317_v55 }
0x1148   : > { %7857 = vmatprep.subr.bf16.mxu0 %v9329_v30 }
0x114b   : > { %7859 = vmatpush3.bf16.msra.mxu0 %v9329_v30 }
0x114c   : > { %7861 = vmatprep.subr.bf16.mxu0 %v9341_v39 }
0x114f   : > { %7863 = vmatpush3.bf16.msra.mxu0 %v9341_v39 }
0x1150   : > { %7865 = vmatprep.subr.bf16.mxu0 %v9353_v48 }
0x1153   : > { %7867 = vmatpush3.bf16.msra.mxu0 %v9353_v48 }
0x1154   : > { %7869 = vmatprep.subr.bf16.mxu0 %v9365_v10 }
0x1157   : > { %7871 = vmatpush3.bf16.msra.mxu0 %v9365_v10 }
0x1158   : > { %7907 = vmatprep.subr.bf16.mxu0 %v10024_v49 }
0x120d   : > { %v4040_v20 = vpop.f32.mrb[54].mxu0 }
0x120e   : > { %v4041_v12 = vadd.f32 %v4040_v20, %v9376_v3  ;;  %v7133_v13 = vpop.f32.mrb[55].mxu0 }
0x1210   : > { %v4045_v6 = vmul.f32 %v4044_v27, %v4041_v12  ;;  %v4238_v27 = vld [vmem:[#allocation3 + $0x6] sm:$0x1] }
0x1212   : > { %4046 = vst [vmem:[#allocation4 + $0x5] sm:$0x1] %v4045_v6 }
0x1219   : > { %v4049_v11 = vld [vmem:[#allocation4] sm:$0xff] }
0x121a   : > { %v4051_v63 = vmul.f32 %v4049_v11, %v9255_v15  ;;  %v4140_v15 = vpop.permute.xlu1 %4139 }
0x121c   : > { %7166 = vmatprep.mubr.f32.mxu0 %v4051_v63 }
0x121d   : > { %7167 = vmatmul.mubr.f32.vlgmr.msra.gmra.mrb[56].mxu0 %v9399_v43 }
0x121e   : > { %7909 = vmatpush3.bf16.msra.mxu0 %v9155_v29  ;;  %7215 = vmatprep.mubr.msk.f32.mxu0 %vm8446_vm6, %v10025_v18 }
0x121f   : > { %7911 = vmatprep.subr.bf16.mxu0 %v9167_v32 }
0x12f0   : > { %v7168_v16 = vpop.f32.mrb[56].mxu0 }
0x12f1   : > { %v4125_v52 = vadd.f32 %v7168_v16, %v9414_v60  ;;  %v4119_v22 = vpop.f32.mrb[57].mxu0 }
0x12f2   : > { %v4120_v8 = vadd.f32 %v4119_v22, %v9416_v62 }
0x12f3   : > { %8335 = vtanh.f32 %v4125_v52 }
0x12f4   : > { %8337 = vtanh.f32 %v4120_v8 }
0x12fd   : > { %v8336_v14 = vpop.eup %8335 }
0x12fe   : > { %v8338_v4 = vpop.eup %8337  ;;  %v4143_v43 = vmul.f32 %v8336_v14, %v4140_v15 }
0x12ff   : > { %v4142_v24 = vmul.f32 %v8338_v4, %v4135_v38  ;;  %v4329_v4 = vpop.permute.xlu1 %4328 }
0x1300   : > { %v4145_v21 = vsel %vm1081_vm4, %v4143_v43, 0.0 }
0x1301   : > { %v4144_v51 = vsel %vm1081_vm4, %v4142_v24, 0.0 }
0x1302   : > { %v4146_v19 = vadd.f32 %v4145_v21, %v4144_v51 }
0x1304   : > { %v4147_v58 = vrot.slane %v4146_v19, 4 }
0x1306   : > { %v4148_v25 = vadd.f32 %v4147_v58, %v4146_v19 }
0x1308   : > { %v4149_v23 = vrot.slane %v4148_v25, 2 }
0x130a   : > { %v4150_v56 = vadd.f32 %v4149_v23, %v4148_v25 }
0x130c   : > { %v4151_v31 = vrot.slane %v4150_v56, 1 }
0x130e   : > { %v4152_v35 = vadd.f32 %v4151_v31, %v4150_v56  ;;  %v4347_v31 = vld [vmem:[#allocation5 + $0x7] sm:$0x1] }
0x1310   : > { %v4156_v42 = vsub.f32 %v4152_v35, %v4153_v53 }
0x1312   : > { %v4162_v33 = vmul.f32 %v4160_v0, %v4156_v42 }
0x1314   : > { %v4163_v5 = vadd.f32 %v4162_v33, %v4153_v53  ;;  %v4354_v53 = vpop.permute.xlu1 %4353 }
0x1316   : > { %4164 = vst.msk [vmem:[#allocation5 + $0x6] sm:$0x1] %vm2999_vm12, %v4163_v5  ;;  %7174 = vmatmul.mubr.msk.f32.vlgmr.msra.gmra.mrb[26].mxu1 %vm1081_vm4, %v4163_v5 }
0x1317   : > { %7878 = vmatpush3.bf16.msra.mxu1 %v9167_v32 }
0x1318   : > { %7880 = vmatprep.subr.bf16.mxu1 %v9172_v34 }
0x131b   : > { %7882 = vmatpush3.bf16.msra.mxu1 %v9172_v34 }
0x131c   : > { %7884 = vmatprep.subr.bf16.mxu1 %v9183_v37 }
0x131f   : > { %7886 = vmatpush3.bf16.msra.mxu1 %v9183_v37 }
0x1320   : > { %7888 = vmatprep.subr.bf16.mxu1 %v9317_v55 }
0x1323   : > { %7890 = vmatpush3.bf16.msra.mxu1 %v9317_v55 }
0x1324   : > { %7892 = vmatprep.subr.bf16.mxu1 %v9329_v30 }
0x1327   : > { %7894 = vmatpush3.bf16.msra.mxu1 %v9329_v30 }
0x1328   : > { %7896 = vmatprep.subr.bf16.mxu1 %v9341_v39 }
0x132b   : > { %7898 = vmatpush3.bf16.msra.mxu1 %v9341_v39 }
0x132c   : > { %7900 = vmatprep.subr.bf16.mxu1 %v9353_v48 }
0x132f   : > { %7902 = vmatpush3.bf16.msra.mxu1 %v9353_v48 }
0x1330   : > { %7904 = vmatprep.subr.bf16.mxu1 %v9365_v10 }
0x1333   : > { %7906 = vmatpush3.bf16.msra.mxu1 %v9365_v10 }
0x1334   : > { %7942 = vmatprep.subr.bf16.mxu1 %v10024_v49 }
0x13e9   : > { %v4234_v20 = vpop.f32.mrb[26].mxu1 }
0x13ea   : > { %v4235_v12 = vadd.f32 %v4234_v20, %v9376_v3  ;;  %v7175_v13 = vpop.f32.mrb[27].mxu1 }
0x13ec   : > { %v4239_v6 = vmul.f32 %v4238_v27, %v4235_v12  ;;  %v4432_v12 = vld [vmem:[#allocation3 + $0x7] sm:$0x1] }
0x13ee   : > { %4240 = vst [vmem:[#allocation4 + $0x6] sm:$0x1] %v4239_v6 }
0x13f5   : > { %v4243_v11 = vld [vmem:[#allocation4] sm:$0xff] }
0x13f6   : > { %v4245_v63 = vmul.f32 %v4243_v11, %v9261_v57  ;;  %v4334_v57 = vpop.permute.xlu0 %4333 }
0x13f8   : > { %7208 = vmatprep.mubr.f32.mxu1 %v4245_v63 }
0x13f9   : > { %7209 = vmatmul.mubr.f32.vlgmr.msra.gmra.mrb[28].mxu1 %v9402_v50 }
0x13fa   : > { %7944 = vmatpush3.bf16.msra.mxu1 %v9155_v29  ;;  %7257 = vmatprep.mubr.msk.f32.mxu1 %vm8446_vm6, %v10025_v18 }
0x13fb   : > { %7946 = vmatprep.subr.bf16.mxu1 %v9167_v32 }
0x14cc   : > { %v7210_v16 = vpop.f32.mrb[28].mxu1 }
0x14cd   : > { %v4319_v52 = vadd.f32 %v7210_v16, %v9414_v60  ;;  %v4313_v22 = vpop.f32.mrb[29].mxu1 }
0x14ce   : > { %v4314_v8 = vadd.f32 %v4313_v22, %v9416_v62 }
0x14cf   : > { %8339 = vtanh.f32 %v4319_v52 }
0x14d0   : > { %8341 = vtanh.f32 %v4314_v8 }
0x14d9   : > { %v8340_v14 = vpop.eup %8339 }
0x14da   : > { %v8342_v15 = vpop.eup %8341  ;;  %v4337_v50 = vmul.f32 %v8340_v14, %v4334_v57 }
0x14db   : > { %v4336_v38 = vmul.f32 %v8342_v15, %v4329_v4 }
0x14dc   : > { %v4339_v43 = vsel %vm1081_vm4, %v4337_v50, 0.0 }
0x14dd   : > { %v4338_v24 = vsel %vm1081_vm4, %v4336_v38, 0.0 }
0x14de   : > { %v4340_v21 = vadd.f32 %v4339_v43, %v4338_v24 }
0x14e0   : > { %v4341_v51 = vrot.slane %v4340_v21, 4 }
0x14e2   : > { %v4342_v19 = vadd.f32 %v4341_v51, %v4340_v21 }
0x14e4   : > { %v4343_v58 = vrot.slane %v4342_v19, 2 }
0x14e6   : > { %v4344_v25 = vadd.f32 %v4343_v58, %v4342_v19  ;;  %v4541_v19 = vld [vmem:[#allocation5 + $0x8] sm:$0x1] }
0x14e8   : > { %v4345_v23 = vrot.slane %v4344_v25, 1 }
0x14ea   : > { %v4346_v56 = vadd.f32 %v4345_v23, %v4344_v25 }
0x14ec   : > { %v4350_v35 = vsub.f32 %v4346_v56, %v4347_v31 }
0x14ee   : > { %v4356_v42 = vmul.f32 %v4354_v53, %v4350_v35  ;;  %v9684_v35 = vld [vmem:[%s9945_s19] sm:$0x1] }
0x14f0   : > { %v4357_v0 = vadd.f32 %v4356_v42, %v4347_v31 }
0x14f2   : > { %4358 = vst.msk [vmem:[#allocation5 + $0x7] sm:$0x1] %vm2999_vm12, %v4357_v0  ;;  %7216 = vmatmul.mubr.msk.f32.vlgmr.msra.gmra.mrb[58].mxu0 %vm1081_vm4, %v4357_v0  ;;  %v4626_v0 = vld [vmem:[#allocation3 + $0x8] sm:$0x1] }
0x14f3   : > { %7913 = vmatpush3.bf16.msra.mxu0 %v9167_v32 }
0x14f4   : > { %7915 = vmatprep.subr.bf16.mxu0 %v9172_v34 }
0x14f7   : > { %7917 = vmatpush3.bf16.msra.mxu0 %v9172_v34 }
0x14f8   : > { %7919 = vmatprep.subr.bf16.mxu0 %v9183_v37 }
0x14fb   : > { %7921 = vmatpush3.bf16.msra.mxu0 %v9183_v37 }
0x14fc   : > { %7923 = vmatprep.subr.bf16.mxu0 %v9317_v55 }
0x14ff   : > { %7925 = vmatpush3.bf16.msra.mxu0 %v9317_v55 }
0x1500   : > { %7927 = vmatprep.subr.bf16.mxu0 %v9329_v30 }
0x1503   : > { %7929 = vmatpush3.bf16.msra.mxu0 %v9329_v30 }
0x1504   : > { %7931 = vmatprep.subr.bf16.mxu0 %v9341_v39 }
0x1507   : > { %7933 = vmatpush3.bf16.msra.mxu0 %v9341_v39 }
0x1508   : > { %7935 = vmatprep.subr.bf16.mxu0 %v9353_v48 }
0x150b   : > { %7937 = vmatpush3.bf16.msra.mxu0 %v9353_v48 }
0x150c   : > { %7939 = vmatprep.subr.bf16.mxu0 %v9365_v10 }
0x150f   : > { %7941 = vmatpush3.bf16.msra.mxu0 %v9365_v10 }
0x1510   : > { %7977 = vmatprep.subr.bf16.mxu0 %v10024_v49 }
0x15c5   : > { %v4428_v33 = vpop.f32.mrb[58].mxu0 }
0x15c6   : > { %v4429_v5 = vadd.f32 %v4428_v33, %v9376_v3  ;;  %v7217_v20 = vpop.f32.mrb[59].mxu0 }
0x15c8   : > { %v4433_v13 = vmul.f32 %v4432_v12, %v4429_v5 }
0x15ca   : > { %4434 = vst [vmem:[#allocation4 + $0x7] sm:$0x1] %v4433_v13 }
0x15d1   : > { %v4437_v27 = vld [vmem:[#allocation4] sm:$0xff] }
0x15d2   : > { %v4439_v6 = vmul.f32 %v4437_v27, %v9267_v28  ;;  %v4633_v11 = vmul.f32 %v4437_v27, %v9273_v7  ;;  %v9637_v63 = vmul.f32 %v4437_v27, %v9279_v40  ;;  %v9640_v16 = vmul.f32 %v4437_v27, %v9285_v47 }
0x15d3   : > { %v9643_v52 = vmul.f32 %v4437_v27, %v9291_v1  ;;  %v9646_v3 = vmul.f32 %v4437_v27, %v9297_v54  ;;  %v9649_v22 = vmul.f32 %v4437_v27, %v9303_v61  ;;  %v9652_v8 = vmul.f32 %v4437_v27, %v9309_v9  ;;  %v4528_v54 = vpop.permute.xlu1 %4527  ;;  %v4523_v9 = vpop.permute.xlu0 %4522 }
0x15d4   : > { %7250 = vmatprep.mubr.f32.mxu0 %v4439_v6 }
0x15d5   : > { %7251 = vmatmul.mubr.f32.vlgmr.msra.gmra.mrb[60].mxu0 %v9405_v41 }
0x15d6   : > { %7979 = vmatpush3.bf16.msra.mxu0 %v9155_v29  ;;  %7299 = vmatprep.mubr.msk.f32.mxu0 %vm8446_vm6, %v10025_v18 }
0x15d7   : > { %7981 = vmatprep.subr.bf16.mxu0 %v9167_v32  ;;  %v4548_v25 = vpop.permute.xlu0 %4547 }
0x16a8   : > { %v7252_v28 = vpop.f32.mrb[60].mxu0 }
0x16a9   : > { %v4513_v7 = vadd.f32 %v7252_v28, %v9414_v60  ;;  %v4507_v40 = vpop.f32.mrb[61].mxu0  ;;  %v4722_v28 = vpop.permute.xlu0 %4721 }
0x16aa   : > { %v4508_v47 = vadd.f32 %v4507_v40, %v9416_v62 }
0x16ab   : > { %8343 = vtanh.f32 %v4513_v7 }
0x16ac   : > { %8345 = vtanh.f32 %v4508_v47 }
0x16b5   : > { %v8344_v1 = vpop.eup %8343 }
0x16b6   : > { %v8346_v61 = vpop.eup %8345  ;;  %v4531_v41 = vmul.f32 %v8344_v1, %v4528_v54 }
0x16b7   : > { %v4530_v14 = vmul.f32 %v8346_v61, %v4523_v9 }
0x16b8   : > { %v4533_v57 = vsel %vm1081_vm4, %v4531_v41, 0.0 }
0x16b9   : > { %v4532_v15 = vsel %vm1081_vm4, %v4530_v14, 0.0 }
0x16ba   : > { %v4534_v4 = vadd.f32 %v4533_v57, %v4532_v15 }
0x16bc   : > { %v4535_v50 = vrot.slane %v4534_v4, 4 }
0x16be   : > { %v4536_v38 = vadd.f32 %v4535_v50, %v4534_v4  ;;  %v4735_v50 = vld [vmem:[#allocation5 + $0x9] sm:$0x1] }
0x16c0   : > { %v4537_v43 = vrot.slane %v4536_v38, 2 }
0x16c2   : > { %v4538_v24 = vadd.f32 %v4537_v43, %v4536_v38 }
0x16c4   : > { %v4539_v21 = vrot.slane %v4538_v24, 1 }
0x16c6   : > { %v4540_v51 = vadd.f32 %v4539_v21, %v4538_v24 }
0x16c8   : > { %v4544_v58 = vsub.f32 %v4540_v51, %v4541_v19 }
0x16ca   : > { %v4550_v23 = vmul.f32 %v4548_v25, %v4544_v58  ;;  %v4820_v58 = vld [vmem:[#allocation3 + $0x9] sm:$0x1] }
0x16cc   : > { %v4551_v56 = vadd.f32 %v4550_v23, %v4541_v19 }
0x16ce   : > { %4552 = vst.msk [vmem:[#allocation5 + $0x8] sm:$0x1] %vm2999_vm12, %v4551_v56  ;;  %7258 = vmatmul.mubr.msk.f32.vlgmr.msra.gmra.mrb[30].mxu1 %vm1081_vm4, %v4551_v56 }
0x16cf   : > { %7292 = vmatprep.mubr.f32.mxu1 %v4633_v11  ;;  %7948 = vmatpush3.bf16.msra.mxu1 %v9167_v32 }
0x16d0   : > { %7950 = vmatprep.subr.bf16.mxu1 %v9172_v34 }
0x16d3   : > { %7952 = vmatpush3.bf16.msra.mxu1 %v9172_v34 }
0x16d4   : > { %7954 = vmatprep.subr.bf16.mxu1 %v9183_v37 }
0x16d7   : > { %7956 = vmatpush3.bf16.msra.mxu1 %v9183_v37 }
0x16d8   : > { %7958 = vmatprep.subr.bf16.mxu1 %v9317_v55 }
0x16db   : > { %7960 = vmatpush3.bf16.msra.mxu1 %v9317_v55 }
0x16dc   : > { %7962 = vmatprep.subr.bf16.mxu1 %v9329_v30 }
0x16df   : > { %7964 = vmatpush3.bf16.msra.mxu1 %v9329_v30 }
0x16e0   : > { %7966 = vmatprep.subr.bf16.mxu1 %v9341_v39 }
0x16e3   : > { %7968 = vmatpush3.bf16.msra.mxu1 %v9341_v39 }
0x16e4   : > { %7970 = vmatprep.subr.bf16.mxu1 %v9353_v48 }
0x16e7   : > { %7972 = vmatpush3.bf16.msra.mxu1 %v9353_v48 }
0x16e8   : > { %7974 = vmatprep.subr.bf16.mxu1 %v9365_v10 }
0x16eb   : > { %7976 = vmatpush3.bf16.msra.mxu1 %v9365_v10 }
0x16ec   : > { %8012 = vmatprep.subr.bf16.mxu1 %v10024_v49 }
0x17a1   : > { %v4622_v31 = vpop.f32.mrb[30].mxu1 }
0x17a2   : > { %v4623_v53 = vadd.f32 %v9684_v35, %v4622_v31  ;;  %v7259_v42 = vpop.f32.mrb[31].mxu1 }
0x17a4   : > { %v4627_v33 = vmul.f32 %v4626_v0, %v4623_v53 }
0x17a6   : > { %4628 = vst [vmem:[#allocation4 + $0x8] sm:$0x1] %v4627_v33 }
0x17ad   : > { %v4632_v5 = vld [vmem:[#allocation4 + $0x8] sm:$0xff] }
0x17ae   : > { %v4634_v20 = vmul.f32 %v4632_v5, %v9270_v17  ;;  %v4717_v17 = vpop.permute.xlu1 %4716 }
0x17b0   : > { %7293 = vmatmul.mubr.f32.vlgmr.msra.gmra.mrb[32].mxu1 %v4634_v20 }
0x17b1   : > { %8014 = vmatpush3.bf16.msra.mxu1 %v9155_v29  ;;  %7341 = vmatprep.mubr.msk.f32.mxu1 %vm8446_vm6, %v10025_v18 }
0x17b2   : > { %8016 = vmatprep.subr.bf16.mxu1 %v9167_v32  ;;  %v4742_v43 = vpop.permute.xlu1 %4741 }
0x17b6   : > { %v4916_v5 = vpop.permute.xlu1 %4915 }
0x1883   : > { %v7294_v12 = vpop.f32.mrb[32].mxu1 }
0x1884   : > { %v4707_v13 = vadd.f32 %v7294_v12, %v9414_v60  ;;  %v4701_v27 = vpop.f32.mrb[33].mxu1 }
0x1885   : > { %v4702_v6 = vadd.f32 %v4701_v27, %v9416_v62 }
0x1886   : > { %8347 = vtanh.f32 %v4707_v13 }
0x1887   : > { %8349 = vtanh.f32 %v4702_v6 }
0x1890   : > { %v8348_v11 = vpop.eup %8347 }
0x1891   : > { %v8350_v7 = vpop.eup %8349  ;;  %v4725_v40 = vmul.f32 %v8348_v11, %v4722_v28 }
0x1892   : > { %v4724_v47 = vmul.f32 %v8350_v7, %v4717_v17 }
0x1893   : > { %v4727_v1 = vsel %vm1081_vm4, %v4725_v40, 0.0 }
0x1894   : > { %v4726_v54 = vsel %vm1081_vm4, %v4724_v47, 0.0 }
0x1895   : > { %v4728_v61 = vadd.f32 %v4727_v1, %v4726_v54  ;;  %v4929_v54 = vld [vmem:[#allocation5 + $0xa] sm:$0x1] }
0x1897   : > { %v4729_v9 = vrot.slane %v4728_v61, 4 }
0x1899   : > { %v4730_v41 = vadd.f32 %v4729_v9, %v4728_v61 }
0x189b   : > { %v4731_v14 = vrot.slane %v4730_v41, 2 }
0x189d   : > { %v4732_v57 = vadd.f32 %v4731_v14, %v4730_v41 }
0x189f   : > { %v4733_v15 = vrot.slane %v4732_v57, 1 }
0x18a1   : > { %v4734_v4 = vadd.f32 %v4733_v15, %v4732_v57 }
0x18a3   : > { %v4738_v38 = vsub.f32 %v4734_v4, %v4735_v50  ;;  %v5014_v4 = vld [vmem:[#allocation3 + $0xa] sm:$0x1] }
0x18a5   : > { %v4744_v24 = vmul.f32 %v4742_v43, %v4738_v38 }
0x18a7   : > { %v4745_v21 = vadd.f32 %v4744_v24, %v4735_v50 }
0x18a9   : > { %4746 = vst.msk [vmem:[#allocation5 + $0x9] sm:$0x1] %vm2999_vm12, %v4745_v21  ;;  %7300 = vmatmul.mubr.msk.f32.vlgmr.msra.gmra.mrb[62].mxu0 %vm1081_vm4, %v4745_v21 }
0x18aa   : > { %7334 = vmatprep.mubr.f32.mxu0 %v9637_v63  ;;  %7983 = vmatpush3.bf16.msra.mxu0 %v9167_v32 }
0x18ab   : > { %7985 = vmatprep.subr.bf16.mxu0 %v9172_v34 }
0x18ae   : > { %7987 = vmatpush3.bf16.msra.mxu0 %v9172_v34 }
0x18af   : > { %7989 = vmatprep.subr.bf16.mxu0 %v9183_v37 }
0x18b2   : > { %7991 = vmatpush3.bf16.msra.mxu0 %v9183_v37 }
0x18b3   : > { %7993 = vmatprep.subr.bf16.mxu0 %v9317_v55 }
0x18b6   : > { %7995 = vmatpush3.bf16.msra.mxu0 %v9317_v55 }
0x18b7   : > { %7997 = vmatprep.subr.bf16.mxu0 %v9329_v30 }
0x18ba   : > { %7999 = vmatpush3.bf16.msra.mxu0 %v9329_v30 }
0x18bb   : > { %8001 = vmatprep.subr.bf16.mxu0 %v9341_v39 }
0x18be   : > { %8003 = vmatpush3.bf16.msra.mxu0 %v9341_v39 }
0x18bf   : > { %8005 = vmatprep.subr.bf16.mxu0 %v9353_v48 }
0x18c2   : > { %8007 = vmatpush3.bf16.msra.mxu0 %v9353_v48 }
0x18c3   : > { %8009 = vmatprep.subr.bf16.mxu0 %v9365_v10 }
0x18c6   : > { %8011 = vmatpush3.bf16.msra.mxu0 %v9365_v10 }
0x18c7   : > { %8047 = vmatprep.subr.bf16.mxu0 %v10024_v49 }
0x197c   : > { %v4816_v63 = vpop.f32.mrb[62].mxu0 }
0x197d   : > { %v4817_v51 = vadd.f32 %v9684_v35, %v4816_v63  ;;  %v7301_v19 = vpop.f32.mrb[63].mxu0 }
0x197f   : > { %v4821_v25 = vmul.f32 %v4820_v58, %v4817_v51 }
0x1981   : > { %4822 = vst [vmem:[#allocation4 + $0x9] sm:$0x1] %v4821_v25 }
0x1988   : > { %v4826_v23 = vld [vmem:[#allocation4 + $0x8] sm:$0xff] }
0x1989   : > { %v4828_v56 = vmul.f32 %v4826_v23, %v9276_v36  ;;  %v4911_v36 = vpop.permute.xlu0 %4910 }
0x198b   : > { %7335 = vmatmul.mubr.f32.vlgmr.msra.gmra.mrb[64].mxu0 %v4828_v56 }
0x198c   : > { %8049 = vmatpush3.bf16.msra.mxu0 %v9155_v29  ;;  %7383 = vmatprep.mubr.msk.f32.mxu0 %vm8446_vm6, %v10025_v18 }
0x198d   : > { %8051 = vmatprep.subr.bf16.mxu0 %v9167_v32  ;;  %v4936_v9 = vpop.permute.xlu0 %4935 }
0x1991   : > { %v5110_v58 = vpop.permute.xlu0 %5109 }
0x1a5e   : > { %v7336_v31 = vpop.f32.mrb[64].mxu0 }
0x1a5f   : > { %v4901_v53 = vadd.f32 %v7336_v31, %v9414_v60  ;;  %v4895_v42 = vpop.f32.mrb[65].mxu0 }
0x1a60   : > { %v4896_v0 = vadd.f32 %v4895_v42, %v9416_v62 }
0x1a61   : > { %8351 = vtanh.f32 %v4901_v53 }
0x1a62   : > { %8353 = vtanh.f32 %v4896_v0 }
0x1a6b   : > { %v8352_v33 = vpop.eup %8351 }
0x1a6c   : > { %v8354_v20 = vpop.eup %8353  ;;  %v4919_v12 = vmul.f32 %v8352_v33, %v4916_v5 }
0x1a6d   : > { %v4918_v13 = vmul.f32 %v8354_v20, %v4911_v36 }
0x1a6e   : > { %v4921_v27 = vsel %vm1081_vm4, %v4919_v12, 0.0 }
0x1a6f   : > { %v4920_v6 = vsel %vm1081_vm4, %v4918_v13, 0.0  ;;  %v5123_v13 = vld [vmem:[#allocation5 + $0xb] sm:$0x1] }
0x1a70   : > { %v4922_v11 = vadd.f32 %v4921_v27, %v4920_v6 }
0x1a72   : > { %v4923_v28 = vrot.slane %v4922_v11, 4 }
0x1a74   : > { %v4924_v7 = vadd.f32 %v4923_v28, %v4922_v11 }
0x1a76   : > { %v4925_v17 = vrot.slane %v4924_v7, 2 }
0x1a78   : > { %v4926_v40 = vadd.f32 %v4925_v17, %v4924_v7 }
0x1a7a   : > { %v4927_v47 = vrot.slane %v4926_v40, 1 }
0x1a7c   : > { %v4928_v1 = vadd.f32 %v4927_v47, %v4926_v40  ;;  %v5208_v40 = vld [vmem:[#allocation3 + $0xb] sm:$0x1] }
0x1a7e   : > { %v4932_v61 = vsub.f32 %v4928_v1, %v4929_v54 }
0x1a80   : > { %v4938_v41 = vmul.f32 %v4936_v9, %v4932_v61 }
0x1a82   : > { %v4939_v14 = vadd.f32 %v4938_v41, %v4929_v54 }
0x1a84   : > { %4940 = vst.msk [vmem:[#allocation5 + $0xa] sm:$0x1] %vm2999_vm12, %v4939_v14  ;;  %7342 = vmatmul.mubr.msk.f32.vlgmr.msra.gmra.mrb[34].mxu1 %vm1081_vm4, %v4939_v14 }
0x1a85   : > { %7376 = vmatprep.mubr.f32.mxu1 %v9640_v16  ;;  %8018 = vmatpush3.bf16.msra.mxu1 %v9167_v32 }
0x1a86   : > { %8020 = vmatprep.subr.bf16.mxu1 %v9172_v34 }
0x1a89   : > { %8022 = vmatpush3.bf16.msra.mxu1 %v9172_v34 }
0x1a8a   : > { %8024 = vmatprep.subr.bf16.mxu1 %v9183_v37 }
0x1a8d   : > { %8026 = vmatpush3.bf16.msra.mxu1 %v9183_v37 }
0x1a8e   : > { %8028 = vmatprep.subr.bf16.mxu1 %v9317_v55 }
0x1a91   : > { %8030 = vmatpush3.bf16.msra.mxu1 %v9317_v55 }
0x1a92   : > { %8032 = vmatprep.subr.bf16.mxu1 %v9329_v30 }
0x1a95   : > { %8034 = vmatpush3.bf16.msra.mxu1 %v9329_v30 }
0x1a96   : > { %8036 = vmatprep.subr.bf16.mxu1 %v9341_v39 }
0x1a99   : > { %8038 = vmatpush3.bf16.msra.mxu1 %v9341_v39 }
0x1a9a   : > { %8040 = vmatprep.subr.bf16.mxu1 %v9353_v48 }
0x1a9d   : > { %8042 = vmatpush3.bf16.msra.mxu1 %v9353_v48 }
0x1a9e   : > { %8044 = vmatprep.subr.bf16.mxu1 %v9365_v10 }
0x1aa1   : > { %8046 = vmatpush3.bf16.msra.mxu1 %v9365_v10 }
0x1aa2   : > { %8082 = vmatprep.subr.bf16.mxu1 %v10024_v49 }
0x1b57   : > { %v5010_v16 = vpop.f32.mrb[34].mxu1 }
0x1b58   : > { %v5011_v57 = vadd.f32 %v9684_v35, %v5010_v16  ;;  %v7343_v15 = vpop.f32.mrb[35].mxu1 }
0x1b5a   : > { %v5015_v50 = vmul.f32 %v5014_v4, %v5011_v57 }
0x1b5c   : > { %5016 = vst [vmem:[#allocation4 + $0xa] sm:$0x1] %v5015_v50 }
0x1b63   : > { %v5020_v38 = vld [vmem:[#allocation4 + $0x8] sm:$0xff] }
0x1b64   : > { %v5022_v43 = vmul.f32 %v5020_v38, %v9282_v46  ;;  %v5105_v46 = vpop.permute.xlu1 %5104 }
0x1b66   : > { %7377 = vmatmul.mubr.f32.vlgmr.msra.gmra.mrb[36].mxu1 %v5022_v43 }
0x1b67   : > { %8084 = vmatpush3.bf16.msra.mxu1 %v9155_v29  ;;  %7425 = vmatprep.mubr.msk.f32.mxu1 %vm8446_vm6, %v10025_v18 }
0x1b68   : > { %8086 = vmatprep.subr.bf16.mxu1 %v9167_v32  ;;  %v5130_v6 = vpop.permute.xlu1 %5129 }
0x1b6c   : > { %v5304_v57 = vpop.permute.xlu1 %5303 }
0x1c39   : > { %v7378_v24 = vpop.f32.mrb[36].mxu1 }
0x1c3a   : > { %v5095_v21 = vadd.f32 %v7378_v24, %v9414_v60  ;;  %v5089_v63 = vpop.f32.mrb[37].mxu1 }
0x1c3b   : > { %v5090_v51 = vadd.f32 %v5089_v63, %v9416_v62 }
0x1c3c   : > { %8355 = vtanh.f32 %v5095_v21 }
0x1c3d   : > { %8357 = vtanh.f32 %v5090_v51 }
0x1c46   : > { %v8356_v19 = vpop.eup %8355 }
0x1c47   : > { %v8358_v25 = vpop.eup %8357  ;;  %v5113_v23 = vmul.f32 %v8356_v19, %v5110_v58 }
0x1c48   : > { %v5112_v56 = vmul.f32 %v8358_v25, %v5105_v46  ;;  %v5317_v46 = vld [vmem:[#allocation5 + $0xc] sm:$0x1] }
0x1c49   : > { %v5115_v31 = vsel %vm1081_vm4, %v5113_v23, 0.0 }
0x1c4a   : > { %v5114_v53 = vsel %vm1081_vm4, %v5112_v56, 0.0 }
0x1c4b   : > { %v5116_v42 = vadd.f32 %v5115_v31, %v5114_v53 }
0x1c4d   : > { %v5117_v0 = vrot.slane %v5116_v42, 4 }
0x1c4f   : > { %v5118_v33 = vadd.f32 %v5117_v0, %v5116_v42 }
0x1c51   : > { %v5119_v5 = vrot.slane %v5118_v33, 2 }
0x1c53   : > { %v5120_v20 = vadd.f32 %v5119_v5, %v5118_v33  ;;  %v5402_v33 = vld [vmem:[#allocation3 + $0xc] sm:$0x1] }
0x1c55   : > { %v5121_v36 = vrot.slane %v5120_v20, 1 }
0x1c57   : > { %v5122_v12 = vadd.f32 %v5121_v36, %v5120_v20 }
0x1c59   : > { %v5126_v27 = vsub.f32 %v5122_v12, %v5123_v13 }
0x1c5b   : > { %v5132_v11 = vmul.f32 %v5130_v6, %v5126_v27 }
0x1c5d   : > { %v5133_v28 = vadd.f32 %v5132_v11, %v5123_v13 }
0x1c5f   : > { %5134 = vst.msk [vmem:[#allocation5 + $0xb] sm:$0x1] %vm2999_vm12, %v5133_v28  ;;  %7384 = vmatmul.mubr.msk.f32.vlgmr.msra.gmra.mrb[66].mxu0 %vm1081_vm4, %v5133_v28 }
0x1c60   : > { %7418 = vmatprep.mubr.f32.mxu0 %v9643_v52  ;;  %8053 = vmatpush3.bf16.msra.mxu0 %v9167_v32 }
0x1c61   : > { %8055 = vmatprep.subr.bf16.mxu0 %v9172_v34 }
0x1c64   : > { %8057 = vmatpush3.bf16.msra.mxu0 %v9172_v34 }
0x1c65   : > { %8059 = vmatprep.subr.bf16.mxu0 %v9183_v37 }
0x1c68   : > { %8061 = vmatpush3.bf16.msra.mxu0 %v9183_v37 }
0x1c69   : > { %8063 = vmatprep.subr.bf16.mxu0 %v9317_v55 }
0x1c6c   : > { %8065 = vmatpush3.bf16.msra.mxu0 %v9317_v55 }
0x1c6d   : > { %8067 = vmatprep.subr.bf16.mxu0 %v9329_v30 }
0x1c70   : > { %8069 = vmatpush3.bf16.msra.mxu0 %v9329_v30 }
0x1c71   : > { %8071 = vmatprep.subr.bf16.mxu0 %v9341_v39 }
0x1c74   : > { %8073 = vmatpush3.bf16.msra.mxu0 %v9341_v39 }
0x1c75   : > { %8075 = vmatprep.subr.bf16.mxu0 %v9353_v48 }
0x1c78   : > { %8077 = vmatpush3.bf16.msra.mxu0 %v9353_v48 }
0x1c79   : > { %8079 = vmatprep.subr.bf16.mxu0 %v9365_v10 }
0x1c7c   : > { %8081 = vmatpush3.bf16.msra.mxu0 %v9365_v10 }
0x1c7d   : > { %8117 = vmatprep.subr.bf16.mxu0 %v10024_v49 }
0x1d32   : > { %v5204_v52 = vpop.f32.mrb[66].mxu0 }
0x1d33   : > { %v5205_v7 = vadd.f32 %v9684_v35, %v5204_v52  ;;  %v7385_v17 = vpop.f32.mrb[67].mxu0 }
0x1d35   : > { %v5209_v47 = vmul.f32 %v5208_v40, %v5205_v7 }
0x1d37   : > { %5210 = vst [vmem:[#allocation4 + $0xb] sm:$0x1] %v5209_v47 }
0x1d3e   : > { %v5214_v1 = vld [vmem:[#allocation4 + $0x8] sm:$0xff] }
0x1d3f   : > { %v5216_v54 = vmul.f32 %v5214_v1, %v9288_v26  ;;  %v5299_v26 = vpop.permute.xlu0 %5298 }
0x1d41   : > { %7419 = vmatmul.mubr.f32.vlgmr.msra.gmra.mrb[68].mxu0 %v5216_v54 }
0x1d42   : > { %8119 = vmatpush3.bf16.msra.mxu0 %v9155_v29  ;;  %7467 = vmatprep.mubr.msk.f32.mxu0 %vm8446_vm6, %v10025_v18 }
0x1d43   : > { %8121 = vmatprep.subr.bf16.mxu0 %v9167_v32  ;;  %v5324_v56 = vpop.permute.xlu0 %5323 }
0x1d47   : > { %v5498_v28 = vpop.permute.xlu0 %5497 }
0x1e14   : > { %v7420_v61 = vpop.f32.mrb[68].mxu0 }
0x1e15   : > { %v5289_v9 = vadd.f32 %v7420_v61, %v9414_v60  ;;  %v5283_v41 = vpop.f32.mrb[69].mxu0 }
0x1e16   : > { %v5284_v14 = vadd.f32 %v5283_v41, %v9416_v62 }
0x1e17   : > { %8359 = vtanh.f32 %v5289_v9 }
0x1e18   : > { %8361 = vtanh.f32 %v5284_v14 }
0x1e21   : > { %v8360_v16 = vpop.eup %8359 }
0x1e22   : > { %v8362_v15 = vpop.eup %8361  ;;  %v5307_v4 = vmul.f32 %v8360_v16, %v5304_v57  ;;  %v5511_v57 = vld [vmem:[#allocation5 + $0xd] sm:$0x1] }
0x1e23   : > { %v5306_v50 = vmul.f32 %v8362_v15, %v5299_v26 }
0x1e24   : > { %v5309_v38 = vsel %vm1081_vm4, %v5307_v4, 0.0 }
0x1e25   : > { %v5308_v43 = vsel %vm1081_vm4, %v5306_v50, 0.0 }
0x1e26   : > { %v5310_v24 = vadd.f32 %v5309_v38, %v5308_v43 }
0x1e28   : > { %v5311_v21 = vrot.slane %v5310_v24, 4 }
0x1e2a   : > { %v5312_v63 = vadd.f32 %v5311_v21, %v5310_v24  ;;  %v5596_v24 = vld [vmem:[#allocation3 + $0xd] sm:$0x1] }
0x1e2c   : > { %v5313_v51 = vrot.slane %v5312_v63, 2 }
0x1e2e   : > { %v5314_v19 = vadd.f32 %v5313_v51, %v5312_v63 }
0x1e30   : > { %v5315_v58 = vrot.slane %v5314_v19, 1 }
0x1e32   : > { %v5316_v25 = vadd.f32 %v5315_v58, %v5314_v19 }
0x1e34   : > { %v5320_v23 = vsub.f32 %v5316_v25, %v5317_v46 }
0x1e36   : > { %v5326_v31 = vmul.f32 %v5324_v56, %v5320_v23 }
0x1e38   : > { %v5327_v53 = vadd.f32 %v5326_v31, %v5317_v46 }
0x1e3a   : > { %5328 = vst.msk [vmem:[#allocation5 + $0xc] sm:$0x1] %vm2999_vm12, %v5327_v53  ;;  %7426 = vmatmul.mubr.msk.f32.vlgmr.msra.gmra.mrb[38].mxu1 %vm1081_vm4, %v5327_v53 }
0x1e3b   : > { %7460 = vmatprep.mubr.f32.mxu1 %v9646_v3  ;;  %8088 = vmatpush3.bf16.msra.mxu1 %v9167_v32 }
0x1e3c   : > { %8090 = vmatprep.subr.bf16.mxu1 %v9172_v34 }
0x1e3f   : > { %8092 = vmatpush3.bf16.msra.mxu1 %v9172_v34 }
0x1e40   : > { %8094 = vmatprep.subr.bf16.mxu1 %v9183_v37 }
0x1e43   : > { %8096 = vmatpush3.bf16.msra.mxu1 %v9183_v37 }
0x1e44   : > { %8098 = vmatprep.subr.bf16.mxu1 %v9317_v55 }
0x1e47   : > { %8100 = vmatpush3.bf16.msra.mxu1 %v9317_v55 }
0x1e48   : > { %8102 = vmatprep.subr.bf16.mxu1 %v9329_v30 }
0x1e4b   : > { %8104 = vmatpush3.bf16.msra.mxu1 %v9329_v30 }
0x1e4c   : > { %8106 = vmatprep.subr.bf16.mxu1 %v9341_v39 }
0x1e4f   : > { %8108 = vmatpush3.bf16.msra.mxu1 %v9341_v39 }
0x1e50   : > { %8110 = vmatprep.subr.bf16.mxu1 %v9353_v48 }
0x1e53   : > { %8112 = vmatpush3.bf16.msra.mxu1 %v9353_v48 }
0x1e54   : > { %8114 = vmatprep.subr.bf16.mxu1 %v9365_v10 }
0x1e57   : > { %8116 = vmatpush3.bf16.msra.mxu1 %v9365_v10 }
0x1e58   : > { %8152 = vmatprep.subr.bf16.mxu1 %v10024_v49 }
0x1f0d   : > { %v5398_v3 = vpop.f32.mrb[38].mxu1 }
0x1f0e   : > { %v5399_v42 = vadd.f32 %v9684_v35, %v5398_v3  ;;  %v7427_v0 = vpop.f32.mrb[39].mxu1 }
0x1f10   : > { %v5403_v5 = vmul.f32 %v5402_v33, %v5399_v42 }
0x1f12   : > { %5404 = vst [vmem:[#allocation4 + $0xc] sm:$0x1] %v5403_v5 }
0x1f19   : > { %v5408_v20 = vld [vmem:[#allocation4 + $0x8] sm:$0xff] }
0x1f1a   : > { %v5410_v36 = vmul.f32 %v5408_v20, %v9294_v44  ;;  %v5493_v44 = vpop.permute.xlu1 %5492 }
0x1f1c   : > { %7461 = vmatmul.mubr.f32.vlgmr.msra.gmra.mrb[40].mxu1 %v5410_v36 }
0x1f1d   : > { %8154 = vmatpush3.bf16.msra.mxu1 %v9155_v29  ;;  %7509 = vmatprep.mubr.msk.f32.mxu1 %vm8446_vm6, %v10025_v18 }
0x1f1e   : > { %8156 = vmatprep.subr.bf16.mxu1 %v9167_v32  ;;  %v5518_v26 = vpop.permute.xlu1 %5517 }
0x1f22   : > { %v5692_v56 = vpop.permute.xlu1 %5691 }
0x1fef   : > { %v7462_v12 = vpop.f32.mrb[40].mxu1 }
0x1ff0   : > { %v5483_v13 = vadd.f32 %v7462_v12, %v9414_v60  ;;  %v5477_v27 = vpop.f32.mrb[41].mxu1 }
0x1ff1   : > { %v5478_v6 = vadd.f32 %v5477_v27, %v9416_v62 }
0x1ff2   : > { %8363 = vtanh.f32 %v5483_v13  ;;  %v5705_v13 = vld [vmem:[#allocation5 + $0xe] sm:$0x1] }
0x1ff3   : > { %8365 = vtanh.f32 %v5478_v6 }
0x1ffc   : > { %v8364_v11 = vpop.eup %8363 }
0x1ffd   : > { %v8366_v52 = vpop.eup %8365  ;;  %v5501_v7 = vmul.f32 %v8364_v11, %v5498_v28 }
0x1ffe   : > { %v5500_v17 = vmul.f32 %v8366_v52, %v5493_v44 }
0x1fff   : > { %v5503_v40 = vsel %vm1081_vm4, %v5501_v7, 0.0 }
0x2000   : > { %v5502_v47 = vsel %vm1081_vm4, %v5500_v17, 0.0 }
0x2001   : > { %v5504_v1 = vadd.f32 %v5503_v40, %v5502_v47  ;;  %v5881_v47 = vpop.permute.xlu1 %5880 }
0x2003   : > { %v5505_v54 = vrot.slane %v5504_v1, 4 }
0x2005   : > { %v5506_v61 = vadd.f32 %v5505_v54, %v5504_v1 }
0x2007   : > { %v5507_v9 = vrot.slane %v5506_v61, 2 }
0x2009   : > { %v5508_v41 = vadd.f32 %v5507_v9, %v5506_v61 }
0x200b   : > { %v5509_v14 = vrot.slane %v5508_v41, 1 }
0x200d   : > { %v5510_v16 = vadd.f32 %v5509_v14, %v5508_v41 }
0x200f   : > { %v5514_v15 = vsub.f32 %v5510_v16, %v5511_v57 }
0x2011   : > { %v5520_v4 = vmul.f32 %v5518_v26, %v5514_v15 }
0x2013   : > { %v5521_v50 = vadd.f32 %v5520_v4, %v5511_v57  ;;  %v5906_v4 = vpop.permute.xlu1 %5905 }
0x2015   : > { %5522 = vst.msk [vmem:[#allocation5 + $0xd] sm:$0x1] %vm2999_vm12, %v5521_v50  ;;  %7468 = vmatmul.mubr.msk.f32.vlgmr.msra.gmra.mrb[70].mxu0 %vm1081_vm4, %v5521_v50 }
0x2016   : > { %7502 = vmatprep.mubr.f32.mxu0 %v9649_v22  ;;  %8123 = vmatpush3.bf16.msra.mxu0 %v9167_v32 }
0x2017   : > { %8125 = vmatprep.subr.bf16.mxu0 %v9172_v34 }
0x201a   : > { %8127 = vmatpush3.bf16.msra.mxu0 %v9172_v34 }
0x201b   : > { %8129 = vmatprep.subr.bf16.mxu0 %v9183_v37 }
0x201e   : > { %8131 = vmatpush3.bf16.msra.mxu0 %v9183_v37 }
0x201f   : > { %8133 = vmatprep.subr.bf16.mxu0 %v9317_v55 }
0x2022   : > { %8135 = vmatpush3.bf16.msra.mxu0 %v9317_v55 }
0x2023   : > { %8137 = vmatprep.subr.bf16.mxu0 %v9329_v30 }
0x2026   : > { %8139 = vmatpush3.bf16.msra.mxu0 %v9329_v30 }
0x2027   : > { %8141 = vmatprep.subr.bf16.mxu0 %v9341_v39 }
0x202a   : > { %8143 = vmatpush3.bf16.msra.mxu0 %v9341_v39 }
0x202b   : > { %8145 = vmatprep.subr.bf16.mxu0 %v9353_v48 }
0x202e   : > { %8147 = vmatpush3.bf16.msra.mxu0 %v9353_v48 }
0x202f   : > { %8149 = vmatprep.subr.bf16.mxu0 %v9365_v10 }
0x2032   : > { %8151 = vmatpush3.bf16.msra.mxu0 %v9365_v10 }
0x2033   : > { %8187 = vmatprep.subr.bf16.mxu0 %v10024_v49 }
0x20e8   : > { %v5592_v22 = vpop.f32.mrb[70].mxu0 }
0x20e9   : > { %v5593_v38 = vadd.f32 %v9684_v35, %v5592_v22  ;;  %v7469_v43 = vpop.f32.mrb[71].mxu0 }
0x20eb   : > { %v5597_v21 = vmul.f32 %v5596_v24, %v5593_v38  ;;  %v5987_v38 = vld [vmem:[#allocation5] sm:$0xff] }
0x20ed   : > { %5598 = vst [vmem:[#allocation4 + $0xd] sm:$0x1] %v5597_v21  ;;  %v8378_v21 = vld [vmem:[%s10016_s3] sm:$0xff] }
0x20f4   : > { %v5602_v63 = vld [vmem:[#allocation4 + $0x8] sm:$0xff] }
0x20f5   : > { %v5604_v51 = vmul.f32 %v5602_v63, %v9300_v59  ;;  %v5687_v59 = vpop.permute.xlu0 %5686 }
0x20f7   : > { %7503 = vmatmul.mubr.f32.vlgmr.msra.gmra.mrb[72].mxu0 %v5604_v51 }
0x20f8   : > { %8189 = vmatpush3.bf16.msra.mxu0 %v9155_v29  ;;  %7551 = vmatprep.mubr.msk.f32.mxu0 %vm8446_vm6, %v10025_v18 }
0x20f9   : > { %8190 = vmatprep.subr.bf16.mxu0 %v10024_v49  ;;  %v5712_v6 = vpop.permute.xlu0 %5711 }
0x20fd   : > { %v5886_v17 = vpop.permute.xlu0 %5885 }
0x21ca   : > { %v7504_v19 = vpop.f32.mrb[72].mxu0 }
0x21cb   : > { %v5677_v58 = vadd.f32 %v7504_v19, %v9414_v60  ;;  %v5671_v25 = vpop.f32.mrb[73].mxu0 }
0x21cc   : > { %v5672_v46 = vadd.f32 %v5671_v25, %v9416_v62 }
0x21cd   : > { %8367 = vtanh.f32 %v5677_v58  ;;  %v5984_v58 = vld [vmem:[#allocation3 + $0xf] sm:$0x1] }
0x21ce   : > { %8369 = vtanh.f32 %v5672_v46 }
0x21d7   : > { %v8368_v23 = vpop.eup %8367 }
0x21d8   : > { %v8370_v31 = vpop.eup %8369  ;;  %v5695_v53 = vmul.f32 %v8368_v23, %v5692_v56 }
0x21d9   : > { %v5694_v3 = vmul.f32 %v8370_v31, %v5687_v59 }
0x21da   : > { %v5697_v29 = vsel %vm1081_vm4, %v5695_v53, 0.0 }
0x21db   : > { %v5696_v42 = vsel %vm1081_vm4, %v5694_v3, 0.0  ;;  %v8379_v3 = vld [vmem:[%s8671_s28] sm:$0xff] }
0x21dc   : > { %v5698_v0 = vadd.f32 %v5697_v29, %v5696_v42 }
0x21de   : > { %v5699_v49 = vrot.slane %v5698_v0, 4 }
0x21e0   : > { %v5700_v33 = vadd.f32 %v5699_v49, %v5698_v0 }
0x21e2   : > { %v5701_v5 = vrot.slane %v5700_v33, 2 }
0x21e4   : > { %v5702_v20 = vadd.f32 %v5701_v5, %v5700_v33 }
0x21e6   : > { %v5703_v36 = vrot.slane %v5702_v20, 1 }
0x21e8   : > { %v5704_v12 = vadd.f32 %v5703_v36, %v5702_v20 }
0x21ea   : > { %v5708_v27 = vsub.f32 %v5704_v12, %v5705_v13 }
0x21ec   : > { %v5714_v11 = vmul.f32 %v5712_v6, %v5708_v27 }
0x21ee   : > { %v5715_v28 = vadd.f32 %v5714_v11, %v5705_v13 }
0x21f0   : > { %5716 = vst.msk [vmem:[#allocation5 + $0xe] sm:$0x1] %vm2999_vm12, %v5715_v28  ;;  %7510 = vmatmul.mubr.msk.f32.vlgmr.msra.gmra.mrb[42].mxu1 %vm1081_vm4, %v5715_v28 }
0x21f1   : > { %7544 = vmatprep.mubr.f32.mxu1 %v9652_v8  ;;  %8158 = vmatpush3.bf16.msra.mxu1 %v9167_v32 }
0x21f2   : > { %8160 = vmatprep.subr.bf16.mxu1 %v9172_v34 }
0x21f5   : > { %8162 = vmatpush3.bf16.msra.mxu1 %v9172_v34 }
0x21f6   : > { %8164 = vmatprep.subr.bf16.mxu1 %v9183_v37 }
0x21f9   : > { %8166 = vmatpush3.bf16.msra.mxu1 %v9183_v37 }
0x21fa   : > { %8168 = vmatprep.subr.bf16.mxu1 %v9317_v55 }
0x21fd   : > { %8170 = vmatpush3.bf16.msra.mxu1 %v9317_v55  ;;  %v5790_v55 = vld [vmem:[#allocation3 + $0xe] sm:$0x1] }
0x21fe   : > { %8172 = vmatprep.subr.bf16.mxu1 %v9329_v30 }
0x2201   : > { %8174 = vmatpush3.bf16.msra.mxu1 %v9329_v30 }
0x2202   : > { %8176 = vmatprep.subr.bf16.mxu1 %v9341_v39 }
0x2205   : > { %8178 = vmatpush3.bf16.msra.mxu1 %v9341_v39 }
0x2206   : > { %8180 = vmatprep.subr.bf16.mxu1 %v9353_v48 }
0x2209   : > { %8182 = vmatpush3.bf16.msra.mxu1 %v9353_v48 }
0x220a   : > { %8184 = vmatprep.subr.bf16.mxu1 %v9365_v10 }
0x220d   : > { %8186 = vmatpush3.bf16.msra.mxu1 %v9365_v10 }
0x22c3   : > { %v5786_v32 = vpop.f32.mrb[42].mxu1 }
0x22c4   : > { %v5787_v34 = vadd.f32 %v9684_v35, %v5786_v32  ;;  %v7511_v37 = vpop.f32.mrb[43].mxu1 }
0x22c6   : > { %v5791_v8 = vmul.f32 %v5790_v55, %v5787_v34 }
0x22c8   : > { %5792 = vst [vmem:[#allocation4 + $0xe] sm:$0x1] %v5791_v8 }
0x22cf   : > { %v5796_v30 = vld [vmem:[#allocation4 + $0x8] sm:$0xff] }
0x22d0   : > { %v5798_v52 = vmul.f32 %v5796_v30, %v9306_v2 }
0x22d2   : > { %7545 = vmatmul.mubr.f32.vlgmr.msra.gmra.mrb[44].mxu1 %v5798_v52 }
0x23a5   : > { %v7546_v39 = vpop.f32.mrb[44].mxu1 }
0x23a6   : > { %v5871_v44 = vadd.f32 %v7546_v39, %v9414_v60  ;;  %v5865_v7 = vpop.f32.mrb[45].mxu1 }
0x23a7   : > { %v5866_v48 = vadd.f32 %v5865_v7, %v9416_v62  ;;  %v5899_v62 = vld [vmem:[#allocation5 + $0xf] sm:$0x1] }
0x23a8   : > { %8371 = vtanh.f32 %v5871_v44 }
0x23a9   : > { %8373 = vtanh.f32 %v5866_v48 }
0x23b2   : > { %v8372_v10 = vpop.eup %8371 }
0x23b3   : > { %v8374_v40 = vpop.eup %8373  ;;  %v5889_v1 = vmul.f32 %v8372_v10, %v5886_v17 }
0x23b4   : > { %v5888_v54 = vmul.f32 %v8374_v40, %v5881_v47 }
0x23b5   : > { %v5891_v61 = vsel %vm1081_vm4, %v5889_v1, 0.0 }
0x23b6   : > { %v5890_v9 = vsel %vm1081_vm4, %v5888_v54, 0.0 }
0x23b7   : > { %v5892_v2 = vadd.f32 %v5891_v61, %v5890_v9 }
0x23b9   : > { %v5893_v41 = vrot.slane %v5892_v2, 4 }
0x23bb   : > { %v5894_v14 = vadd.f32 %v5893_v41, %v5892_v2 }
0x23bd   : > { %v5895_v16 = vrot.slane %v5894_v14, 2 }
0x23bf   : > { %v5896_v60 = vadd.f32 %v5895_v16, %v5894_v14 }
0x23c1   : > { %v5897_v57 = vrot.slane %v5896_v60, 1 }
0x23c3   : > { %v5898_v15 = vadd.f32 %v5897_v57, %v5896_v60 }
0x23c5   : > { %v5902_v26 = vsub.f32 %v5898_v15, %v5899_v62 }
0x23c7   : > { %v5908_v50 = vmul.f32 %v5906_v4, %v5902_v26 }
0x23c9   : > { %v5909_v22 = vadd.f32 %v5908_v50, %v5899_v62 }
0x23cb   : > { %5910 = vst.msk [vmem:[#allocation5 + $0xf] sm:$0x1] %vm2999_vm12, %v5909_v22  ;;  %7552 = vmatmul.mubr.msk.f32.vlgmr.msra.gmra.mrb[74].mxu0 %vm1081_vm4, %v5909_v22 }
0x23cc   : > { %7558 = vmatprep.mubr.msk.f32.mxu0 %vm8446_vm6, %v10025_v18 }
0x23d2   : > { %v5988_v43 = vld [vmem:[#allocation5 + $0x8] sm:$0xff] }
0x23d3   : > { %v8191_v24 = vpack.c.bf16 %v5988_v43, %v5987_v38 }
0x23d5   : > { %8192 = vmatpush3.bf16.msra.mxu0 %v8191_v24 }
0x23d8   : > { %7559 = vmatmul.mubr.msk.f32.vlgmr.msra.gmra.mrb[76].mxu0 %vm1081_vm4, %v8378_v21 }
0x249e   : > { %v5980_v63 = vpop.f32.mrb[74].mxu0 }
0x249f   : > { %v5981_v51 = vadd.f32 %v9684_v35, %v5980_v63  ;;  %v7553_v19 = vpop.f32.mrb[75].mxu0 }
0x24a1   : > { %v5985_v25 = vmul.f32 %v5984_v58, %v5981_v51 }
0x24a3   : > { %5986 = vst [vmem:[#allocation4 + $0xf] sm:$0x1] %v5985_v25 }
0x24ab   : > { %v6055_v18 = vpop.f32.mrb[76].mxu0 }
0x24ac   : > { %v6059_v46 = vmul.f32 %v6055_v18, %v6055_v18  ;;  %v7560_v23 = vpop.f32.mrb[77].mxu0 }
0x24ae   : > { %v6060_v56 = vsel %vm1081_vm4, %v6059_v46, 0.0 }
0x24af   : > { %6061 = vadd.xlane.f32.xlu0 %v6060_v56 }
0x253c   : > { %v6062_v31 = vpop.xlane.xlu0 %6061 }
0x253d   : > { %v6063_v59 = vadd.f32 1e-12, %v6062_v31 }
0x253f   : > { %8375 = vrsqrt.f32 %v6063_v59 }
0x2549   : > { %v8376_v35 = vpop.eup %8375 }
0x254a   : > { %v6065_v53 = vmul.f32 %v8376_v35, %v6055_v18 }
0x254c   : > { %v6066_v29 = vsel %vm1623_vm8, %v6065_v53, %v8379_v3 }
0x254d   : > { %6067 = vst.msk [vmem:[%s881_s8] sm:$0xff] %vm1081_vm4, %v6066_v29 }
0x254e   : > { %8393 = shalt.err (!%p8390_p3)
}
0x254f   : > { %s8394_s28 = scalar_lea.hbm %s9880_s7, 128  ;;  %s8398_s10 = scalar_lea.hbm %s10028_s12, 256 }
0x2550   : > { %p8395_p4 = scmp.ne.s32.totalorder %s9880_s7, %s8394_s28  ;;  %p8399_p9 = scmp.lt.u32.totalorder %s9880_s7, %s10028_s12 }
0x2551   : > { %p8400_p10 = scmp.lt.u32.totalorder %s8398_s10, %s8394_s28  ;;  %p8402_p12 = scmp.lt.u32.totalorder %s8394_s28, %s9880_s7 }
0x2552   : > { %p8396_p7 = pnand %p8395_p4, %p8633_p5 }
0x2553   : > { %p8401_p11 = por %p8400_p10, %p8399_p9 }
0x2554   : > { %p8397_p8 = pneg %p8396_p7 }
0x2555   : > { %p8403_p13 = por %p8402_p12, %p8401_p11 }
0x2557   : > { %p8404_p0 = pnand %p8403_p13, %p8397_p8 }
0x2559   : > { %8407 = shalt.err (!%p8404_p0)
}
0x255a   : > { %8195 = dma.vmem_to_hbm [thread:$0]  (%p8633_p5), %s9882_s30, 128, %s9880_s7, %s6069_s6  }
0x255b PF: > { %s10029_s9 = sld [smem:[#allocation11_spill]]  ;;  %s10030_s2 = sld [smem:[#allocation9_spill]] }
0x2561   : > { %p8201_p1 = scmp.ge.s32.totalorder %s10029_s9, 2  ;;  %s6094_s8 = sand.u32 1, %s10030_s2  }
0x2562   : > { %s6095_s1 = scalar_lea.sflag [#allocation7], %s6094_s8 }
0x2563   : > { %p8198_p2 = pnand %p8201_p1, %p8637_p6 }
0x2565   : > { %8425 = dma.done.wait (!%p8198_p2), %s6095_s1, 128  }
0x2566   : > { %8427 = vsyncadd (!%p8198_p2), %s6095_s1, 4294967168  ;;  %s10032_s30 = sld [smem:[#allocation13_spill]]  ;;  %s10033_s28 = sld [smem:[#allocation10_spill]] }
0x2567   : > { %s10034_s9 = sld [smem:[#allocation14_spill]]  ;;  %s10035_s8 = smov %s8434_s5 }
0x256c   : > { %p38_p3 = scmp.ge.s32.totalorder %s10032_s30, 4   ;;  %s10036_s5 = smov %s10033_s28 }
0x256e   :  { %40 = sbr.rel (!%p38_p3) target bundleno = 18 (0x12), region = 176 }
0x2575   :  { %6100 = vsyncpa [#allocation7], 1 }
0x2576   :  { %6102 = vsyncpa [#allocation7 + $0x1], 1 }

</bundles_post_ra>
